<compile_context>
chip_gen: v5e
topology: v5e:2x2
jax: 0.10.0
libtpu: 0.0.40
codegen_flags: <defaults>
</compile_context>

<pallas_src>
import functools

import jax
import jax.numpy as jnp
from jax.experimental import pallas as pl
from jax.experimental.pallas import tpu as pltpu

LANE = 128   # lane width (final output channels padded to this)
SUB = 16     # bf16 sublane packing (contraction channels padded to this)


def _round_up(x, m):
    return ((x + m - 1) // m) * m


def _vmem_limit(est_bytes):
    """Explicit VMEM request: 2x the estimate, capped at 48 MiB so there is
    headroom under v7x's 64 MiB physical VMEM for Mosaic internal scratch."""
    return int(min(48 * 2**20, max(16 * 2**20, 2 * int(est_bytes))))


# --------------------- fused matmul + bias (+res) + relu ----------------------

def _mm_bias_kernel(*refs, n_mm, has_res, relu):
    """out = [relu]( sum_i x_i @ w_i + bias [+ residual] ); bf16 MXU, f32 acc."""
    o_ref = refs[-1]
    b_ref = refs[2 * n_mm]
    acc = None
    for i in range(n_mm):
        part = jnp.dot(refs[2 * i][...], refs[2 * i + 1][...],
                       preferred_element_type=jnp.float32)
        acc = part if acc is None else acc + part
    acc = acc + b_ref[...]                       # folded-BN bias (f32)
    if has_res:
        acc = acc + refs[2 * n_mm + 1][...].astype(jnp.float32)
    if relu:
        acc = jnp.maximum(acc, 0.0)
    o_ref[...] = acc.astype(o_ref.dtype)


def _pick_tm(m, row_bytes):
    """Row tile for the 2-D matmul calls.

    Prefers (a) tiles dividing M (no padded row slab), (b) an even step count
    with >=2 steps per v7x TensorCore, (c) multiples of 256 (v6e/v7x MXU
    block), under a ~24 MiB VMEM working-set cap."""
    cap = max(128, min(1024, (24 * 2**20) // max(1, row_bytes)))
    cap = (cap // 128) * 128
    if m <= 256:
        return _round_up(m, SUB)
    candidates = [t for t in (1024, 768, 512, 384, 256, 128) if t <= cap]
    # >= 4 even steps (>=2 per v7x core) with a reasonably large tile.
    for t in candidates:
        if t >= 256 and m % t == 0 and (m // t) % 2 == 0 and m // t >= 4:
            return t
    # even step count (one or more steps per core).
    for t in candidates:
        if m % t == 0 and (m // t) % 2 == 0:
            return t
    # plain halving (2 steps -> one per v7x core).
    if m <= 2 * cap and m % 2 == 0 and (m // 2) % 8 == 0:
        return m // 2
    for t in candidates:
        if m % t == 0:
            return t
    return max(128, min(cap, 512, _round_up(m, SUB)))   # padded-tail fallback


def fused_matmul_bias(branches, bias, *, residual=None, relu=True,
                      out_dtype=jnp.bfloat16):
    """out = [relu]( sum_i x_i @ w_i + bias [+ residual] ).

    branches: list of (x2d bf16 (M, K_i), w bf16 (K_i, Cout)); the folded BN
    scale must already be multiplied into w.  bias: f32 (Cout,), the sum of
    the branches' folded-BN biases."""
    M = branches[0][0].shape[0]
    Cout = branches[0][1].shape[1]
    out_bytes = jnp.dtype(out_dtype).itemsize

    # Approximate VMEM bytes per output row: double-buffered in/out plus the
    # in-kernel f32 part/acc temporaries (review: account for these).
    row_bytes = 2 * Cout * out_bytes + (len(branches) + 1) * Cout * 4
    for x2d, _ in branches:
        row_bytes += 2 * x2d.shape[1] * 2
    if residual is not None:
        row_bytes += 2 * Cout * residual.dtype.itemsize

    tm = _pick_tm(M, row_bytes)
    Mp = _round_up(M, tm)
    grid = (Mp // tm,)

    args, in_specs = [], []
    flops = 0
    bytes_acc = Mp * Cout * out_bytes
    vmem_est = tm * row_bytes
    for (x2d, w) in branches:
        K = x2d.shape[1]
        xp = jnp.pad(x2d, ((0, Mp - M), (0, 0))) if Mp != M else x2d
        args += [xp, w]
        in_specs += [pl.BlockSpec((tm, K), lambda i: (i, 0)),
                     pl.BlockSpec((K, Cout), lambda i: (0, 0))]
        flops += 2 * Mp * K * Cout
        bytes_acc += Mp * K * 2 + K * Cout * 2
        vmem_est += 2 * K * Cout * 2
    args.append(bias.reshape(1, Cout).astype(jnp.float32))
    in_specs.append(pl.BlockSpec((1, Cout), lambda i: (0, 0)))
    bytes_acc += Cout * 4
    vmem_est += 2 * Cout * 4
    if residual is not None:
        rp = jnp.pad(residual, ((0, Mp - M), (0, 0))) if Mp != M else residual
        args.append(rp)
        in_specs.append(pl.BlockSpec((tm, Cout), lambda i: (i, 0)))
        bytes_acc += Mp * Cout * residual.dtype.itemsize

    kernel = functools.partial(_mm_bias_kernel, n_mm=len(branches),
                               has_res=residual is not None, relu=relu)
    out = pl.pallas_call(
        kernel,
        out_shape=jax.ShapeDtypeStruct((Mp, Cout), out_dtype),
        grid=grid,
        in_specs=in_specs,
        out_specs=pl.BlockSpec((tm, Cout), lambda i: (i, 0)),
        compiler_params=pltpu.CompilerParams(
            dimension_semantics=("parallel",),
            vmem_limit_bytes=_vmem_limit(vmem_est)),
        cost_estimate=pl.CostEstimate(flops=flops, transcendentals=0,
                                      bytes_accessed=bytes_acc),
    )(*args)
    return out[:M] if Mp != M else out


# --------------------- 3x3 conv + folded BN + relu (no im2col) ----------------

def _phase_split_pad1(x_nhwc, stride):
    """Zero-pad H/W by 1 and split into stride x stride phases.

    Returns y of shape (N, stride*stride*Hh, Wh, C) with
      y[n, (a*stride+b)*Hh + i, j, :] = padded[n, i*stride + a, j*stride + b, :]
    so every 3x3 tap is a contiguous (rows, cols) window of a single phase
    for any stride (one XLA pass over o1 instead of the 9x im2col slab)."""
    N, H, W, C = x_nhwc.shape
    s = stride
    Hh = -(-(H + 2) // s)
    Wh = -(-(W + 2) // s)
    xp = jnp.pad(x_nhwc,
                 ((0, 0), (1, Hh * s - H - 1), (1, Wh * s - W - 1), (0, 0)))
    xp = xp.reshape(N, Hh, s, Wh, s, C)
    xp = jnp.transpose(xp, (0, 2, 4, 1, 3, 5))           # (N, s, s, Hh, Wh, C)
    return xp.reshape(N, s * s * Hh, Wh, C)


def _conv3x3_bn_relu_kernel(x_ref, w_ref, b_ref, o_ref, *, stride):
    """Per-image 3x3 conv: 9 in-kernel taps, f32 accumulation, bias + ReLU.

    x_ref: (1, s*s*Hh, Wh, Cin) bf16 phase-split halo of o1
    w_ref: (9, Cin, Cout)       bf16 (BN scale already folded in)
    b_ref: (1, Cout)            f32 folded-BN bias
    o_ref: (1, Ho, Wo, Cout)    bf16
    """
    _, Ho, Wo, Cout = o_ref.shape
    s = stride
    hh = x_ref.shape[1] // (s * s)
    bias = b_ref[...]
    for ho in range(Ho):                       # static unroll (Ho is small)
        acc = jnp.zeros((Wo, Cout), jnp.float32)
        for kh in range(3):
            for kw in range(3):
                p = (kh % s) * s + (kw % s)    # phase holding this tap
                row = p * hh + ho + kh // s
                col = kw // s
                acc = acc + jnp.dot(x_ref[0, row, col:col + Wo, :],
                                    w_ref[kh * 3 + kw],
                                    preferred_element_type=jnp.float32)
        acc = jnp.maximum(acc + bias, 0.0)
        o_ref[0, ho, :, :] = acc.astype(o_ref.dtype)


def conv3x3_bn_relu(x_nhwc, w_scaled, bias, *, stride):
    """3x3 / pad=1 / stride conv + folded-BN bias + ReLU without an HBM im2col.

    x_nhwc: (N, H, W, Cin) bf16;  w_scaled: (9, Cin, Cout) bf16;  bias: (Cout,)
    Returns (N, Ho, Wo, Cout) bf16."""
    N, H, W, Cin = x_nhwc.shape
    Cout = w_scaled.shape[-1]
    Ho = (H + 2 - 3) // stride + 1
    Wo = (W + 2 - 3) // stride + 1
    xph = _phase_split_pad1(x_nhwc, stride)             # (N, ss*Hh, Wh, Cin)
    _, sshh, Wh, _ = xph.shape
    b2 = bias.reshape(1, Cout).astype(jnp.float32)

    flops = 2 * N * Ho * Wo * 9 * Cin * Cout
    bytes_acc = (xph.size * 2 + w_scaled.size * 2 + Cout * 4
                 + N * Ho * Wo * Cout * 2)
    vmem_est = (2 * sshh * Wh * Cin * 2        # double-buffered input halo
                + 2 * 9 * Cin * Cout * 2       # weights
                + 2 * Ho * Wo * Cout * 2       # double-buffered output
                + 2 * Wo * Cout * 4 + Cout * 4)  # f32 row accumulator + bias

    kernel = functools.partial(_conv3x3_bn_relu_kernel, stride=stride)
    return pl.pallas_call(
        kernel,
        out_shape=jax.ShapeDtypeStruct((N, Ho, Wo, Cout), jnp.bfloat16),
        grid=(N,),
        in_specs=[
            pl.BlockSpec((1, sshh, Wh, Cin), lambda n: (n, 0, 0, 0)),
            pl.BlockSpec((9, Cin, Cout), lambda n: (0, 0, 0)),
            pl.BlockSpec((1, Cout), lambda n: (0, 0)),
        ],
        out_specs=pl.BlockSpec((1, Ho, Wo, Cout), lambda n: (n, 0, 0, 0)),
        compiler_params=pltpu.CompilerParams(
            dimension_semantics=("parallel",),
            vmem_limit_bytes=_vmem_limit(vmem_est)),
        cost_estimate=pl.CostEstimate(flops=flops, transcendentals=0,
                                      bytes_accessed=bytes_acc),
    )(xph, w_scaled, b2)


# ------------------------------ JAX glue --------------------------------------

def _fold_bn(gamma, beta, mean, var, eps=1e-5):
    scale = gamma * jax.lax.rsqrt(var + eps)
    bias = beta - mean * scale
    return scale, bias


def _pad_last(a, target):
    c = a.shape[-1]
    if c == target:
        return a
    pad = [(0, 0)] * (a.ndim - 1) + [(0, target - c)]
    return jnp.pad(a, pad)


def _pad_mat(w, kt, nt):
    k, n = w.shape
    if k == kt and n == nt:
        return w
    return jnp.pad(w, ((0, kt - k), (0, nt - n)))


def init_bottleneck_params(key, in_planes, planes, stride, expansion=4):
    """Deterministic synthetic parameters (PyTorch weight shapes, converted)."""
    ks = jax.random.split(key, 16)
    p = {}

    def conv_w(k, cout, cin, kh, kw):
        # torch layout (Cout, Cin, KH, KW)
        return jax.random.normal(k, (cout, cin, kh, kw), jnp.float32) * 0.1

    def bn(k, c):
        k1, k2, k3, k4 = jax.random.split(k, 4)
        gamma = 1.0 + 0.1 * jax.random.normal(k1, (c,), jnp.float32)
        beta = 0.1 * jax.random.normal(k2, (c,), jnp.float32)
        mean = 0.1 * jax.random.normal(k3, (c,), jnp.float32)
        var = jax.random.uniform(k4, (c,), jnp.float32, 0.5, 1.5)
        return _fold_bn(gamma, beta, mean, var)

    out_planes = expansion * planes
    w1 = conv_w(ks[0], planes, in_planes, 1, 1)
    p["w1"] = w1[:, :, 0, 0].T                                 # (Cin, Cout)
    p["s1"], p["b1"] = bn(ks[1], planes)
    w2 = conv_w(ks[2], planes, planes, 3, 3)
    p["w2"] = jnp.transpose(w2, (2, 3, 1, 0)).reshape(9 * planes, planes)
    p["s2"], p["b2"] = bn(ks[3], planes)
    w3 = conv_w(ks[4], out_planes, planes, 1, 1)
    p["w3"] = w3[:, :, 0, 0].T
    p["s3"], p["b3"] = bn(ks[5], out_planes)
    if stride != 1 or in_planes != out_planes:
        wsc = conv_w(ks[6], out_planes, in_planes, 1, 1)
        p["ws"] = wsc[:, :, 0, 0].T
        p["ss"], p["bs"] = bn(ks[7], out_planes)
    return p


def bottleneck_forward(params, x_nchw, *, in_planes, planes, stride,
                       expansion=4):
    """Pallas-kernel forward pass.  Input/output in NCHW (PyTorch convention)."""
    out_planes = expansion * planes
    # Contraction / intermediate channels: bf16 sublane (16) padding only.
    # Final output channels: lane-dense multiple of 128.
    cin_p = _round_up(in_planes, SUB)
    pln_p = _round_up(planes, SUB)
    out_p = _round_up(out_planes, LANE)

    x = jnp.transpose(x_nchw, (0, 2, 3, 1))                       # NHWC
    N, H, W, _ = x.shape
    xb = _pad_last(x, cin_p).astype(jnp.bfloat16)

    # BN scale folded into the bf16 weights once; only +bias in the epilogue.
    w1 = _pad_mat(params["w1"] * params["s1"][None, :],
                  cin_p, pln_p).astype(jnp.bfloat16)
    b1 = _pad_last(params["b1"], pln_p)

    w2 = (params["w2"] * params["s2"][None, :]).reshape(9, planes, planes)
    w2 = jnp.pad(w2, ((0, 0), (0, pln_p - planes),
                      (0, pln_p - planes))).astype(jnp.bfloat16)
    b2 = _pad_last(params["b2"], pln_p)

    w3 = _pad_mat(params["w3"] * params["s3"][None, :],
                  pln_p, out_p).astype(jnp.bfloat16)
    b3 = _pad_last(params["b3"], out_p)

    # conv1 (1x1) + bn1 + relu
    M1 = N * H * W
    o1 = fused_matmul_bias([(xb.reshape(M1, cin_p), w1)], b1, relu=True)
    o1 = o1.reshape(N, H, W, pln_p)

    # conv2 (3x3, stride, pad=1) + bn2 + relu -- in-kernel taps, no im2col slab
    o2 = conv3x3_bn_relu(o1, w2, b2, stride=stride)
    _, Ho, Wo, _ = o2.shape
    M2 = N * Ho * Wo
    o2_2d = o2.reshape(M2, pln_p)

    # conv3 (1x1) + bn3 + shortcut + relu fused in one pallas_call, bf16 out
    if stride != 1 or in_planes != out_planes:
        ws = _pad_mat(params["ws"] * params["ss"][None, :],
                      cin_p, out_p).astype(jnp.bfloat16)
        bs = _pad_last(params["bs"], out_p)
        # TODO(synk): strided BlockSpec index_map instead of this HBM slice.
        xs = xb[:, ::stride, ::stride, :].reshape(M2, cin_p)
        o3 = fused_matmul_bias([(o2_2d, w3), (xs, ws)], b3 + bs, relu=True)
    else:
        res = xb if cin_p == out_p else _pad_last(xb, out_p)
        o3 = fused_matmul_bias([(o2_2d, w3)], b3,
                               residual=res.reshape(M1, out_p), relu=True)

    o3 = o3[:, :out_planes].reshape(N, Ho, Wo, out_planes)
    return jnp.transpose(o3, (0, 3, 1, 2)).astype(jnp.float32)    # NCHW


# ------------------------- pure-JAX reference ---------------------------------

def bottleneck_reference(params, x_nchw, *, in_planes, planes, stride,
                         expansion=4):
    """Reference with lax convs mirroring the kernel's bf16-in / f32-acc math
    (BN scale folded into bf16 weights, bf16 intermediates, bf16 final cast)."""
    out_planes = expansion * planes
    x = jnp.transpose(x_nchw, (0, 2, 3, 1)).astype(jnp.float32)
    dn = ("NHWC", "HWIO", "NHWC")

    def conv(inp, w_hwio, scale, bias, stride, pad):
        w = (w_hwio * scale).astype(jnp.bfloat16)
        y = jax.lax.conv_general_dilated(
            inp.astype(jnp.bfloat16), w, (stride, stride), pad,
            dimension_numbers=dn, preferred_element_type=jnp.float32)
        return y + bias

    w1 = params["w1"].reshape(1, 1, in_planes, planes)
    o = jax.nn.relu(conv(x, w1, params["s1"], params["b1"], 1, "VALID"))
    o = o.astype(jnp.bfloat16)
    w2 = params["w2"].reshape(3, 3, planes, planes)
    o = jax.nn.relu(conv(o, w2, params["s2"], params["b2"], stride,
                         ((1, 1), (1, 1))))
    o = o.astype(jnp.bfloat16)
    w3 = params["w3"].reshape(1, 1, planes, out_planes)
    o = conv(o, w3, params["s3"], params["b3"], 1, "VALID")
    if stride != 1 or in_planes != out_planes:
        wsc = params["ws"].reshape(1, 1, in_planes, out_planes)
        sc = conv(x, wsc, params["ss"], params["bs"], stride, "VALID")
    else:
        sc = x.astype(jnp.bfloat16).astype(jnp.float32)
    o = jax.nn.relu(o + sc).astype(jnp.bfloat16).astype(jnp.float32)
    return jnp.transpose(o, (0, 3, 1, 2))


# --------------------------------- main ---------------------------------------

if __name__ == "__main__":
    key = jax.random.PRNGKey(0)

    # Case 1: projection shortcut (stride=2, in_planes != expansion*planes)
    in_planes, planes, stride = 4, 4, 2
    kp, kx, key = jax.random.split(key, 3)
    params = init_bottleneck_params(kp, in_planes, planes, stride)
    x = jax.random.normal(kx, (2, in_planes, 16, 16), jnp.float32)   # NCHW
    fwd1 = jax.jit(functools.partial(bottleneck_forward, in_planes=in_planes,
                                     planes=planes, stride=stride))
    out = jax.block_until_ready(fwd1(params, x))
    ref = bottleneck_reference(params, x, in_planes=in_planes, planes=planes,
                               stride=stride)
    assert out.shape == (2, 16, 8, 8), out.shape
    assert jnp.allclose(out, ref, rtol=1e-2, atol=1e-2), \
        float(jnp.max(jnp.abs(out - ref)))

    # Case 2: identity shortcut (stride=1, in_planes == expansion*planes)
    in_planes2, planes2, stride2 = 16, 4, 1
    kp2, kx2, key = jax.random.split(key, 3)
    params2 = init_bottleneck_params(kp2, in_planes2, planes2, stride2)
    x2 = jax.random.normal(kx2, (2, in_planes2, 16, 16), jnp.float32)
    fwd2 = jax.jit(functools.partial(bottleneck_forward, in_planes=in_planes2,
                                     planes=planes2, stride=stride2))
    out2 = jax.block_until_ready(fwd2(params2, x2))
    ref2 = bottleneck_reference(params2, x2, in_planes=in_planes2,
                                planes=planes2, stride=stride2)
    assert out2.shape == (2, 16, 16, 16), out2.shape
    assert jnp.allclose(out2, ref2, rtol=1e-2, atol=1e-2), \
        float(jnp.max(jnp.abs(out2 - ref2)))

    print("KERNEL_OK")
</pallas_src>

<mosaic_0001>
module attributes {stable_mosaic.version = 11 : i64} {
  func.func @_mm_bias_kernel(%arg0: i32, %arg1: memref<256x16xbf16, #tpu.memory_space<vmem>>, %arg2: memref<16x16xbf16, #tpu.memory_space<vmem>>, %arg3: memref<1x16xf32, #tpu.memory_space<vmem>>, %arg4: memref<256x16xbf16, #tpu.memory_space<vmem>>) attributes {dimension_semantics = [#tpu.dimension_semantics<parallel>], iteration_bounds = array<i64: 2>, scalar_prefetch = 0 : i64, scratch_operands = 0 : i64, tpu.core_type = #tpu.core_type<tc>, window_params = [{transform_indices = @transform_0, window_bounds = array<i64: 256, 16>}, {pipeline_mode = #tpu.pipeline_mode<synchronous>, transform_indices = @transform_1, window_bounds = array<i64: 16, 16>}, {pipeline_mode = #tpu.pipeline_mode<synchronous>, transform_indices = @transform_2, window_bounds = array<i64: 1, 16>}, {transform_indices = @transform_3, window_bounds = array<i64: 256, 16>}]} {
    %c0 = arith.constant 0 : index
    %c0_0 = arith.constant 0 : index
    %0 = vector.load %arg1[%c0, %c0_0] : memref<256x16xbf16, #tpu.memory_space<vmem>>, vector<256x16xbf16>
    %c0_1 = arith.constant 0 : index
    %c0_2 = arith.constant 0 : index
    %1 = vector.load %arg2[%c0_1, %c0_2] : memref<16x16xbf16, #tpu.memory_space<vmem>>, vector<16x16xbf16>
    %cst = arith.constant dense<0.000000e+00> : vector<256x16xf32>
    %2 = tpu.matmul %0, %1, %cst {dimension_numbers = #tpu.dot_dimension_numbers<[1], [0], [0], [1], [0, 0, 1, 1], [], []>} : vector<256x16xbf16>, vector<16x16xbf16>, vector<256x16xf32> -> vector<256x16xf32>
    %c0_3 = arith.constant 0 : index
    %c0_4 = arith.constant 0 : index
    %3 = vector.load %arg3[%c0_3, %c0_4] : memref<1x16xf32, #tpu.memory_space<vmem>>, vector<1x16xf32>
    %4 = vector.broadcast %3 : vector<1x16xf32> to vector<256x16xf32>
    %5 = arith.addf %2, %4 : vector<256x16xf32>
    %cst_5 = arith.constant 0.000000e+00 : f32
    %6 = vector.broadcast %cst_5 : f32 to vector<256x16xf32>
    %7 = arith.maximumf %5, %6 : vector<256x16xf32>
    %8 = arith.truncf %7 : vector<256x16xf32> to vector<256x16xbf16>
    %c0_6 = arith.constant 0 : index
    %c0_7 = arith.constant 0 : index
    %9 = vector.load %arg4[%c0_6, %c0_7] : memref<256x16xbf16, #tpu.memory_space<vmem>>, vector<256x16xbf16>
    tpu.vector_store %arg4[%c0_6, %c0_7], %8 {strides = array<i32>} : memref<256x16xbf16, #tpu.memory_space<vmem>>, vector<256x16xbf16>,
    return
  }
  func.func @transform_0(%arg0: i32) -> (i32, i32) {
    %c0_i32 = arith.constant 0 : i32
    %c0_i32_0 = arith.constant 0 : i32
    return %arg0, %c0_i32 : i32, i32
  }
  func.func @transform_1(%arg0: i32) -> (i32, i32) {
    %c0_i32 = arith.constant 0 : i32
    %c0_i32_0 = arith.constant 0 : i32
    %c0_i32_1 = arith.constant 0 : i32
    return %c0_i32, %c0_i32_0 : i32, i32
  }
  func.func @transform_2(%arg0: i32) -> (i32, i32) {
    %c0_i32 = arith.constant 0 : i32
    %c0_i32_0 = arith.constant 0 : i32
    %c0_i32_1 = arith.constant 0 : i32
    return %c0_i32, %c0_i32_0 : i32, i32
  }
  func.func @transform_3(%arg0: i32) -> (i32, i32) {
    %c0_i32 = arith.constant 0 : i32
    %c0_i32_0 = arith.constant 0 : i32
    return %arg0, %c0_i32 : i32, i32
  }
}

module attributes {stable_mosaic.version = 11 : i64} {
  func.func @_mm_bias_kernel(%arg0: i32, %arg1: memref<128x16xbf16, #tpu.memory_space<vmem>>, %arg2: memref<16x128xbf16, #tpu.memory_space<vmem>>, %arg3: memref<128x16xbf16, #tpu.memory_space<vmem>>, %arg4: memref<16x128xbf16, #tpu.memory_space<vmem>>, %arg5: memref<1x128xf32, #tpu.memory_space<vmem>>, %arg6: memref<128x128xbf16, #tpu.memory_space<vmem>>) attributes {dimension_semantics = [#tpu.dimension_semantics<parallel>], iteration_bounds = array<i64: 1>, scalar_prefetch = 0 : i64, scratch_operands = 0 : i64, tpu.core_type = #tpu.core_type<tc>, window_params = [{transform_indices = @transform_0, window_bounds = array<i64: 128, 16>}, {pipeline_mode = #tpu.pipeline_mode<synchronous>, transform_indices = @transform_1, window_bounds = array<i64: 16, 128>}, {transform_indices = @transform_2, window_bounds = array<i64: 128, 16>}, {pipeline_mode = #tpu.pipeline_mode<synchronous>, transform_indices = @transform_3, window_bounds = array<i64: 16, 128>}, {pipeline_mode = #tpu.pipeline_mode<synchronous>, transform_indices = @transform_4, window_bounds = array<i64: 1, 128>}, {transform_indices = @transform_5, window_bounds = array<i64: 128, 128>}]} {
    %c0 = arith.constant 0 : index
    %c0_0 = arith.constant 0 : index
    %0 = vector.load %arg1[%c0, %c0_0] : memref<128x16xbf16, #tpu.memory_space<vmem>>, vector<128x16xbf16>
    %c0_1 = arith.constant 0 : index
    %c0_2 = arith.constant 0 : index
    %1 = vector.load %arg2[%c0_1, %c0_2] : memref<16x128xbf16, #tpu.memory_space<vmem>>, vector<16x128xbf16>
    %cst = arith.constant dense<0.000000e+00> : vector<128x128xf32>
    %2 = tpu.matmul %0, %1, %cst {dimension_numbers = #tpu.dot_dimension_numbers<[1], [0], [0], [1], [0, 0, 1, 1], [], []>} : vector<128x16xbf16>, vector<16x128xbf16>, vector<128x128xf32> -> vector<128x128xf32>
    %c0_3 = arith.constant 0 : index
    %c0_4 = arith.constant 0 : index
    %3 = vector.load %arg3[%c0_3, %c0_4] : memref<128x16xbf16, #tpu.memory_space<vmem>>, vector<128x16xbf16>
    %c0_5 = arith.constant 0 : index
    %c0_6 = arith.constant 0 : index
    %4 = vector.load %arg4[%c0_5, %c0_6] : memref<16x128xbf16, #tpu.memory_space<vmem>>, vector<16x128xbf16>
    %cst_7 = arith.constant dense<0.000000e+00> : vector<128x128xf32>
    %5 = tpu.matmul %3, %4, %cst_7 {dimension_numbers = #tpu.dot_dimension_numbers<[1], [0], [0], [1], [0, 0, 1, 1], [], []>} : vector<128x16xbf16>, vector<16x128xbf16>, vector<128x128xf32> -> vector<128x128xf32>
    %6 = arith.addf %2, %5 : vector<128x128xf32>
    %c0_8 = arith.constant 0 : index
    %c0_9 = arith.constant 0 : index
    %7 = vector.load %arg5[%c0_8, %c0_9] : memref<1x128xf32, #tpu.memory_space<vmem>>, vector<1x128xf32>
    %8 = vector.broadcast %7 : vector<1x128xf32> to vector<128x128xf32>
    %9 = arith.addf %6, %8 : vector<128x128xf32>
    %cst_10 = arith.constant 0.000000e+00 : f32
    %10 = vector.broadcast %cst_10 : f32 to vector<128x128xf32>
    %11 = arith.maximumf %9, %10 : vector<128x128xf32>
    %12 = arith.truncf %11 : vector<128x128xf32> to vector<128x128xbf16>
    %c0_11 = arith.constant 0 : index
    %c0_12 = arith.constant 0 : index
    %13 = vector.load %arg6[%c0_11, %c0_12] : memref<128x128xbf16, #tpu.memory_space<vmem>>, vector<128x128xbf16>
    tpu.vector_store %arg6[%c0_11, %c0_12], %12 {strides = array<i32>} : memref<128x128xbf16, #tpu.memory_space<vmem>>, vector<128x128xbf16>,
    return
  }
  func.func @transform_0(%arg0: i32) -> (i32, i32) {
    %c0_i32 = arith.constant 0 : i32
    %c0_i32_0 = arith.constant 0 : i32
    return %arg0, %c0_i32 : i32, i32
  }
  func.func @transform_1(%arg0: i32) -> (i32, i32) {
    %c0_i32 = arith.constant 0 : i32
    %c0_i32_0 = arith.constant 0 : i32
    %c0_i32_1 = arith.constant 0 : i32
    return %c0_i32, %c0_i32_0 : i32, i32
  }
  func.func @transform_2(%arg0: i32) -> (i32, i32) {
    %c0_i32 = arith.constant 0 : i32
    %c0_i32_0 = arith.constant 0 : i32
    return %arg0, %c0_i32 : i32, i32
  }
  func.func @transform_3(%arg0: i32) -> (i32, i32) {
    %c0_i32 = arith.constant 0 : i32
    %c0_i32_0 = arith.constant 0 : i32
    %c0_i32_1 = arith.constant 0 : i32
    return %c0_i32, %c0_i32_0 : i32, i32
  }
  func.func @transform_4(%arg0: i32) -> (i32, i32) {
    %c0_i32 = arith.constant 0 : i32
    %c0_i32_0 = arith.constant 0 : i32
    %c0_i32_1 = arith.constant 0 : i32
    return %c0_i32, %c0_i32_0 : i32, i32
  }
  func.func @transform_5(%arg0: i32) -> (i32, i32) {
    %c0_i32 = arith.constant 0 : i32
    %c0_i32_0 = arith.constant 0 : i32
    return %arg0, %c0_i32 : i32, i32
  }
}

module attributes {stable_mosaic.version = 11 : i64} {
  func.func @_conv3x3_bn_relu_kernel(%arg0: i32, %arg1: memref<1x36x9x16xbf16, #tpu.memory_space<vmem>>, %arg2: memref<9x16x16xbf16, #tpu.memory_space<vmem>>, %arg3: memref<1x16xf32, #tpu.memory_space<vmem>>, %arg4: memref<1x8x8x16xbf16, #tpu.memory_space<vmem>>) attributes {dimension_semantics = [#tpu.dimension_semantics<parallel>], iteration_bounds = array<i64: 2>, scalar_prefetch = 0 : i64, scratch_operands = 0 : i64, tpu.core_type = #tpu.core_type<tc>, window_params = [{transform_indices = @transform_0, window_bounds = array<i64: 1, 36, 9, 16>}, {pipeline_mode = #tpu.pipeline_mode<synchronous>, transform_indices = @transform_1, window_bounds = array<i64: 9, 16, 16>}, {pipeline_mode = #tpu.pipeline_mode<synchronous>, transform_indices = @transform_2, window_bounds = array<i64: 1, 16>}, {transform_indices = @transform_3, window_bounds = array<i64: 1, 8, 8, 16>}]} {
    %c0 = arith.constant 0 : index
    %c0_0 = arith.constant 0 : index
    %0 = vector.load %arg3[%c0, %c0_0] : memref<1x16xf32, #tpu.memory_space<vmem>>, vector<1x16xf32>
    %cst = arith.constant 0.000000e+00 : f32
    %1 = vector.broadcast %cst : f32 to vector<8x16xf32>
    %c0_1 = arith.constant 0 : index
    %c0_2 = arith.constant 0 : index
    %c0_3 = arith.constant 0 : index
    %c0_4 = arith.constant 0 : index
    %2 = vector.load %arg1[%c0_1, %c0_2, %c0_3, %c0_4] : memref<1x36x9x16xbf16, #tpu.memory_space<vmem>>, vector<1x1x8x16xbf16>
    %3 = vector.shape_cast %2 : vector<1x1x8x16xbf16> to vector<8x16xbf16>
    %c0_5 = arith.constant 0 : index
    %c0_6 = arith.constant 0 : index
    %c0_7 = arith.constant 0 : index
    %4 = vector.load %arg2[%c0_5, %c0_6, %c0_7] : memref<9x16x16xbf16, #tpu.memory_space<vmem>>, vector<1x16x16xbf16>
    %5 = vector.shape_cast %4 : vector<1x16x16xbf16> to vector<16x16xbf16>
    %cst_8 = arith.constant dense<0.000000e+00> : vector<8x16xf32>
    %6 = tpu.matmul %3, %5, %cst_8 {dimension_numbers = #tpu.dot_dimension_numbers<[1], [0], [0], [1], [0, 0, 1, 1], [], []>} : vector<8x16xbf16>, vector<16x16xbf16>, vector<8x16xf32> -> vector<8x16xf32>
    %7 = arith.addf %1, %6 : vector<8x16xf32>
    %c0_9 = arith.constant 0 : index
    %c9 = arith.constant 9 : index
    %c0_10 = arith.constant 0 : index
    %c0_11 = arith.constant 0 : index
    %8 = vector.load %arg1[%c0_9, %c9, %c0_10, %c0_11] : memref<1x36x9x16xbf16, #tpu.memory_space<vmem>>, vector<1x1x8x16xbf16>
    %9 = vector.shape_cast %8 : vector<1x1x8x16xbf16> to vector<8x16xbf16>
    %c1 = arith.constant 1 : index
    %c0_12 = arith.constant 0 : index
    %c0_13 = arith.constant 0 : index
    %10 = vector.load %arg2[%c1, %c0_12, %c0_13] : memref<9x16x16xbf16, #tpu.memory_space<vmem>>, vector<1x16x16xbf16>
    %11 = vector.shape_cast %10 : vector<1x16x16xbf16> to vector<16x16xbf16>
    %cst_14 = arith.constant dense<0.000000e+00> : vector<8x16xf32>
    %12 = tpu.matmul %9, %11, %cst_14 {dimension_numbers = #tpu.dot_dimension_numbers<[1], [0], [0], [1], [0, 0, 1, 1], [], []>} : vector<8x16xbf16>, vector<16x16xbf16>, vector<8x16xf32> -> vector<8x16xf32>
    %13 = arith.addf %7, %12 : vector<8x16xf32>
    %c0_15 = arith.constant 0 : index
    %c0_16 = arith.constant 0 : index
    %c1_17 = arith.constant 1 : index
    %c0_18 = arith.constant 0 : index
    %14 = vector.load %arg1[%c0_15, %c0_16, %c1_17, %c0_18] : memref<1x36x9x16xbf16, #tpu.memory_space<vmem>>, vector<1x1x8x16xbf16>
    %15 = vector.shape_cast %14 : vector<1x1x8x16xbf16> to vector<8x16xbf16>
    %c2 = arith.constant 2 : index
    %c0_19 = arith.constant 0 : index
    %c0_20 = arith.constant 0 : index
    %16 = vector.load %arg2[%c2, %c0_19, %c0_20] : memref<9x16x16xbf16, #tpu.memory_space<vmem>>, vector<1x16x16xbf16>
    %17 = vector.shape_cast %16 : vector<1x16x16xbf16> to vector<16x16xbf16>
    %cst_21 = arith.constant dense<0.000000e+00> : vector<8x16xf32>
    %18 = tpu.matmul %15, %17, %cst_21 {dimension_numbers = #tpu.dot_dimension_numbers<[1], [0], [0], [1], [0, 0, 1, 1], [], []>} : vector<8x16xbf16>, vector<16x16xbf16>, vector<8x16xf32> -> vector<8x16xf32>
    %19 = arith.addf %13, %18 : vector<8x16xf32>
    %c0_22 = arith.constant 0 : index
    %c18 = arith.constant 18 : index
    %c0_23 = arith.constant 0 : index
    %c0_24 = arith.constant 0 : index
    %20 = vector.load %arg1[%c0_22, %c18, %c0_23, %c0_24] : memref<1x36x9x16xbf16, #tpu.memory_space<vmem>>, vector<1x1x8x16xbf16>
    %21 = vector.shape_cast %20 : vector<1x1x8x16xbf16> to vector<8x16xbf16>
    %c3 = arith.constant 3 : index
    %c0_25 = arith.constant 0 : index
    %c0_26 = arith.constant 0 : index
    %22 = vector.load %arg2[%c3, %c0_25, %c0_26] : memref<9x16x16xbf16, #tpu.memory_space<vmem>>, vector<1x16x16xbf16>
    %23 = vector.shape_cast %22 : vector<1x16x16xbf16> to vector<16x16xbf16>
    %cst_27 = arith.constant dense<0.000000e+00> : vector<8x16xf32>
    %24 = tpu.matmul %21, %23, %cst_27 {dimension_numbers = #tpu.dot_dimension_numbers<[1], [0], [0], [1], [0, 0, 1, 1], [], []>} : vector<8x16xbf16>, vector<16x16xbf16>, vector<8x16xf32> -> vector<8x16xf32>
    %25 = arith.addf %19, %24 : vector<8x16xf32>
    %c0_28 = arith.constant 0 : index
    %c27 = arith.constant 27 : index
    %c0_29 = arith.constant 0 : index
    %c0_30 = arith.constant 0 : index
    %26 = vector.load %arg1[%c0_28, %c27, %c0_29, %c0_30] : memref<1x36x9x16xbf16, #tpu.memory_space<vmem>>, vector<1x1x8x16xbf16>
    %27 = vector.shape_cast %26 : vector<1x1x8x16xbf16> to vector<8x16xbf16>
    %c4 = arith.constant 4 : index
    %c0_31 = arith.constant 0 : index
    %c0_32 = arith.constant 0 : index
    %28 = vector.load %arg2[%c4, %c0_31, %c0_32] : memref<9x16x16xbf16, #tpu.memory_space<vmem>>, vector<1x16x16xbf16>
    %29 = vector.shape_cast %28 : vector<1x16x16xbf16> to vector<16x16xbf16>
    %cst_33 = arith.constant dense<0.000000e+00> : vector<8x16xf32>
    %30 = tpu.matmul %27, %29, %cst_33 {dimension_numbers = #tpu.dot_dimension_numbers<[1], [0], [0], [1], [0, 0, 1, 1], [], []>} : vector<8x16xbf16>, vector<16x16xbf16>, vector<8x16xf32> -> vector<8x16xf32>
    %31 = arith.addf %25, %30 : vector<8x16xf32>
    %c0_34 = arith.constant 0 : index
    %c18_35 = arith.constant 18 : index
    %c1_36 = arith.constant 1 : index
    %c0_37 = arith.constant 0 : index
    %32 = vector.load %arg1[%c0_34, %c18_35, %c1_36, %c0_37] : memref<1x36x9x16xbf16, #tpu.memory_space<vmem>>, vector<1x1x8x16xbf16>
    %33 = vector.shape_cast %32 : vector<1x1x8x16xbf16> to vector<8x16xbf16>
    %c5 = arith.constant 5 : index
    %c0_38 = arith.constant 0 : index
    %c0_39 = arith.constant 0 : index
    %34 = vector.load %arg2[%c5, %c0_38, %c0_39] : memref<9x16x16xbf16, #tpu.memory_space<vmem>>, vector<1x16x16xbf16>
    %35 = vector.shape_cast %34 : vector<1x16x16xbf16> to vector<16x16xbf16>
    %cst_40 = arith.constant dense<0.000000e+00> : vector<8x16xf32>
    %36 = tpu.matmul %33, %35, %cst_40 {dimension_numbers = #tpu.dot_dimension_numbers<[1], [0], [0], [1], [0, 0, 1, 1], [], []>} : vector<8x16xbf16>, vector<16x16xbf16>, vector<8x16xf32> -> vector<8x16xf32>
    %37 = arith.addf %31, %36 : vector<8x16xf32>
    %c0_41 = arith.constant 0 : index
    %c1_42 = arith.constant 1 : index
    %c0_43 = arith.constant 0 : index
    %c0_44 = arith.constant 0 : index
    %38 = vector.load %arg1[%c0_41, %c1_42, %c0_43, %c0_44] : memref<1x36x9x16xbf16, #tpu.memory_space<vmem>>, vector<1x1x8x16xbf16>
    %39 = vector.shape_cast %38 : vector<1x1x8x16xbf16> to vector<8x16xbf16>
    %c6 = arith.constant 6 : index
    %c0_45 = arith.constant 0 : index
    %c0_46 = arith.constant 0 : index
    %40 = vector.load %arg2[%c6, %c0_45, %c0_46] : memref<9x16x16xbf16, #tpu.memory_space<vmem>>, vector<1x16x16xbf16>
    %41 = vector.shape_cast %40 : vector<1x16x16xbf16> to vector<16x16xbf16>
    %cst_47 = arith.constant dense<0.000000e+00> : vector<8x16xf32>
    %42 = tpu.matmul %39, %41, %cst_47 {dimension_numbers = #tpu.dot_dimension_numbers<[1], [0], [0], [1], [0, 0, 1, 1], [], []>} : vector<8x16xbf16>, vector<16x16xbf16>, vector<8x16xf32> -> vector<8x16xf32>
    %43 = arith.addf %37, %42 : vector<8x16xf32>
    %c0_48 = arith.constant 0 : index
    %c10 = arith.constant 10 : index
    %c0_49 = arith.constant 0 : index
    %c0_50 = arith.constant 0 : index
    %44 = vector.load %arg1[%c0_48, %c10, %c0_49, %c0_50] : memref<1x36x9x16xbf16, #tpu.memory_space<vmem>>, vector<1x1x8x16xbf16>
    %45 = vector.shape_cast %44 : vector<1x1x8x16xbf16> to vector<8x16xbf16>
    %c7 = arith.constant 7 : index
    %c0_51 = arith.constant 0 : index
    %c0_52 = arith.constant 0 : index
    %46 = vector.load %arg2[%c7, %c0_51, %c0_52] : memref<9x16x16xbf16, #tpu.memory_space<vmem>>, vector<1x16x16xbf16>
    %47 = vector.shape_cast %46 : vector<1x16x16xbf16> to vector<16x16xbf16>
    %cst_53 = arith.constant dense<0.000000e+00> : vector<8x16xf32>
    %48 = tpu.matmul %45, %47, %cst_53 {dimension_numbers = #tpu.dot_dimension_numbers<[1], [0], [0], [1], [0, 0, 1, 1], [], []>} : vector<8x16xbf16>, vector<16x16xbf16>, vector<8x16xf32> -> vector<8x16xf32>
    %49 = arith.addf %43, %48 : vector<8x16xf32>
    %c0_54 = arith.constant 0 : index
    %c1_55 = arith.constant 1 : index
    %c1_56 = arith.constant 1 : index
    %c0_57 = arith.constant 0 : index
    %50 = vector.load %arg1[%c0_54, %c1_55, %c1_56, %c0_57] : memref<1x36x9x16xbf16, #tpu.memory_space<vmem>>, vector<1x1x8x16xbf16>
    %51 = vector.shape_cast %50 : vector<1x1x8x16xbf16> to vector<8x16xbf16>
    %c8 = arith.constant 8 : index
    %c0_58 = arith.constant 0 : index
    %c0_59 = arith.constant 0 : index
    %52 = vector.load %arg2[%c8, %c0_58, %c0_59] : memref<9x16x16xbf16, #tpu.memory_space<vmem>>, vector<1x16x16xbf16>
    %53 = vector.shape_cast %52 : vector<1x16x16xbf16> to vector<16x16xbf16>
    %cst_60 = arith.constant dense<0.000000e+00> : vector<8x16xf32>
    %54 = tpu.matmul %51, %53, %cst_60 {dimension_numbers = #tpu.dot_dimension_numbers<[1], [0], [0], [1], [0, 0, 1, 1], [], []>} : vector<8x16xbf16>, vector<16x16xbf16>, vector<8x16xf32> -> vector<8x16xf32>
    %55 = arith.addf %49, %54 : vector<8x16xf32>
    %56 = vector.broadcast %0 : vector<1x16xf32> to vector<8x16xf32>
    %57 = arith.addf %55, %56 : vector<8x16xf32>
    %cst_61 = arith.constant 0.000000e+00 : f32
    %58 = vector.broadcast %cst_61 : f32 to vector<8x16xf32>
    %59 = arith.maximumf %57, %58 : vector<8x16xf32>
    %60 = arith.truncf %59 : vector<8x16xf32> to vector<8x16xbf16>
    %c0_62 = arith.constant 0 : index
    %c0_63 = arith.constant 0 : index
    %c0_64 = arith.constant 0 : index
    %c0_65 = arith.constant 0 : index
    %61 = vector.load %arg4[%c0_62, %c0_63, %c0_64, %c0_65] : memref<1x8x8x16xbf16, #tpu.memory_space<vmem>>, vector<1x1x8x16xbf16>
    %62 = vector.shape_cast %61 : vector<1x1x8x16xbf16> to vector<8x16xbf16>
    %63 = vector.shape_cast %60 : vector<8x16xbf16> to vector<1x1x8x16xbf16>
    tpu.vector_store %arg4[%c0_62, %c0_63, %c0_64, %c0_65], %63 {strides = array<i32>} : memref<1x8x8x16xbf16, #tpu.memory_space<vmem>>, vector<1x1x8x16xbf16>,
    %cst_66 = arith.constant 0.000000e+00 : f32
    %64 = vector.broadcast %cst_66 : f32 to vector<8x16xf32>
    %c0_67 = arith.constant 0 : index
    %c1_68 = arith.constant 1 : index
    %c0_69 = arith.constant 0 : index
    %c0_70 = arith.constant 0 : index
    %65 = vector.load %arg1[%c0_67, %c1_68, %c0_69, %c0_70] : memref<1x36x9x16xbf16, #tpu.memory_space<vmem>>, vector<1x1x8x16xbf16>
    %66 = vector.shape_cast %65 : vector<1x1x8x16xbf16> to vector<8x16xbf16>
    %c0_71 = arith.constant 0 : index
    %c0_72 = arith.constant 0 : index
    %c0_73 = arith.constant 0 : index
    %67 = vector.load %arg2[%c0_71, %c0_72, %c0_73] : memref<9x16x16xbf16, #tpu.memory_space<vmem>>, vector<1x16x16xbf16>
    %68 = vector.shape_cast %67 : vector<1x16x16xbf16> to vector<16x16xbf16>
    %cst_74 = arith.constant dense<0.000000e+00> : vector<8x16xf32>
    %69 = tpu.matmul %66, %68, %cst_74 {dimension_numbers = #tpu.dot_dimension_numbers<[1], [0], [0], [1], [0, 0, 1, 1], [], []>} : vector<8x16xbf16>, vector<16x16xbf16>, vector<8x16xf32> -> vector<8x16xf32>
    %70 = arith.addf %64, %69 : vector<8x16xf32>
    %c0_75 = arith.constant 0 : index
    %c10_76 = arith.constant 10 : index
    %c0_77 = arith.constant 0 : index
    %c0_78 = arith.constant 0 : index
    %71 = vector.load %arg1[%c0_75, %c10_76, %c0_77, %c0_78] : memref<1x36x9x16xbf16, #tpu.memory_space<vmem>>, vector<1x1x8x16xbf16>
    %72 = vector.shape_cast %71 : vector<1x1x8x16xbf16> to vector<8x16xbf16>
    %c1_79 = arith.constant 1 : index
    %c0_80 = arith.constant 0 : index
    %c0_81 = arith.constant 0 : index
    %73 = vector.load %arg2[%c1_79, %c0_80, %c0_81] : memref<9x16x16xbf16, #tpu.memory_space<vmem>>, vector<1x16x16xbf16>
    %74 = vector.shape_cast %73 : vector<1x16x16xbf16> to vector<16x16xbf16>
    %cst_82 = arith.constant dense<0.000000e+00> : vector<8x16xf32>
    %75 = tpu.matmul %72, %74, %cst_82 {dimension_numbers = #tpu.dot_dimension_numbers<[1], [0], [0], [1], [0, 0, 1, 1], [], []>} : vector<8x16xbf16>, vector<16x16xbf16>, vector<8x16xf32> -> vector<8x16xf32>
    %76 = arith.addf %70, %75 : vector<8x16xf32>
    %c0_83 = arith.constant 0 : index
    %c1_84 = arith.constant 1 : index
    %c1_85 = arith.constant 1 : index
    %c0_86 = arith.constant 0 : index
    %77 = vector.load %arg1[%c0_83, %c1_84, %c1_85, %c0_86] : memref<1x36x9x16xbf16, #tpu.memory_space<vmem>>, vector<1x1x8x16xbf16>
    %78 = vector.shape_cast %77 : vector<1x1x8x16xbf16> to vector<8x16xbf16>
    %c2_87 = arith.constant 2 : index
    %c0_88 = arith.constant 0 : index
    %c0_89 = arith.constant 0 : index
    %79 = vector.load %arg2[%c2_87, %c0_88, %c0_89] : memref<9x16x16xbf16, #tpu.memory_space<vmem>>, vector<1x16x16xbf16>
    %80 = vector.shape_cast %79 : vector<1x16x16xbf16> to vector<16x16xbf16>
    %cst_90 = arith.constant dense<0.000000e+00> : vector<8x16xf32>
    %81 = tpu.matmul %78, %80, %cst_90 {dimension_numbers = #tpu.dot_dimension_numbers<[1], [0], [0], [1], [0, 0, 1, 1], [], []>} : vector<8x16xbf16>, vector<16x16xbf16>, vector<8x16xf32> -> vector<8x16xf32>
    %82 = arith.addf %76, %81 : vector<8x16xf32>
    %c0_91 = arith.constant 0 : index
    %c19 = arith.constant 19 : index
    %c0_92 = arith.constant 0 : index
    %c0_93 = arith.constant 0 : index
    %83 = vector.load %arg1[%c0_91, %c19, %c0_92, %c0_93] : memref<1x36x9x16xbf16, #tpu.memory_space<vmem>>, vector<1x1x8x16xbf16>
    %84 = vector.shape_cast %83 : vector<1x1x8x16xbf16> to vector<8x16xbf16>
    %c3_94 = arith.constant 3 : index
    %c0_95 = arith.constant 0 : index
    %c0_96 = arith.constant 0 : index
    %85 = vector.load %arg2[%c3_94, %c0_95, %c0_96] : memref<9x16x16xbf16, #tpu.memory_space<vmem>>, vector<1x16x16xbf16>
    %86 = vector.shape_cast %85 : vector<1x16x16xbf16> to vector<16x16xbf16>
    %cst_97 = arith.constant dense<0.000000e+00> : vector<8x16xf32>
    %87 = tpu.matmul %84, %86, %cst_97 {dimension_numbers = #tpu.dot_dimension_numbers<[1], [0], [0], [1], [0, 0, 1, 1], [], []>} : vector<8x16xbf16>, vector<16x16xbf16>, vector<8x16xf32> -> vector<8x16xf32>
    %88 = arith.addf %82, %87 : vector<8x16xf32>
    %c0_98 = arith.constant 0 : index
    %c28 = arith.constant 28 : index
    %c0_99 = arith.constant 0 : index
    %c0_100 = arith.constant 0 : index
    %89 = vector.load %arg1[%c0_98, %c28, %c0_99, %c0_100] : memref<1x36x9x16xbf16, #tpu.memory_space<vmem>>, vector<1x1x8x16xbf16>
    %90 = vector.shape_cast %89 : vector<1x1x8x16xbf16> to vector<8x16xbf16>
    %c4_101 = arith.constant 4 : index
    %c0_102 = arith.constant 0 : index
    %c0_103 = arith.constant 0 : index
    %91 = vector.load %arg2[%c4_101, %c0_102, %c0_103] : memref<9x16x16xbf16, #tpu.memory_space<vmem>>, vector<1x16x16xbf16>
    %92 = vector.shape_cast %91 : vector<1x16x16xbf16> to vector<16x16xbf16>
    %cst_104 = arith.constant dense<0.000000e+00> : vector<8x16xf32>
    %93 = tpu.matmul %90, %92, %cst_104 {dimension_numbers = #tpu.dot_dimension_numbers<[1], [0], [0], [1], [0, 0, 1, 1], [], []>} : vector<8x16xbf16>, vector<16x16xbf16>, vector<8x16xf32> -> vector<8x16xf32>
    %94 = arith.addf %88, %93 : vector<8x16xf32>
    %c0_105 = arith.constant 0 : index
    %c19_106 = arith.constant 19 : index
    %c1_107 = arith.constant 1 : index
    %c0_108 = arith.constant 0 : index
    %95 = vector.load %arg1[%c0_105, %c19_106, %c1_107, %c0_108] : memref<1x36x9x16xbf16, #tpu.memory_space<vmem>>, vector<1x1x8x16xbf16>
    %96 = vector.shape_cast %95 : vector<1x1x8x16xbf16> to vector<8x16xbf16>
    %c5_109 = arith.constant 5 : index
    %c0_110 = arith.constant 0 : index
    %c0_111 = arith.constant 0 : index
    %97 = vector.load %arg2[%c5_109, %c0_110, %c0_111] : memref<9x16x16xbf16, #tpu.memory_space<vmem>>, vector<1x16x16xbf16>
    %98 = vector.shape_cast %97 : vector<1x16x16xbf16> to vector<16x16xbf16>
    %cst_112 = arith.constant dense<0.000000e+00> : vector<8x16xf32>
    %99 = tpu.matmul %96, %98, %cst_112 {dimension_numbers = #tpu.dot_dimension_numbers<[1], [0], [0], [1], [0, 0, 1, 1], [], []>} : vector<8x16xbf16>, vector<16x16xbf16>, vector<8x16xf32> -> vector<8x16xf32>
    %100 = arith.addf %94, %99 : vector<8x16xf32>
    %c0_113 = arith.constant 0 : index
    %c2_114 = arith.constant 2 : index
    %c0_115 = arith.constant 0 : index
    %c0_116 = arith.constant 0 : index
    %101 = vector.load %arg1[%c0_113, %c2_114, %c0_115, %c0_116] : memref<1x36x9x16xbf16, #tpu.memory_space<vmem>>, vector<1x1x8x16xbf16>
    %102 = vector.shape_cast %101 : vector<1x1x8x16xbf16> to vector<8x16xbf16>
    %c6_117 = arith.constant 6 : index
    %c0_118 = arith.constant 0 : index
    %c0_119 = arith.constant 0 : index
    %103 = vector.load %arg2[%c6_117, %c0_118, %c0_119] : memref<9x16x16xbf16, #tpu.memory_space<vmem>>, vector<1x16x16xbf16>
    %104 = vector.shape_cast %103 : vector<1x16x16xbf16> to vector<16x16xbf16>
    %cst_120 = arith.constant dense<0.000000e+00> : vector<8x16xf32>
    %105 = tpu.matmul %102, %104, %cst_120 {dimension_numbers = #tpu.dot_dimension_numbers<[1], [0], [0], [1], [0, 0, 1, 1], [], []>} : vector<8x16xbf16>, vector<16x16xbf16>, vector<8x16xf32> -> vector<8x16xf32>
    %106 = arith.addf %100, %105 : vector<8x16xf32>
    %c0_121 = arith.constant 0 : index
    %c11 = arith.constant 11 : index
    %c0_122 = arith.constant 0 : index
    %c0_123 = arith.constant 0 : index
    %107 = vector.load %arg1[%c0_121, %c11, %c0_122, %c0_123] : memref<1x36x9x16xbf16, #tpu.memory_space<vmem>>, vector<1x1x8x16xbf16>
    %108 = vector.shape_cast %107 : vector<1x1x8x16xbf16> to vector<8x16xbf16>
    %c7_124 = arith.constant 7 : index
    %c0_125 = arith.constant 0 : index
    %c0_126 = arith.constant 0 : index
    %109 = vector.load %arg2[%c7_124, %c0_125, %c0_126] : memref<9x16x16xbf16, #tpu.memory_space<vmem>>, vector<1x16x16xbf16>
    %110 = vector.shape_cast %109 : vector<1x16x16xbf16> to vector<16x16xbf16>
    %cst_127 = arith.constant dense<0.000000e+00> : vector<8x16xf32>
    %111 = tpu.matmul %108, %110, %cst_127 {dimension_numbers = #tpu.dot_dimension_numbers<[1], [0], [0], [1], [0, 0, 1, 1], [], []>} : vector<8x16xbf16>, vector<16x16xbf16>, vector<8x16xf32> -> vector<8x16xf32>
    %112 = arith.addf %106, %111 : vector<8x16xf32>
    %c0_128 = arith.constant 0 : index
    %c2_129 = arith.constant 2 : index
    %c1_130 = arith.constant 1 : index
    %c0_131 = arith.constant 0 : index
    %113 = vector.load %arg1[%c0_128, %c2_129, %c1_130, %c0_131] : memref<1x36x9x16xbf16, #tpu.memory_space<vmem>>, vector<1x1x8x16xbf16>
    %114 = vector.shape_cast %113 : vector<1x1x8x16xbf16> to vector<8x16xbf16>
    %c8_132 = arith.constant 8 : index
    %c0_133 = arith.constant 0 : index
    %c0_134 = arith.constant 0 : index
    %115 = vector.load %arg2[%c8_132, %c0_133, %c0_134] : memref<9x16x16xbf16, #tpu.memory_space<vmem>>, vector<1x16x16xbf16>
    %116 = vector.shape_cast %115 : vector<1x16x16xbf16> to vector<16x16xbf16>
    %cst_135 = arith.constant dense<0.000000e+00> : vector<8x16xf32>
    %117 = tpu.matmul %114, %116, %cst_135 {dimension_numbers = #tpu.dot_dimension_numbers<[1], [0], [0], [1], [0, 0, 1, 1], [], []>} : vector<8x16xbf16>, vector<16x16xbf16>, vector<8x16xf32> -> vector<8x16xf32>
    %118 = arith.addf %112, %117 : vector<8x16xf32>
    %119 = vector.broadcast %0 : vector<1x16xf32> to vector<8x16xf32>
    %120 = arith.addf %118, %119 : vector<8x16xf32>
    %cst_136 = arith.constant 0.000000e+00 : f32
    %121 = vector.broadcast %cst_136 : f32 to vector<8x16xf32>
    %122 = arith.maximumf %120, %121 : vector<8x16xf32>
    %123 = arith.truncf %122 : vector<8x16xf32> to vector<8x16xbf16>
    %c0_137 = arith.constant 0 : index
    %c1_138 = arith.constant 1 : index
    %c0_139 = arith.constant 0 : index
    %c0_140 = arith.constant 0 : index
    %124 = vector.load %arg4[%c0_137, %c1_138, %c0_139, %c0_140] : memref<1x8x8x16xbf16, #tpu.memory_space<vmem>>, vector<1x1x8x16xbf16>
    %125 = vector.shape_cast %124 : vector<1x1x8x16xbf16> to vector<8x16xbf16>
    %126 = vector.shape_cast %123 : vector<8x16xbf16> to vector<1x1x8x16xbf16>
    tpu.vector_store %arg4[%c0_137, %c1_138, %c0_139, %c0_140], %126 {strides = array<i32>} : memref<1x8x8x16xbf16, #tpu.memory_space<vmem>>, vector<1x1x8x16xbf16>,
    %cst_141 = arith.constant 0.000000e+00 : f32
    %127 = vector.broadcast %cst_141 : f32 to vector<8x16xf32>
    %c0_142 = arith.constant 0 : index
    %c2_143 = arith.constant 2 : index
    %c0_144 = arith.constant 0 : index
    %c0_145 = arith.constant 0 : index
    %128 = vector.load %arg1[%c0_142, %c2_143, %c0_144, %c0_145] : memref<1x36x9x16xbf16, #tpu.memory_space<vmem>>, vector<1x1x8x16xbf16>
    %129 = vector.shape_cast %128 : vector<1x1x8x16xbf16> to vector<8x16xbf16>
    %c0_146 = arith.constant 0 : index
    %c0_147 = arith.constant 0 : index
    %c0_148 = arith.constant 0 : index
    %130 = vector.load %arg2[%c0_146, %c0_147, %c0_148] : memref<9x16x16xbf16, #tpu.memory_space<vmem>>, vector<1x16x16xbf16>
    %131 = vector.shape_cast %130 : vector<1x16x16xbf16> to vector<16x16xbf16>
    %cst_149 = arith.constant dense<0.000000e+00> : vector<8x16xf32>
    %132 = tpu.matmul %129, %131, %cst_149 {dimension_numbers = #tpu.dot_dimension_numbers<[1], [0], [0], [1], [0, 0, 1, 1], [], []>} : vector<8x16xbf16>, vector<16x16xbf16>, vector<8x16xf32> -> vector<8x16xf32>
    %133 = arith.addf %127, %132 : vector<8x16xf32>
    %c0_150 = arith.constant 0 : index
    %c11_151 = arith.constant 11 : index
    %c0_152 = arith.constant 0 : index
    %c0_153 = arith.constant 0 : index
    %134 = vector.load %arg1[%c0_150, %c11_151, %c0_152, %c0_153] : memref<1x36x9x16xbf16, #tpu.memory_space<vmem>>, vector<1x1x8x16xbf16>
    %135 = vector.shape_cast %134 : vector<1x1x8x16xbf16> to vector<8x16xbf16>
    %c1_154 = arith.constant 1 : index
    %c0_155 = arith.constant 0 : index
    %c0_156 = arith.constant 0 : index
    %136 = vector.load %arg2[%c1_154, %c0_155, %c0_156] : memref<9x16x16xbf16, #tpu.memory_space<vmem>>, vector<1x16x16xbf16>
    %137 = vector.shape_cast %136 : vector<1x16x16xbf16> to vector<16x16xbf16>
    %cst_157 = arith.constant dense<0.000000e+00> : vector<8x16xf32>
    %138 = tpu.matmul %135, %137, %cst_157 {dimension_numbers = #tpu.dot_dimension_numbers<[1], [0], [0], [1], [0, 0, 1, 1], [], []>} : vector<8x16xbf16>, vector<16x16xbf16>, vector<8x16xf32> -> vector<8x16xf32>
    %139 = arith.addf %133, %138 : vector<8x16xf32>
    %c0_158 = arith.constant 0 : index
    %c2_159 = arith.constant 2 : index
    %c1_160 = arith.constant 1 : index
    %c0_161 = arith.constant 0 : index
    %140 = vector.load %arg1[%c0_158, %c2_159, %c1_160, %c0_161] : memref<1x36x9x16xbf16, #tpu.memory_space<vmem>>, vector<1x1x8x16xbf16>
    %141 = vector.shape_cast %140 : vector<1x1x8x16xbf16> to vector<8x16xbf16>
    %c2_162 = arith.constant 2 : index
    %c0_163 = arith.constant 0 : index
    %c0_164 = arith.constant 0 : index
    %142 = vector.load %arg2[%c2_162, %c0_163, %c0_164] : memref<9x16x16xbf16, #tpu.memory_space<vmem>>, vector<1x16x16xbf16>
    %143 = vector.shape_cast %142 : vector<1x16x16xbf16> to vector<16x16xbf16>
    %cst_165 = arith.constant dense<0.000000e+00> : vector<8x16xf32>
    %144 = tpu.matmul %141, %143, %cst_165 {dimension_numbers = #tpu.dot_dimension_numbers<[1], [0], [0], [1], [0, 0, 1, 1], [], []>} : vector<8x16xbf16>, vector<16x16xbf16>, vector<8x16xf32> -> vector<8x16xf32>
    %145 = arith.addf %139, %144 : vector<8x16xf32>
    %c0_166 = arith.constant 0 : index
    %c20 = arith.constant 20 : index
    %c0_167 = arith.constant 0 : index
    %c0_168 = arith.constant 0 : index
    %146 = vector.load %arg1[%c0_166, %c20, %c0_167, %c0_168] : memref<1x36x9x16xbf16, #tpu.memory_space<vmem>>, vector<1x1x8x16xbf16>
    %147 = vector.shape_cast %146 : vector<1x1x8x16xbf16> to vector<8x16xbf16>
    %c3_169 = arith.constant 3 : index
    %c0_170 = arith.constant 0 : index
    %c0_171 = arith.constant 0 : index
    %148 = vector.load %arg2[%c3_169, %c0_170, %c0_171] : memref<9x16x16xbf16, #tpu.memory_space<vmem>>, vector<1x16x16xbf16>
    %149 = vector.shape_cast %148 : vector<1x16x16xbf16> to vector<16x16xbf16>
    %cst_172 = arith.constant dense<0.000000e+00> : vector<8x16xf32>
    %150 = tpu.matmul %147, %149, %cst_172 {dimension_numbers = #tpu.dot_dimension_numbers<[1], [0], [0], [1], [0, 0, 1, 1], [], []>} : vector<8x16xbf16>, vector<16x16xbf16>, vector<8x16xf32> -> vector<8x16xf32>
    %151 = arith.addf %145, %150 : vector<8x16xf32>
    %c0_173 = arith.constant 0 : index
    %c29 = arith.constant 29 : index
    %c0_174 = arith.constant 0 : index
    %c0_175 = arith.constant 0 : index
    %152 = vector.load %arg1[%c0_173, %c29, %c0_174, %c0_175] : memref<1x36x9x16xbf16, #tpu.memory_space<vmem>>, vector<1x1x8x16xbf16>
    %153 = vector.shape_cast %152 : vector<1x1x8x16xbf16> to vector<8x16xbf16>
    %c4_176 = arith.constant 4 : index
    %c0_177 = arith.constant 0 : index
    %c0_178 = arith.constant 0 : index
    %154 = vector.load %arg2[%c4_176, %c0_177, %c0_178] : memref<9x16x16xbf16, #tpu.memory_space<vmem>>, vector<1x16x16xbf16>
    %155 = vector.shape_cast %154 : vector<1x16x16xbf16> to vector<16x16xbf16>
    %cst_179 = arith.constant dense<0.000000e+00> : vector<8x16xf32>
    %156 = tpu.matmul %153, %155, %cst_179 {dimension_numbers = #tpu.dot_dimension_numbers<[1], [0], [0], [1], [0, 0, 1, 1], [], []>} : vector<8x16xbf16>, vector<16x16xbf16>, vector<8x16xf32> -> vector<8x16xf32>
    %157 = arith.addf %151, %156 : vector<8x16xf32>
    %c0_180 = arith.constant 0 : index
    %c20_181 = arith.constant 20 : index
    %c1_182 = arith.constant 1 : index
    %c0_183 = arith.constant 0 : index
    %158 = vector.load %arg1[%c0_180, %c20_181, %c1_182, %c0_183] : memref<1x36x9x16xbf16, #tpu.memory_space<vmem>>, vector<1x1x8x16xbf16>
    %159 = vector.shape_cast %158 : vector<1x1x8x16xbf16> to vector<8x16xbf16>
    %c5_184 = arith.constant 5 : index
    %c0_185 = arith.constant 0 : index
    %c0_186 = arith.constant 0 : index
    %160 = vector.load %arg2[%c5_184, %c0_185, %c0_186] : memref<9x16x16xbf16, #tpu.memory_space<vmem>>, vector<1x16x16xbf16>
    %161 = vector.shape_cast %160 : vector<1x16x16xbf16> to vector<16x16xbf16>
    %cst_187 = arith.constant dense<0.000000e+00> : vector<8x16xf32>
    %162 = tpu.matmul %159, %161, %cst_187 {dimension_numbers = #tpu.dot_dimension_numbers<[1], [0], [0], [1], [0, 0, 1, 1], [], []>} : vector<8x16xbf16>, vector<16x16xbf16>, vector<8x16xf32> -> vector<8x16xf32>
    %163 = arith.addf %157, %162 : vector<8x16xf32>
    %c0_188 = arith.constant 0 : index
    %c3_189 = arith.constant 3 : index
    %c0_190 = arith.constant 0 : index
    %c0_191 = arith.constant 0 : index
    %164 = vector.load %arg1[%c0_188, %c3_189, %c0_190, %c0_191] : memref<1x36x9x16xbf16, #tpu.memory_space<vmem>>, vector<1x1x8x16xbf16>
    %165 = vector.shape_cast %164 : vector<1x1x8x16xbf16> to vector<8x16xbf16>
    %c6_192 = arith.constant 6 : index
    %c0_193 = arith.constant 0 : index
    %c0_194 = arith.constant 0 : index
    %166 = vector.load %arg2[%c6_192, %c0_193, %c0_194] : memref<9x16x16xbf16, #tpu.memory_space<vmem>>, vector<1x16x16xbf16>
    %167 = vector.shape_cast %166 : vector<1x16x16xbf16> to vector<16x16xbf16>
    %cst_195 = arith.constant dense<0.000000e+00> : vector<8x16xf32>
    %168 = tpu.matmul %165, %167, %cst_195 {dimension_numbers = #tpu.dot_dimension_numbers<[1], [0], [0], [1], [0, 0, 1, 1], [], []>} : vector<8x16xbf16>, vector<16x16xbf16>, vector<8x16xf32> -> vector<8x16xf32>
    %169 = arith.addf %163, %168 : vector<8x16xf32>
    %c0_196 = arith.constant 0 : index
    %c12 = arith.constant 12 : index
    %c0_197 = arith.constant 0 : index
    %c0_198 = arith.constant 0 : index
    %170 = vector.load %arg1[%c0_196, %c12, %c0_197, %c0_198] : memref<1x36x9x16xbf16, #tpu.memory_space<vmem>>, vector<1x1x8x16xbf16>
    %171 = vector.shape_cast %170 : vector<1x1x8x16xbf16> to vector<8x16xbf16>
    %c7_199 = arith.constant 7 : index
    %c0_200 = arith.constant 0 : index
    %c0_201 = arith.constant 0 : index
    %172 = vector.load %arg2[%c7_199, %c0_200, %c0_201] : memref<9x16x16xbf16, #tpu.memory_space<vmem>>, vector<1x16x16xbf16>
    %173 = vector.shape_cast %172 : vector<1x16x16xbf16> to vector<16x16xbf16>
    %cst_202 = arith.constant dense<0.000000e+00> : vector<8x16xf32>
    %174 = tpu.matmul %171, %173, %cst_202 {dimension_numbers = #tpu.dot_dimension_numbers<[1], [0], [0], [1], [0, 0, 1, 1], [], []>} : vector<8x16xbf16>, vector<16x16xbf16>, vector<8x16xf32> -> vector<8x16xf32>
    %175 = arith.addf %169, %174 : vector<8x16xf32>
    %c0_203 = arith.constant 0 : index
    %c3_204 = arith.constant 3 : index
    %c1_205 = arith.constant 1 : index
    %c0_206 = arith.constant 0 : index
    %176 = vector.load %arg1[%c0_203, %c3_204, %c1_205, %c0_206] : memref<1x36x9x16xbf16, #tpu.memory_space<vmem>>, vector<1x1x8x16xbf16>
    %177 = vector.shape_cast %176 : vector<1x1x8x16xbf16> to vector<8x16xbf16>
    %c8_207 = arith.constant 8 : index
    %c0_208 = arith.constant 0 : index
    %c0_209 = arith.constant 0 : index
    %178 = vector.load %arg2[%c8_207, %c0_208, %c0_209] : memref<9x16x16xbf16, #tpu.memory_space<vmem>>, vector<1x16x16xbf16>
    %179 = vector.shape_cast %178 : vector<1x16x16xbf16> to vector<16x16xbf16>
    %cst_210 = arith.constant dense<0.000000e+00> : vector<8x16xf32>
    %180 = tpu.matmul %177, %179, %cst_210 {dimension_numbers = #tpu.dot_dimension_numbers<[1], [0], [0], [1], [0, 0, 1, 1], [], []>} : vector<8x16xbf16>, vector<16x16xbf16>, vector<8x16xf32> -> vector<8x16xf32>
    %181 = arith.addf %175, %180 : vector<8x16xf32>
    %182 = vector.broadcast %0 : vector<1x16xf32> to vector<8x16xf32>
    %183 = arith.addf %181, %182 : vector<8x16xf32>
    %cst_211 = arith.constant 0.000000e+00 : f32
    %184 = vector.broadcast %cst_211 : f32 to vector<8x16xf32>
    %185 = arith.maximumf %183, %184 : vector<8x16xf32>
    %186 = arith.truncf %185 : vector<8x16xf32> to vector<8x16xbf16>
    %c0_212 = arith.constant 0 : index
    %c2_213 = arith.constant 2 : index
    %c0_214 = arith.constant 0 : index
    %c0_215 = arith.constant 0 : index
    %187 = vector.load %arg4[%c0_212, %c2_213, %c0_214, %c0_215] : memref<1x8x8x16xbf16, #tpu.memory_space<vmem>>, vector<1x1x8x16xbf16>
    %188 = vector.shape_cast %187 : vector<1x1x8x16xbf16> to vector<8x16xbf16>
    %189 = vector.shape_cast %186 : vector<8x16xbf16> to vector<1x1x8x16xbf16>
    tpu.vector_store %arg4[%c0_212, %c2_213, %c0_214, %c0_215], %189 {strides = array<i32>} : memref<1x8x8x16xbf16, #tpu.memory_space<vmem>>, vector<1x1x8x16xbf16>,
    %cst_216 = arith.constant 0.000000e+00 : f32
    %190 = vector.broadcast %cst_216 : f32 to vector<8x16xf32>
    %c0_217 = arith.constant 0 : index
    %c3_218 = arith.constant 3 : index
    %c0_219 = arith.constant 0 : index
    %c0_220 = arith.constant 0 : index
    %191 = vector.load %arg1[%c0_217, %c3_218, %c0_219, %c0_220] : memref<1x36x9x16xbf16, #tpu.memory_space<vmem>>, vector<1x1x8x16xbf16>
    %192 = vector.shape_cast %191 : vector<1x1x8x16xbf16> to vector<8x16xbf16>
    %c0_221 = arith.constant 0 : index
    %c0_222 = arith.constant 0 : index
    %c0_223 = arith.constant 0 : index
    %193 = vector.load %arg2[%c0_221, %c0_222, %c0_223] : memref<9x16x16xbf16, #tpu.memory_space<vmem>>, vector<1x16x16xbf16>
    %194 = vector.shape_cast %193 : vector<1x16x16xbf16> to vector<16x16xbf16>
    %cst_224 = arith.constant dense<0.000000e+00> : vector<8x16xf32>
    %195 = tpu.matmul %192, %194, %cst_224 {dimension_numbers = #tpu.dot_dimension_numbers<[1], [0], [0], [1], [0, 0, 1, 1], [], []>} : vector<8x16xbf16>, vector<16x16xbf16>, vector<8x16xf32> -> vector<8x16xf32>
    %196 = arith.addf %190, %195 : vector<8x16xf32>
    %c0_225 = arith.constant 0 : index
    %c12_226 = arith.constant 12 : index
    %c0_227 = arith.constant 0 : index
    %c0_228 = arith.constant 0 : index
    %197 = vector.load %arg1[%c0_225, %c12_226, %c0_227, %c0_228] : memref<1x36x9x16xbf16, #tpu.memory_space<vmem>>, vector<1x1x8x16xbf16>
    %198 = vector.shape_cast %197 : vector<1x1x8x16xbf16> to vector<8x16xbf16>
    %c1_229 = arith.constant 1 : index
    %c0_230 = arith.constant 0 : index
    %c0_231 = arith.constant 0 : index
    %199 = vector.load %arg2[%c1_229, %c0_230, %c0_231] : memref<9x16x16xbf16, #tpu.memory_space<vmem>>, vector<1x16x16xbf16>
    %200 = vector.shape_cast %199 : vector<1x16x16xbf16> to vector<16x16xbf16>
    %cst_232 = arith.constant dense<0.000000e+00> : vector<8x16xf32>
    %201 = tpu.matmul %198, %200, %cst_232 {dimension_numbers = #tpu.dot_dimension_numbers<[1], [0], [0], [1], [0, 0, 1, 1], [], []>} : vector<8x16xbf16>, vector<16x16xbf16>, vector<8x16xf32> -> vector<8x16xf32>
    %202 = arith.addf %196, %201 : vector<8x16xf32>
    %c0_233 = arith.constant 0 : index
    %c3_234 = arith.constant 3 : index
    %c1_235 = arith.constant 1 : index
    %c0_236 = arith.constant 0 : index
    %203 = vector.load %arg1[%c0_233, %c3_234, %c1_235, %c0_236] : memref<1x36x9x16xbf16, #tpu.memory_space<vmem>>, vector<1x1x8x16xbf16>
    %204 = vector.shape_cast %203 : vector<1x1x8x16xbf16> to vector<8x16xbf16>
    %c2_237 = arith.constant 2 : index
    %c0_238 = arith.constant 0 : index
    %c0_239 = arith.constant 0 : index
    %205 = vector.load %arg2[%c2_237, %c0_238, %c0_239] : memref<9x16x16xbf16, #tpu.memory_space<vmem>>, vector<1x16x16xbf16>
    %206 = vector.shape_cast %205 : vector<1x16x16xbf16> to vector<16x16xbf16>
    %cst_240 = arith.constant dense<0.000000e+00> : vector<8x16xf32>
    %207 = tpu.matmul %204, %206, %cst_240 {dimension_numbers = #tpu.dot_dimension_numbers<[1], [0], [0], [1], [0, 0, 1, 1], [], []>} : vector<8x16xbf16>, vector<16x16xbf16>, vector<8x16xf32> -> vector<8x16xf32>
    %208 = arith.addf %202, %207 : vector<8x16xf32>
    %c0_241 = arith.constant 0 : index
    %c21 = arith.constant 21 : index
    %c0_242 = arith.constant 0 : index
    %c0_243 = arith.constant 0 : index
    %209 = vector.load %arg1[%c0_241, %c21, %c0_242, %c0_243] : memref<1x36x9x16xbf16, #tpu.memory_space<vmem>>, vector<1x1x8x16xbf16>
    %210 = vector.shape_cast %209 : vector<1x1x8x16xbf16> to vector<8x16xbf16>
    %c3_244 = arith.constant 3 : index
    %c0_245 = arith.constant 0 : index
    %c0_246 = arith.constant 0 : index
    %211 = vector.load %arg2[%c3_244, %c0_245, %c0_246] : memref<9x16x16xbf16, #tpu.memory_space<vmem>>, vector<1x16x16xbf16>
    %212 = vector.shape_cast %211 : vector<1x16x16xbf16> to vector<16x16xbf16>
    %cst_247 = arith.constant dense<0.000000e+00> : vector<8x16xf32>
    %213 = tpu.matmul %210, %212, %cst_247 {dimension_numbers = #tpu.dot_dimension_numbers<[1], [0], [0], [1], [0, 0, 1, 1], [], []>} : vector<8x16xbf16>, vector<16x16xbf16>, vector<8x16xf32> -> vector<8x16xf32>
    %214 = arith.addf %208, %213 : vector<8x16xf32>
    %c0_248 = arith.constant 0 : index
    %c30 = arith.constant 30 : index
    %c0_249 = arith.constant 0 : index
    %c0_250 = arith.constant 0 : index
    %215 = vector.load %arg1[%c0_248, %c30, %c0_249, %c0_250] : memref<1x36x9x16xbf16, #tpu.memory_space<vmem>>, vector<1x1x8x16xbf16>
    %216 = vector.shape_cast %215 : vector<1x1x8x16xbf16> to vector<8x16xbf16>
    %c4_251 = arith.constant 4 : index
    %c0_252 = arith.constant 0 : index
    %c0_253 = arith.constant 0 : index
    %217 = vector.load %arg2[%c4_251, %c0_252, %c0_253] : memref<9x16x16xbf16, #tpu.memory_space<vmem>>, vector<1x16x16xbf16>
    %218 = vector.shape_cast %217 : vector<1x16x16xbf16> to vector<16x16xbf16>
    %cst_254 = arith.constant dense<0.000000e+00> : vector<8x16xf32>
    %219 = tpu.matmul %216, %218, %cst_254 {dimension_numbers = #tpu.dot_dimension_numbers<[1], [0], [0], [1], [0, 0, 1, 1], [], []>} : vector<8x16xbf16>, vector<16x16xbf16>, vector<8x16xf32> -> vector<8x16xf32>
    %220 = arith.addf %214, %219 : vector<8x16xf32>
    %c0_255 = arith.constant 0 : index
    %c21_256 = arith.constant 21 : index
    %c1_257 = arith.constant 1 : index
    %c0_258 = arith.constant 0 : index
    %221 = vector.load %arg1[%c0_255, %c21_256, %c1_257, %c0_258] : memref<1x36x9x16xbf16, #tpu.memory_space<vmem>>, vector<1x1x8x16xbf16>
    %222 = vector.shape_cast %221 : vector<1x1x8x16xbf16> to vector<8x16xbf16>
    %c5_259 = arith.constant 5 : index
    %c0_260 = arith.constant 0 : index
    %c0_261 = arith.constant 0 : index
    %223 = vector.load %arg2[%c5_259, %c0_260, %c0_261] : memref<9x16x16xbf16, #tpu.memory_space<vmem>>, vector<1x16x16xbf16>
    %224 = vector.shape_cast %223 : vector<1x16x16xbf16> to vector<16x16xbf16>
    %cst_262 = arith.constant dense<0.000000e+00> : vector<8x16xf32>
    %225 = tpu.matmul %222, %224, %cst_262 {dimension_numbers = #tpu.dot_dimension_numbers<[1], [0], [0], [1], [0, 0, 1, 1], [], []>} : vector<8x16xbf16>, vector<16x16xbf16>, vector<8x16xf32> -> vector<8x16xf32>
    %226 = arith.addf %220, %225 : vector<8x16xf32>
    %c0_263 = arith.constant 0 : index
    %c4_264 = arith.constant 4 : index
    %c0_265 = arith.constant 0 : index
    %c0_266 = arith.constant 0 : index
    %227 = vector.load %arg1[%c0_263, %c4_264, %c0_265, %c0_266] : memref<1x36x9x16xbf16, #tpu.memory_space<vmem>>, vector<1x1x8x16xbf16>
    %228 = vector.shape_cast %227 : vector<1x1x8x16xbf16> to vector<8x16xbf16>
    %c6_267 = arith.constant 6 : index
    %c0_268 = arith.constant 0 : index
    %c0_269 = arith.constant 0 : index
    %229 = vector.load %arg2[%c6_267, %c0_268, %c0_269] : memref<9x16x16xbf16, #tpu.memory_space<vmem>>, vector<1x16x16xbf16>
    %230 = vector.shape_cast %229 : vector<1x16x16xbf16> to vector<16x16xbf16>
    %cst_270 = arith.constant dense<0.000000e+00> : vector<8x16xf32>
    %231 = tpu.matmul %228, %230, %cst_270 {dimension_numbers = #tpu.dot_dimension_numbers<[1], [0], [0], [1], [0, 0, 1, 1], [], []>} : vector<8x16xbf16>, vector<16x16xbf16>, vector<8x16xf32> -> vector<8x16xf32>
    %232 = arith.addf %226, %231 : vector<8x16xf32>
    %c0_271 = arith.constant 0 : index
    %c13 = arith.constant 13 : index
    %c0_272 = arith.constant 0 : index
    %c0_273 = arith.constant 0 : index
    %233 = vector.load %arg1[%c0_271, %c13, %c0_272, %c0_273] : memref<1x36x9x16xbf16, #tpu.memory_space<vmem>>, vector<1x1x8x16xbf16>
    %234 = vector.shape_cast %233 : vector<1x1x8x16xbf16> to vector<8x16xbf16>
    %c7_274 = arith.constant 7 : index
    %c0_275 = arith.constant 0 : index
    %c0_276 = arith.constant 0 : index
    %235 = vector.load %arg2[%c7_274, %c0_275, %c0_276] : memref<9x16x16xbf16, #tpu.memory_space<vmem>>, vector<1x16x16xbf16>
    %236 = vector.shape_cast %235 : vector<1x16x16xbf16> to vector<16x16xbf16>
    %cst_277 = arith.constant dense<0.000000e+00> : vector<8x16xf32>
    %237 = tpu.matmul %234, %236, %cst_277 {dimension_numbers = #tpu.dot_dimension_numbers<[1], [0], [0], [1], [0, 0, 1, 1], [], []>} : vector<8x16xbf16>, vector<16x16xbf16>, vector<8x16xf32> -> vector<8x16xf32>
    %238 = arith.addf %232, %237 : vector<8x16xf32>
    %c0_278 = arith.constant 0 : index
    %c4_279 = arith.constant 4 : index
    %c1_280 = arith.constant 1 : index
    %c0_281 = arith.constant 0 : index
    %239 = vector.load %arg1[%c0_278, %c4_279, %c1_280, %c0_281] : memref<1x36x9x16xbf16, #tpu.memory_space<vmem>>, vector<1x1x8x16xbf16>
    %240 = vector.shape_cast %239 : vector<1x1x8x16xbf16> to vector<8x16xbf16>
    %c8_282 = arith.constant 8 : index
    %c0_283 = arith.constant 0 : index
    %c0_284 = arith.constant 0 : index
    %241 = vector.load %arg2[%c8_282, %c0_283, %c0_284] : memref<9x16x16xbf16, #tpu.memory_space<vmem>>, vector<1x16x16xbf16>
    %242 = vector.shape_cast %241 : vector<1x16x16xbf16> to vector<16x16xbf16>
    %cst_285 = arith.constant dense<0.000000e+00> : vector<8x16xf32>
    %243 = tpu.matmul %240, %242, %cst_285 {dimension_numbers = #tpu.dot_dimension_numbers<[1], [0], [0], [1], [0, 0, 1, 1], [], []>} : vector<8x16xbf16>, vector<16x16xbf16>, vector<8x16xf32> -> vector<8x16xf32>
    %244 = arith.addf %238, %243 : vector<8x16xf32>
    %245 = vector.broadcast %0 : vector<1x16xf32> to vector<8x16xf32>
    %246 = arith.addf %244, %245 : vector<8x16xf32>
    %cst_286 = arith.constant 0.000000e+00 : f32
    %247 = vector.broadcast %cst_286 : f32 to vector<8x16xf32>
    %248 = arith.maximumf %246, %247 : vector<8x16xf32>
    %249 = arith.truncf %248 : vector<8x16xf32> to vector<8x16xbf16>
    %c0_287 = arith.constant 0 : index
    %c3_288 = arith.constant 3 : index
    %c0_289 = arith.constant 0 : index
    %c0_290 = arith.constant 0 : index
    %250 = vector.load %arg4[%c0_287, %c3_288, %c0_289, %c0_290] : memref<1x8x8x16xbf16, #tpu.memory_space<vmem>>, vector<1x1x8x16xbf16>
    %251 = vector.shape_cast %250 : vector<1x1x8x16xbf16> to vector<8x16xbf16>
    %252 = vector.shape_cast %249 : vector<8x16xbf16> to vector<1x1x8x16xbf16>
    tpu.vector_store %arg4[%c0_287, %c3_288, %c0_289, %c0_290], %252 {strides = array<i32>} : memref<1x8x8x16xbf16, #tpu.memory_space<vmem>>, vector<1x1x8x16xbf16>,
    %cst_291 = arith.constant 0.000000e+00 : f32
    %253 = vector.broadcast %cst_291 : f32 to vector<8x16xf32>
    %c0_292 = arith.constant 0 : index
    %c4_293 = arith.constant 4 : index
    %c0_294 = arith.constant 0 : index
    %c0_295 = arith.constant 0 : index
    %254 = vector.load %arg1[%c0_292, %c4_293, %c0_294, %c0_295] : memref<1x36x9x16xbf16, #tpu.memory_space<vmem>>, vector<1x1x8x16xbf16>
    %255 = vector.shape_cast %254 : vector<1x1x8x16xbf16> to vector<8x16xbf16>
    %c0_296 = arith.constant 0 : index
    %c0_297 = arith.constant 0 : index
    %c0_298 = arith.constant 0 : index
    %256 = vector.load %arg2[%c0_296, %c0_297, %c0_298] : memref<9x16x16xbf16, #tpu.memory_space<vmem>>, vector<1x16x16xbf16>
    %257 = vector.shape_cast %256 : vector<1x16x16xbf16> to vector<16x16xbf16>
    %cst_299 = arith.constant dense<0.000000e+00> : vector<8x16xf32>
    %258 = tpu.matmul %255, %257, %cst_299 {dimension_numbers = #tpu.dot_dimension_numbers<[1], [0], [0], [1], [0, 0, 1, 1], [], []>} : vector<8x16xbf16>, vector<16x16xbf16>, vector<8x16xf32> -> vector<8x16xf32>
    %259 = arith.addf %253, %258 : vector<8x16xf32>
    %c0_300 = arith.constant 0 : index
    %c13_301 = arith.constant 13 : index
    %c0_302 = arith.constant 0 : index
    %c0_303 = arith.constant 0 : index
    %260 = vector.load %arg1[%c0_300, %c13_301, %c0_302, %c0_303] : memref<1x36x9x16xbf16, #tpu.memory_space<vmem>>, vector<1x1x8x16xbf16>
    %261 = vector.shape_cast %260 : vector<1x1x8x16xbf16> to vector<8x16xbf16>
    %c1_304 = arith.constant 1 : index
    %c0_305 = arith.constant 0 : index
    %c0_306 = arith.constant 0 : index
    %262 = vector.load %arg2[%c1_304, %c0_305, %c0_306] : memref<9x16x16xbf16, #tpu.memory_space<vmem>>, vector<1x16x16xbf16>
    %263 = vector.shape_cast %262 : vector<1x16x16xbf16> to vector<16x16xbf16>
    %cst_307 = arith.constant dense<0.000000e+00> : vector<8x16xf32>
    %264 = tpu.matmul %261, %263, %cst_307 {dimension_numbers = #tpu.dot_dimension_numbers<[1], [0], [0], [1], [0, 0, 1, 1], [], []>} : vector<8x16xbf16>, vector<16x16xbf16>, vector<8x16xf32> -> vector<8x16xf32>
    %265 = arith.addf %259, %264 : vector<8x16xf32>
    %c0_308 = arith.constant 0 : index
    %c4_309 = arith.constant 4 : index
    %c1_310 = arith.constant 1 : index
    %c0_311 = arith.constant 0 : index
    %266 = vector.load %arg1[%c0_308, %c4_309, %c1_310, %c0_311] : memref<1x36x9x16xbf16, #tpu.memory_space<vmem>>, vector<1x1x8x16xbf16>
    %267 = vector.shape_cast %266 : vector<1x1x8x16xbf16> to vector<8x16xbf16>
    %c2_312 = arith.constant 2 : index
    %c0_313 = arith.constant 0 : index
    %c0_314 = arith.constant 0 : index
    %268 = vector.load %arg2[%c2_312, %c0_313, %c0_314] : memref<9x16x16xbf16, #tpu.memory_space<vmem>>, vector<1x16x16xbf16>
    %269 = vector.shape_cast %268 : vector<1x16x16xbf16> to vector<16x16xbf16>
    %cst_315 = arith.constant dense<0.000000e+00> : vector<8x16xf32>
    %270 = tpu.matmul %267, %269, %cst_315 {dimension_numbers = #tpu.dot_dimension_numbers<[1], [0], [0], [1], [0, 0, 1, 1], [], []>} : vector<8x16xbf16>, vector<16x16xbf16>, vector<8x16xf32> -> vector<8x16xf32>
    %271 = arith.addf %265, %270 : vector<8x16xf32>
    %c0_316 = arith.constant 0 : index
    %c22 = arith.constant 22 : index
    %c0_317 = arith.constant 0 : index
    %c0_318 = arith.constant 0 : index
    %272 = vector.load %arg1[%c0_316, %c22, %c0_317, %c0_318] : memref<1x36x9x16xbf16, #tpu.memory_space<vmem>>, vector<1x1x8x16xbf16>
    %273 = vector.shape_cast %272 : vector<1x1x8x16xbf16> to vector<8x16xbf16>
    %c3_319 = arith.constant 3 : index
    %c0_320 = arith.constant 0 : index
    %c0_321 = arith.constant 0 : index
    %274 = vector.load %arg2[%c3_319, %c0_320, %c0_321] : memref<9x16x16xbf16, #tpu.memory_space<vmem>>, vector<1x16x16xbf16>
    %275 = vector.shape_cast %274 : vector<1x16x16xbf16> to vector<16x16xbf16>
    %cst_322 = arith.constant dense<0.000000e+00> : vector<8x16xf32>
    %276 = tpu.matmul %273, %275, %cst_322 {dimension_numbers = #tpu.dot_dimension_numbers<[1], [0], [0], [1], [0, 0, 1, 1], [], []>} : vector<8x16xbf16>, vector<16x16xbf16>, vector<8x16xf32> -> vector<8x16xf32>
    %277 = arith.addf %271, %276 : vector<8x16xf32>
    %c0_323 = arith.constant 0 : index
    %c31 = arith.constant 31 : index
    %c0_324 = arith.constant 0 : index
    %c0_325 = arith.constant 0 : index
    %278 = vector.load %arg1[%c0_323, %c31, %c0_324, %c0_325] : memref<1x36x9x16xbf16, #tpu.memory_space<vmem>>, vector<1x1x8x16xbf16>
    %279 = vector.shape_cast %278 : vector<1x1x8x16xbf16> to vector<8x16xbf16>
    %c4_326 = arith.constant 4 : index
    %c0_327 = arith.constant 0 : index
    %c0_328 = arith.constant 0 : index
    %280 = vector.load %arg2[%c4_326, %c0_327, %c0_328] : memref<9x16x16xbf16, #tpu.memory_space<vmem>>, vector<1x16x16xbf16>
    %281 = vector.shape_cast %280 : vector<1x16x16xbf16> to vector<16x16xbf16>
    %cst_329 = arith.constant dense<0.000000e+00> : vector<8x16xf32>
    %282 = tpu.matmul %279, %281, %cst_329 {dimension_numbers = #tpu.dot_dimension_numbers<[1], [0], [0], [1], [0, 0, 1, 1], [], []>} : vector<8x16xbf16>, vector<16x16xbf16>, vector<8x16xf32> -> vector<8x16xf32>
    %283 = arith.addf %277, %282 : vector<8x16xf32>
    %c0_330 = arith.constant 0 : index
    %c22_331 = arith.constant 22 : index
    %c1_332 = arith.constant 1 : index
    %c0_333 = arith.constant 0 : index
    %284 = vector.load %arg1[%c0_330, %c22_331, %c1_332, %c0_333] : memref<1x36x9x16xbf16, #tpu.memory_space<vmem>>, vector<1x1x8x16xbf16>
    %285 = vector.shape_cast %284 : vector<1x1x8x16xbf16> to vector<8x16xbf16>
    %c5_334 = arith.constant 5 : index
    %c0_335 = arith.constant 0 : index
    %c0_336 = arith.constant 0 : index
    %286 = vector.load %arg2[%c5_334, %c0_335, %c0_336] : memref<9x16x16xbf16, #tpu.memory_space<vmem>>, vector<1x16x16xbf16>
    %287 = vector.shape_cast %286 : vector<1x16x16xbf16> to vector<16x16xbf16>
    %cst_337 = arith.constant dense<0.000000e+00> : vector<8x16xf32>
    %288 = tpu.matmul %285, %287, %cst_337 {dimension_numbers = #tpu.dot_dimension_numbers<[1], [0], [0], [1], [0, 0, 1, 1], [], []>} : vector<8x16xbf16>, vector<16x16xbf16>, vector<8x16xf32> -> vector<8x16xf32>
    %289 = arith.addf %283, %288 : vector<8x16xf32>
    %c0_338 = arith.constant 0 : index
    %c5_339 = arith.constant 5 : index
    %c0_340 = arith.constant 0 : index
    %c0_341 = arith.constant 0 : index
    %290 = vector.load %arg1[%c0_338, %c5_339, %c0_340, %c0_341] : memref<1x36x9x16xbf16, #tpu.memory_space<vmem>>, vector<1x1x8x16xbf16>
    %291 = vector.shape_cast %290 : vector<1x1x8x16xbf16> to vector<8x16xbf16>
    %c6_342 = arith.constant 6 : index
    %c0_343 = arith.constant 0 : index
    %c0_344 = arith.constant 0 : index
    %292 = vector.load %arg2[%c6_342, %c0_343, %c0_344] : memref<9x16x16xbf16, #tpu.memory_space<vmem>>, vector<1x16x16xbf16>
    %293 = vector.shape_cast %292 : vector<1x16x16xbf16> to vector<16x16xbf16>
    %cst_345 = arith.constant dense<0.000000e+00> : vector<8x16xf32>
    %294 = tpu.matmul %291, %293, %cst_345 {dimension_numbers = #tpu.dot_dimension_numbers<[1], [0], [0], [1], [0, 0, 1, 1], [], []>} : vector<8x16xbf16>, vector<16x16xbf16>, vector<8x16xf32> -> vector<8x16xf32>
    %295 = arith.addf %289, %294 : vector<8x16xf32>
    %c0_346 = arith.constant 0 : index
    %c14 = arith.constant 14 : index
    %c0_347 = arith.constant 0 : index
    %c0_348 = arith.constant 0 : index
    %296 = vector.load %arg1[%c0_346, %c14, %c0_347, %c0_348] : memref<1x36x9x16xbf16, #tpu.memory_space<vmem>>, vector<1x1x8x16xbf16>
    %297 = vector.shape_cast %296 : vector<1x1x8x16xbf16> to vector<8x16xbf16>
    %c7_349 = arith.constant 7 : index
    %c0_350 = arith.constant 0 : index
    %c0_351 = arith.constant 0 : index
    %298 = vector.load %arg2[%c7_349, %c0_350, %c0_351] : memref<9x16x16xbf16, #tpu.memory_space<vmem>>, vector<1x16x16xbf16>
    %299 = vector.shape_cast %298 : vector<1x16x16xbf16> to vector<16x16xbf16>
    %cst_352 = arith.constant dense<0.000000e+00> : vector<8x16xf32>
    %300 = tpu.matmul %297, %299, %cst_352 {dimension_numbers = #tpu.dot_dimension_numbers<[1], [0], [0], [1], [0, 0, 1, 1], [], []>} : vector<8x16xbf16>, vector<16x16xbf16>, vector<8x16xf32> -> vector<8x16xf32>
    %301 = arith.addf %295, %300 : vector<8x16xf32>
    %c0_353 = arith.constant 0 : index
    %c5_354 = arith.constant 5 : index
    %c1_355 = arith.constant 1 : index
    %c0_356 = arith.constant 0 : index
    %302 = vector.load %arg1[%c0_353, %c5_354, %c1_355, %c0_356] : memref<1x36x9x16xbf16, #tpu.memory_space<vmem>>, vector<1x1x8x16xbf16>
    %303 = vector.shape_cast %302 : vector<1x1x8x16xbf16> to vector<8x16xbf16>
    %c8_357 = arith.constant 8 : index
    %c0_358 = arith.constant 0 : index
    %c0_359 = arith.constant 0 : index
    %304 = vector.load %arg2[%c8_357, %c0_358, %c0_359] : memref<9x16x16xbf16, #tpu.memory_space<vmem>>, vector<1x16x16xbf16>
    %305 = vector.shape_cast %304 : vector<1x16x16xbf16> to vector<16x16xbf16>
    %cst_360 = arith.constant dense<0.000000e+00> : vector<8x16xf32>
    %306 = tpu.matmul %303, %305, %cst_360 {dimension_numbers = #tpu.dot_dimension_numbers<[1], [0], [0], [1], [0, 0, 1, 1], [], []>} : vector<8x16xbf16>, vector<16x16xbf16>, vector<8x16xf32> -> vector<8x16xf32>
    %307 = arith.addf %301, %306 : vector<8x16xf32>
    %308 = vector.broadcast %0 : vector<1x16xf32> to vector<8x16xf32>
    %309 = arith.addf %307, %308 : vector<8x16xf32>
    %cst_361 = arith.constant 0.000000e+00 : f32
    %310 = vector.broadcast %cst_361 : f32 to vector<8x16xf32>
    %311 = arith.maximumf %309, %310 : vector<8x16xf32>
    %312 = arith.truncf %311 : vector<8x16xf32> to vector<8x16xbf16>
    %c0_362 = arith.constant 0 : index
    %c4_363 = arith.constant 4 : index
    %c0_364 = arith.constant 0 : index
    %c0_365 = arith.constant 0 : index
    %313 = vector.load %arg4[%c0_362, %c4_363, %c0_364, %c0_365] : memref<1x8x8x16xbf16, #tpu.memory_space<vmem>>, vector<1x1x8x16xbf16>
    %314 = vector.shape_cast %313 : vector<1x1x8x16xbf16> to vector<8x16xbf16>
    %315 = vector.shape_cast %312 : vector<8x16xbf16> to vector<1x1x8x16xbf16>
    tpu.vector_store %arg4[%c0_362, %c4_363, %c0_364, %c0_365], %315 {strides = array<i32>} : memref<1x8x8x16xbf16, #tpu.memory_space<vmem>>, vector<1x1x8x16xbf16>,
    %cst_366 = arith.constant 0.000000e+00 : f32
    %316 = vector.broadcast %cst_366 : f32 to vector<8x16xf32>
    %c0_367 = arith.constant 0 : index
    %c5_368 = arith.constant 5 : index
    %c0_369 = arith.constant 0 : index
    %c0_370 = arith.constant 0 : index
    %317 = vector.load %arg1[%c0_367, %c5_368, %c0_369, %c0_370] : memref<1x36x9x16xbf16, #tpu.memory_space<vmem>>, vector<1x1x8x16xbf16>
    %318 = vector.shape_cast %317 : vector<1x1x8x16xbf16> to vector<8x16xbf16>
    %c0_371 = arith.constant 0 : index
    %c0_372 = arith.constant 0 : index
    %c0_373 = arith.constant 0 : index
    %319 = vector.load %arg2[%c0_371, %c0_372, %c0_373] : memref<9x16x16xbf16, #tpu.memory_space<vmem>>, vector<1x16x16xbf16>
    %320 = vector.shape_cast %319 : vector<1x16x16xbf16> to vector<16x16xbf16>
    %cst_374 = arith.constant dense<0.000000e+00> : vector<8x16xf32>
    %321 = tpu.matmul %318, %320, %cst_374 {dimension_numbers = #tpu.dot_dimension_numbers<[1], [0], [0], [1], [0, 0, 1, 1], [], []>} : vector<8x16xbf16>, vector<16x16xbf16>, vector<8x16xf32> -> vector<8x16xf32>
    %322 = arith.addf %316, %321 : vector<8x16xf32>
    %c0_375 = arith.constant 0 : index
    %c14_376 = arith.constant 14 : index
    %c0_377 = arith.constant 0 : index
    %c0_378 = arith.constant 0 : index
    %323 = vector.load %arg1[%c0_375, %c14_376, %c0_377, %c0_378] : memref<1x36x9x16xbf16, #tpu.memory_space<vmem>>, vector<1x1x8x16xbf16>
    %324 = vector.shape_cast %323 : vector<1x1x8x16xbf16> to vector<8x16xbf16>
    %c1_379 = arith.constant 1 : index
    %c0_380 = arith.constant 0 : index
    %c0_381 = arith.constant 0 : index
    %325 = vector.load %arg2[%c1_379, %c0_380, %c0_381] : memref<9x16x16xbf16, #tpu.memory_space<vmem>>, vector<1x16x16xbf16>
    %326 = vector.shape_cast %325 : vector<1x16x16xbf16> to vector<16x16xbf16>
    %cst_382 = arith.constant dense<0.000000e+00> : vector<8x16xf32>
    %327 = tpu.matmul %324, %326, %cst_382 {dimension_numbers = #tpu.dot_dimension_numbers<[1], [0], [0], [1], [0, 0, 1, 1], [], []>} : vector<8x16xbf16>, vector<16x16xbf16>, vector<8x16xf32> -> vector<8x16xf32>
    %328 = arith.addf %322, %327 : vector<8x16xf32>
    %c0_383 = arith.constant 0 : index
    %c5_384 = arith.constant 5 : index
    %c1_385 = arith.constant 1 : index
    %c0_386 = arith.constant 0 : index
    %329 = vector.load %arg1[%c0_383, %c5_384, %c1_385, %c0_386] : memref<1x36x9x16xbf16, #tpu.memory_space<vmem>>, vector<1x1x8x16xbf16>
    %330 = vector.shape_cast %329 : vector<1x1x8x16xbf16> to vector<8x16xbf16>
    %c2_387 = arith.constant 2 : index
    %c0_388 = arith.constant 0 : index
    %c0_389 = arith.constant 0 : index
    %331 = vector.load %arg2[%c2_387, %c0_388, %c0_389] : memref<9x16x16xbf16, #tpu.memory_space<vmem>>, vector<1x16x16xbf16>
    %332 = vector.shape_cast %331 : vector<1x16x16xbf16> to vector<16x16xbf16>
    %cst_390 = arith.constant dense<0.000000e+00> : vector<8x16xf32>
    %333 = tpu.matmul %330, %332, %cst_390 {dimension_numbers = #tpu.dot_dimension_numbers<[1], [0], [0], [1], [0, 0, 1, 1], [], []>} : vector<8x16xbf16>, vector<16x16xbf16>, vector<8x16xf32> -> vector<8x16xf32>
    %334 = arith.addf %328, %333 : vector<8x16xf32>
    %c0_391 = arith.constant 0 : index
    %c23 = arith.constant 23 : index
    %c0_392 = arith.constant 0 : index
    %c0_393 = arith.constant 0 : index
    %335 = vector.load %arg1[%c0_391, %c23, %c0_392, %c0_393] : memref<1x36x9x16xbf16, #tpu.memory_space<vmem>>, vector<1x1x8x16xbf16>
    %336 = vector.shape_cast %335 : vector<1x1x8x16xbf16> to vector<8x16xbf16>
    %c3_394 = arith.constant 3 : index
    %c0_395 = arith.constant 0 : index
    %c0_396 = arith.constant 0 : index
    %337 = vector.load %arg2[%c3_394, %c0_395, %c0_396] : memref<9x16x16xbf16, #tpu.memory_space<vmem>>, vector<1x16x16xbf16>
    %338 = vector.shape_cast %337 : vector<1x16x16xbf16> to vector<16x16xbf16>
    %cst_397 = arith.constant dense<0.000000e+00> : vector<8x16xf32>
    %339 = tpu.matmul %336, %338, %cst_397 {dimension_numbers = #tpu.dot_dimension_numbers<[1], [0], [0], [1], [0, 0, 1, 1], [], []>} : vector<8x16xbf16>, vector<16x16xbf16>, vector<8x16xf32> -> vector<8x16xf32>
    %340 = arith.addf %334, %339 : vector<8x16xf32>
    %c0_398 = arith.constant 0 : index
    %c32 = arith.constant 32 : index
    %c0_399 = arith.constant 0 : index
    %c0_400 = arith.constant 0 : index
    %341 = vector.load %arg1[%c0_398, %c32, %c0_399, %c0_400] : memref<1x36x9x16xbf16, #tpu.memory_space<vmem>>, vector<1x1x8x16xbf16>
    %342 = vector.shape_cast %341 : vector<1x1x8x16xbf16> to vector<8x16xbf16>
    %c4_401 = arith.constant 4 : index
    %c0_402 = arith.constant 0 : index
    %c0_403 = arith.constant 0 : index
    %343 = vector.load %arg2[%c4_401, %c0_402, %c0_403] : memref<9x16x16xbf16, #tpu.memory_space<vmem>>, vector<1x16x16xbf16>
    %344 = vector.shape_cast %343 : vector<1x16x16xbf16> to vector<16x16xbf16>
    %cst_404 = arith.constant dense<0.000000e+00> : vector<8x16xf32>
    %345 = tpu.matmul %342, %344, %cst_404 {dimension_numbers = #tpu.dot_dimension_numbers<[1], [0], [0], [1], [0, 0, 1, 1], [], []>} : vector<8x16xbf16>, vector<16x16xbf16>, vector<8x16xf32> -> vector<8x16xf32>
    %346 = arith.addf %340, %345 : vector<8x16xf32>
    %c0_405 = arith.constant 0 : index
    %c23_406 = arith.constant 23 : index
    %c1_407 = arith.constant 1 : index
    %c0_408 = arith.constant 0 : index
    %347 = vector.load %arg1[%c0_405, %c23_406, %c1_407, %c0_408] : memref<1x36x9x16xbf16, #tpu.memory_space<vmem>>, vector<1x1x8x16xbf16>
    %348 = vector.shape_cast %347 : vector<1x1x8x16xbf16> to vector<8x16xbf16>
    %c5_409 = arith.constant 5 : index
    %c0_410 = arith.constant 0 : index
    %c0_411 = arith.constant 0 : index
    %349 = vector.load %arg2[%c5_409, %c0_410, %c0_411] : memref<9x16x16xbf16, #tpu.memory_space<vmem>>, vector<1x16x16xbf16>
    %350 = vector.shape_cast %349 : vector<1x16x16xbf16> to vector<16x16xbf16>
    %cst_412 = arith.constant dense<0.000000e+00> : vector<8x16xf32>
    %351 = tpu.matmul %348, %350, %cst_412 {dimension_numbers = #tpu.dot_dimension_numbers<[1], [0], [0], [1], [0, 0, 1, 1], [], []>} : vector<8x16xbf16>, vector<16x16xbf16>, vector<8x16xf32> -> vector<8x16xf32>
    %352 = arith.addf %346, %351 : vector<8x16xf32>
    %c0_413 = arith.constant 0 : index
    %c6_414 = arith.constant 6 : index
    %c0_415 = arith.constant 0 : index
    %c0_416 = arith.constant 0 : index
    %353 = vector.load %arg1[%c0_413, %c6_414, %c0_415, %c0_416] : memref<1x36x9x16xbf16, #tpu.memory_space<vmem>>, vector<1x1x8x16xbf16>
    %354 = vector.shape_cast %353 : vector<1x1x8x16xbf16> to vector<8x16xbf16>
    %c6_417 = arith.constant 6 : index
    %c0_418 = arith.constant 0 : index
    %c0_419 = arith.constant 0 : index
    %355 = vector.load %arg2[%c6_417, %c0_418, %c0_419] : memref<9x16x16xbf16, #tpu.memory_space<vmem>>, vector<1x16x16xbf16>
    %356 = vector.shape_cast %355 : vector<1x16x16xbf16> to vector<16x16xbf16>
    %cst_420 = arith.constant dense<0.000000e+00> : vector<8x16xf32>
    %357 = tpu.matmul %354, %356, %cst_420 {dimension_numbers = #tpu.dot_dimension_numbers<[1], [0], [0], [1], [0, 0, 1, 1], [], []>} : vector<8x16xbf16>, vector<16x16xbf16>, vector<8x16xf32> -> vector<8x16xf32>
    %358 = arith.addf %352, %357 : vector<8x16xf32>
    %c0_421 = arith.constant 0 : index
    %c15 = arith.constant 15 : index
    %c0_422 = arith.constant 0 : index
    %c0_423 = arith.constant 0 : index
    %359 = vector.load %arg1[%c0_421, %c15, %c0_422, %c0_423] : memref<1x36x9x16xbf16, #tpu.memory_space<vmem>>, vector<1x1x8x16xbf16>
    %360 = vector.shape_cast %359 : vector<1x1x8x16xbf16> to vector<8x16xbf16>
    %c7_424 = arith.constant 7 : index
    %c0_425 = arith.constant 0 : index
    %c0_426 = arith.constant 0 : index
    %361 = vector.load %arg2[%c7_424, %c0_425, %c0_426] : memref<9x16x16xbf16, #tpu.memory_space<vmem>>, vector<1x16x16xbf16>
    %362 = vector.shape_cast %361 : vector<1x16x16xbf16> to vector<16x16xbf16>
    %cst_427 = arith.constant dense<0.000000e+00> : vector<8x16xf32>
    %363 = tpu.matmul %360, %362, %cst_427 {dimension_numbers = #tpu.dot_dimension_numbers<[1], [0], [0], [1], [0, 0, 1, 1], [], []>} : vector<8x16xbf16>, vector<16x16xbf16>, vector<8x16xf32> -> vector<8x16xf32>
    %364 = arith.addf %358, %363 : vector<8x16xf32>
    %c0_428 = arith.constant 0 : index
    %c6_429 = arith.constant 6 : index
    %c1_430 = arith.constant 1 : index
    %c0_431 = arith.constant 0 : index
    %365 = vector.load %arg1[%c0_428, %c6_429, %c1_430, %c0_431] : memref<1x36x9x16xbf16, #tpu.memory_space<vmem>>, vector<1x1x8x16xbf16>
    %366 = vector.shape_cast %365 : vector<1x1x8x16xbf16> to vector<8x16xbf16>
    %c8_432 = arith.constant 8 : index
    %c0_433 = arith.constant 0 : index
    %c0_434 = arith.constant 0 : index
    %367 = vector.load %arg2[%c8_432, %c0_433, %c0_434] : memref<9x16x16xbf16, #tpu.memory_space<vmem>>, vector<1x16x16xbf16>
    %368 = vector.shape_cast %367 : vector<1x16x16xbf16> to vector<16x16xbf16>
    %cst_435 = arith.constant dense<0.000000e+00> : vector<8x16xf32>
    %369 = tpu.matmul %366, %368, %cst_435 {dimension_numbers = #tpu.dot_dimension_numbers<[1], [0], [0], [1], [0, 0, 1, 1], [], []>} : vector<8x16xbf16>, vector<16x16xbf16>, vector<8x16xf32> -> vector<8x16xf32>
    %370 = arith.addf %364, %369 : vector<8x16xf32>
    %371 = vector.broadcast %0 : vector<1x16xf32> to vector<8x16xf32>
    %372 = arith.addf %370, %371 : vector<8x16xf32>
    %cst_436 = arith.constant 0.000000e+00 : f32
    %373 = vector.broadcast %cst_436 : f32 to vector<8x16xf32>
    %374 = arith.maximumf %372, %373 : vector<8x16xf32>
    %375 = arith.truncf %374 : vector<8x16xf32> to vector<8x16xbf16>
    %c0_437 = arith.constant 0 : index
    %c5_438 = arith.constant 5 : index
    %c0_439 = arith.constant 0 : index
    %c0_440 = arith.constant 0 : index
    %376 = vector.load %arg4[%c0_437, %c5_438, %c0_439, %c0_440] : memref<1x8x8x16xbf16, #tpu.memory_space<vmem>>, vector<1x1x8x16xbf16>
    %377 = vector.shape_cast %376 : vector<1x1x8x16xbf16> to vector<8x16xbf16>
    %378 = vector.shape_cast %375 : vector<8x16xbf16> to vector<1x1x8x16xbf16>
    tpu.vector_store %arg4[%c0_437, %c5_438, %c0_439, %c0_440], %378 {strides = array<i32>} : memref<1x8x8x16xbf16, #tpu.memory_space<vmem>>, vector<1x1x8x16xbf16>,
    %cst_441 = arith.constant 0.000000e+00 : f32
    %379 = vector.broadcast %cst_441 : f32 to vector<8x16xf32>
    %c0_442 = arith.constant 0 : index
    %c6_443 = arith.constant 6 : index
    %c0_444 = arith.constant 0 : index
    %c0_445 = arith.constant 0 : index
    %380 = vector.load %arg1[%c0_442, %c6_443, %c0_444, %c0_445] : memref<1x36x9x16xbf16, #tpu.memory_space<vmem>>, vector<1x1x8x16xbf16>
    %381 = vector.shape_cast %380 : vector<1x1x8x16xbf16> to vector<8x16xbf16>
    %c0_446 = arith.constant 0 : index
    %c0_447 = arith.constant 0 : index
    %c0_448 = arith.constant 0 : index
    %382 = vector.load %arg2[%c0_446, %c0_447, %c0_448] : memref<9x16x16xbf16, #tpu.memory_space<vmem>>, vector<1x16x16xbf16>
    %383 = vector.shape_cast %382 : vector<1x16x16xbf16> to vector<16x16xbf16>
    %cst_449 = arith.constant dense<0.000000e+00> : vector<8x16xf32>
    %384 = tpu.matmul %381, %383, %cst_449 {dimension_numbers = #tpu.dot_dimension_numbers<[1], [0], [0], [1], [0, 0, 1, 1], [], []>} : vector<8x16xbf16>, vector<16x16xbf16>, vector<8x16xf32> -> vector<8x16xf32>
    %385 = arith.addf %379, %384 : vector<8x16xf32>
    %c0_450 = arith.constant 0 : index
    %c15_451 = arith.constant 15 : index
    %c0_452 = arith.constant 0 : index
    %c0_453 = arith.constant 0 : index
    %386 = vector.load %arg1[%c0_450, %c15_451, %c0_452, %c0_453] : memref<1x36x9x16xbf16, #tpu.memory_space<vmem>>, vector<1x1x8x16xbf16>
    %387 = vector.shape_cast %386 : vector<1x1x8x16xbf16> to vector<8x16xbf16>
    %c1_454 = arith.constant 1 : index
    %c0_455 = arith.constant 0 : index
    %c0_456 = arith.constant 0 : index
    %388 = vector.load %arg2[%c1_454, %c0_455, %c0_456] : memref<9x16x16xbf16, #tpu.memory_space<vmem>>, vector<1x16x16xbf16>
    %389 = vector.shape_cast %388 : vector<1x16x16xbf16> to vector<16x16xbf16>
    %cst_457 = arith.constant dense<0.000000e+00> : vector<8x16xf32>
    %390 = tpu.matmul %387, %389, %cst_457 {dimension_numbers = #tpu.dot_dimension_numbers<[1], [0], [0], [1], [0, 0, 1, 1], [], []>} : vector<8x16xbf16>, vector<16x16xbf16>, vector<8x16xf32> -> vector<8x16xf32>
    %391 = arith.addf %385, %390 : vector<8x16xf32>
    %c0_458 = arith.constant 0 : index
    %c6_459 = arith.constant 6 : index
    %c1_460 = arith.constant 1 : index
    %c0_461 = arith.constant 0 : index
    %392 = vector.load %arg1[%c0_458, %c6_459, %c1_460, %c0_461] : memref<1x36x9x16xbf16, #tpu.memory_space<vmem>>, vector<1x1x8x16xbf16>
    %393 = vector.shape_cast %392 : vector<1x1x8x16xbf16> to vector<8x16xbf16>
    %c2_462 = arith.constant 2 : index
    %c0_463 = arith.constant 0 : index
    %c0_464 = arith.constant 0 : index
    %394 = vector.load %arg2[%c2_462, %c0_463, %c0_464] : memref<9x16x16xbf16, #tpu.memory_space<vmem>>, vector<1x16x16xbf16>
    %395 = vector.shape_cast %394 : vector<1x16x16xbf16> to vector<16x16xbf16>
    %cst_465 = arith.constant dense<0.000000e+00> : vector<8x16xf32>
    %396 = tpu.matmul %393, %395, %cst_465 {dimension_numbers = #tpu.dot_dimension_numbers<[1], [0], [0], [1], [0, 0, 1, 1], [], []>} : vector<8x16xbf16>, vector<16x16xbf16>, vector<8x16xf32> -> vector<8x16xf32>
    %397 = arith.addf %391, %396 : vector<8x16xf32>
    %c0_466 = arith.constant 0 : index
    %c24 = arith.constant 24 : index
    %c0_467 = arith.constant 0 : index
    %c0_468 = arith.constant 0 : index
    %398 = vector.load %arg1[%c0_466, %c24, %c0_467, %c0_468] : memref<1x36x9x16xbf16, #tpu.memory_space<vmem>>, vector<1x1x8x16xbf16>
    %399 = vector.shape_cast %398 : vector<1x1x8x16xbf16> to vector<8x16xbf16>
    %c3_469 = arith.constant 3 : index
    %c0_470 = arith.constant 0 : index
    %c0_471 = arith.constant 0 : index
    %400 = vector.load %arg2[%c3_469, %c0_470, %c0_471] : memref<9x16x16xbf16, #tpu.memory_space<vmem>>, vector<1x16x16xbf16>
    %401 = vector.shape_cast %400 : vector<1x16x16xbf16> to vector<16x16xbf16>
    %cst_472 = arith.constant dense<0.000000e+00> : vector<8x16xf32>
    %402 = tpu.matmul %399, %401, %cst_472 {dimension_numbers = #tpu.dot_dimension_numbers<[1], [0], [0], [1], [0, 0, 1, 1], [], []>} : vector<8x16xbf16>, vector<16x16xbf16>, vector<8x16xf32> -> vector<8x16xf32>
    %403 = arith.addf %397, %402 : vector<8x16xf32>
    %c0_473 = arith.constant 0 : index
    %c33 = arith.constant 33 : index
    %c0_474 = arith.constant 0 : index
    %c0_475 = arith.constant 0 : index
    %404 = vector.load %arg1[%c0_473, %c33, %c0_474, %c0_475] : memref<1x36x9x16xbf16, #tpu.memory_space<vmem>>, vector<1x1x8x16xbf16>
    %405 = vector.shape_cast %404 : vector<1x1x8x16xbf16> to vector<8x16xbf16>
    %c4_476 = arith.constant 4 : index
    %c0_477 = arith.constant 0 : index
    %c0_478 = arith.constant 0 : index
    %406 = vector.load %arg2[%c4_476, %c0_477, %c0_478] : memref<9x16x16xbf16, #tpu.memory_space<vmem>>, vector<1x16x16xbf16>
    %407 = vector.shape_cast %406 : vector<1x16x16xbf16> to vector<16x16xbf16>
    %cst_479 = arith.constant dense<0.000000e+00> : vector<8x16xf32>
    %408 = tpu.matmul %405, %407, %cst_479 {dimension_numbers = #tpu.dot_dimension_numbers<[1], [0], [0], [1], [0, 0, 1, 1], [], []>} : vector<8x16xbf16>, vector<16x16xbf16>, vector<8x16xf32> -> vector<8x16xf32>
    %409 = arith.addf %403, %408 : vector<8x16xf32>
    %c0_480 = arith.constant 0 : index
    %c24_481 = arith.constant 24 : index
    %c1_482 = arith.constant 1 : index
    %c0_483 = arith.constant 0 : index
    %410 = vector.load %arg1[%c0_480, %c24_481, %c1_482, %c0_483] : memref<1x36x9x16xbf16, #tpu.memory_space<vmem>>, vector<1x1x8x16xbf16>
    %411 = vector.shape_cast %410 : vector<1x1x8x16xbf16> to vector<8x16xbf16>
    %c5_484 = arith.constant 5 : index
    %c0_485 = arith.constant 0 : index
    %c0_486 = arith.constant 0 : index
    %412 = vector.load %arg2[%c5_484, %c0_485, %c0_486] : memref<9x16x16xbf16, #tpu.memory_space<vmem>>, vector<1x16x16xbf16>
    %413 = vector.shape_cast %412 : vector<1x16x16xbf16> to vector<16x16xbf16>
    %cst_487 = arith.constant dense<0.000000e+00> : vector<8x16xf32>
    %414 = tpu.matmul %411, %413, %cst_487 {dimension_numbers = #tpu.dot_dimension_numbers<[1], [0], [0], [1], [0, 0, 1, 1], [], []>} : vector<8x16xbf16>, vector<16x16xbf16>, vector<8x16xf32> -> vector<8x16xf32>
    %415 = arith.addf %409, %414 : vector<8x16xf32>
    %c0_488 = arith.constant 0 : index
    %c7_489 = arith.constant 7 : index
    %c0_490 = arith.constant 0 : index
    %c0_491 = arith.constant 0 : index
    %416 = vector.load %arg1[%c0_488, %c7_489, %c0_490, %c0_491] : memref<1x36x9x16xbf16, #tpu.memory_space<vmem>>, vector<1x1x8x16xbf16>
    %417 = vector.shape_cast %416 : vector<1x1x8x16xbf16> to vector<8x16xbf16>
    %c6_492 = arith.constant 6 : index
    %c0_493 = arith.constant 0 : index
    %c0_494 = arith.constant 0 : index
    %418 = vector.load %arg2[%c6_492, %c0_493, %c0_494] : memref<9x16x16xbf16, #tpu.memory_space<vmem>>, vector<1x16x16xbf16>
    %419 = vector.shape_cast %418 : vector<1x16x16xbf16> to vector<16x16xbf16>
    %cst_495 = arith.constant dense<0.000000e+00> : vector<8x16xf32>
    %420 = tpu.matmul %417, %419, %cst_495 {dimension_numbers = #tpu.dot_dimension_numbers<[1], [0], [0], [1], [0, 0, 1, 1], [], []>} : vector<8x16xbf16>, vector<16x16xbf16>, vector<8x16xf32> -> vector<8x16xf32>
    %421 = arith.addf %415, %420 : vector<8x16xf32>
    %c0_496 = arith.constant 0 : index
    %c16 = arith.constant 16 : index
    %c0_497 = arith.constant 0 : index
    %c0_498 = arith.constant 0 : index
    %422 = vector.load %arg1[%c0_496, %c16, %c0_497, %c0_498] : memref<1x36x9x16xbf16, #tpu.memory_space<vmem>>, vector<1x1x8x16xbf16>
    %423 = vector.shape_cast %422 : vector<1x1x8x16xbf16> to vector<8x16xbf16>
    %c7_499 = arith.constant 7 : index
    %c0_500 = arith.constant 0 : index
    %c0_501 = arith.constant 0 : index
    %424 = vector.load %arg2[%c7_499, %c0_500, %c0_501] : memref<9x16x16xbf16, #tpu.memory_space<vmem>>, vector<1x16x16xbf16>
    %425 = vector.shape_cast %424 : vector<1x16x16xbf16> to vector<16x16xbf16>
    %cst_502 = arith.constant dense<0.000000e+00> : vector<8x16xf32>
    %426 = tpu.matmul %423, %425, %cst_502 {dimension_numbers = #tpu.dot_dimension_numbers<[1], [0], [0], [1], [0, 0, 1, 1], [], []>} : vector<8x16xbf16>, vector<16x16xbf16>, vector<8x16xf32> -> vector<8x16xf32>
    %427 = arith.addf %421, %426 : vector<8x16xf32>
    %c0_503 = arith.constant 0 : index
    %c7_504 = arith.constant 7 : index
    %c1_505 = arith.constant 1 : index
    %c0_506 = arith.constant 0 : index
    %428 = vector.load %arg1[%c0_503, %c7_504, %c1_505, %c0_506] : memref<1x36x9x16xbf16, #tpu.memory_space<vmem>>, vector<1x1x8x16xbf16>
    %429 = vector.shape_cast %428 : vector<1x1x8x16xbf16> to vector<8x16xbf16>
    %c8_507 = arith.constant 8 : index
    %c0_508 = arith.constant 0 : index
    %c0_509 = arith.constant 0 : index
    %430 = vector.load %arg2[%c8_507, %c0_508, %c0_509] : memref<9x16x16xbf16, #tpu.memory_space<vmem>>, vector<1x16x16xbf16>
    %431 = vector.shape_cast %430 : vector<1x16x16xbf16> to vector<16x16xbf16>
    %cst_510 = arith.constant dense<0.000000e+00> : vector<8x16xf32>
    %432 = tpu.matmul %429, %431, %cst_510 {dimension_numbers = #tpu.dot_dimension_numbers<[1], [0], [0], [1], [0, 0, 1, 1], [], []>} : vector<8x16xbf16>, vector<16x16xbf16>, vector<8x16xf32> -> vector<8x16xf32>
    %433 = arith.addf %427, %432 : vector<8x16xf32>
    %434 = vector.broadcast %0 : vector<1x16xf32> to vector<8x16xf32>
    %435 = arith.addf %433, %434 : vector<8x16xf32>
    %cst_511 = arith.constant 0.000000e+00 : f32
    %436 = vector.broadcast %cst_511 : f32 to vector<8x16xf32>
    %437 = arith.maximumf %435, %436 : vector<8x16xf32>
    %438 = arith.truncf %437 : vector<8x16xf32> to vector<8x16xbf16>
    %c0_512 = arith.constant 0 : index
    %c6_513 = arith.constant 6 : index
    %c0_514 = arith.constant 0 : index
    %c0_515 = arith.constant 0 : index
    %439 = vector.load %arg4[%c0_512, %c6_513, %c0_514, %c0_515] : memref<1x8x8x16xbf16, #tpu.memory_space<vmem>>, vector<1x1x8x16xbf16>
    %440 = vector.shape_cast %439 : vector<1x1x8x16xbf16> to vector<8x16xbf16>
    %441 = vector.shape_cast %438 : vector<8x16xbf16> to vector<1x1x8x16xbf16>
    tpu.vector_store %arg4[%c0_512, %c6_513, %c0_514, %c0_515], %441 {strides = array<i32>} : memref<1x8x8x16xbf16, #tpu.memory_space<vmem>>, vector<1x1x8x16xbf16>,
    %cst_516 = arith.constant 0.000000e+00 : f32
    %442 = vector.broadcast %cst_516 : f32 to vector<8x16xf32>
    %c0_517 = arith.constant 0 : index
    %c7_518 = arith.constant 7 : index
    %c0_519 = arith.constant 0 : index
    %c0_520 = arith.constant 0 : index
    %443 = vector.load %arg1[%c0_517, %c7_518, %c0_519, %c0_520] : memref<1x36x9x16xbf16, #tpu.memory_space<vmem>>, vector<1x1x8x16xbf16>
    %444 = vector.shape_cast %443 : vector<1x1x8x16xbf16> to vector<8x16xbf16>
    %c0_521 = arith.constant 0 : index
    %c0_522 = arith.constant 0 : index
    %c0_523 = arith.constant 0 : index
    %445 = vector.load %arg2[%c0_521, %c0_522, %c0_523] : memref<9x16x16xbf16, #tpu.memory_space<vmem>>, vector<1x16x16xbf16>
    %446 = vector.shape_cast %445 : vector<1x16x16xbf16> to vector<16x16xbf16>
    %cst_524 = arith.constant dense<0.000000e+00> : vector<8x16xf32>
    %447 = tpu.matmul %444, %446, %cst_524 {dimension_numbers = #tpu.dot_dimension_numbers<[1], [0], [0], [1], [0, 0, 1, 1], [], []>} : vector<8x16xbf16>, vector<16x16xbf16>, vector<8x16xf32> -> vector<8x16xf32>
    %448 = arith.addf %442, %447 : vector<8x16xf32>
    %c0_525 = arith.constant 0 : index
    %c16_526 = arith.constant 16 : index
    %c0_527 = arith.constant 0 : index
    %c0_528 = arith.constant 0 : index
    %449 = vector.load %arg1[%c0_525, %c16_526, %c0_527, %c0_528] : memref<1x36x9x16xbf16, #tpu.memory_space<vmem>>, vector<1x1x8x16xbf16>
    %450 = vector.shape_cast %449 : vector<1x1x8x16xbf16> to vector<8x16xbf16>
    %c1_529 = arith.constant 1 : index
    %c0_530 = arith.constant 0 : index
    %c0_531 = arith.constant 0 : index
    %451 = vector.load %arg2[%c1_529, %c0_530, %c0_531] : memref<9x16x16xbf16, #tpu.memory_space<vmem>>, vector<1x16x16xbf16>
    %452 = vector.shape_cast %451 : vector<1x16x16xbf16> to vector<16x16xbf16>
    %cst_532 = arith.constant dense<0.000000e+00> : vector<8x16xf32>
    %453 = tpu.matmul %450, %452, %cst_532 {dimension_numbers = #tpu.dot_dimension_numbers<[1], [0], [0], [1], [0, 0, 1, 1], [], []>} : vector<8x16xbf16>, vector<16x16xbf16>, vector<8x16xf32> -> vector<8x16xf32>
    %454 = arith.addf %448, %453 : vector<8x16xf32>
    %c0_533 = arith.constant 0 : index
    %c7_534 = arith.constant 7 : index
    %c1_535 = arith.constant 1 : index
    %c0_536 = arith.constant 0 : index
    %455 = vector.load %arg1[%c0_533, %c7_534, %c1_535, %c0_536] : memref<1x36x9x16xbf16, #tpu.memory_space<vmem>>, vector<1x1x8x16xbf16>
    %456 = vector.shape_cast %455 : vector<1x1x8x16xbf16> to vector<8x16xbf16>
    %c2_537 = arith.constant 2 : index
    %c0_538 = arith.constant 0 : index
    %c0_539 = arith.constant 0 : index
    %457 = vector.load %arg2[%c2_537, %c0_538, %c0_539] : memref<9x16x16xbf16, #tpu.memory_space<vmem>>, vector<1x16x16xbf16>
    %458 = vector.shape_cast %457 : vector<1x16x16xbf16> to vector<16x16xbf16>
    %cst_540 = arith.constant dense<0.000000e+00> : vector<8x16xf32>
    %459 = tpu.matmul %456, %458, %cst_540 {dimension_numbers = #tpu.dot_dimension_numbers<[1], [0], [0], [1], [0, 0, 1, 1], [], []>} : vector<8x16xbf16>, vector<16x16xbf16>, vector<8x16xf32> -> vector<8x16xf32>
    %460 = arith.addf %454, %459 : vector<8x16xf32>
    %c0_541 = arith.constant 0 : index
    %c25 = arith.constant 25 : index
    %c0_542 = arith.constant 0 : index
    %c0_543 = arith.constant 0 : index
    %461 = vector.load %arg1[%c0_541, %c25, %c0_542, %c0_543] : memref<1x36x9x16xbf16, #tpu.memory_space<vmem>>, vector<1x1x8x16xbf16>
    %462 = vector.shape_cast %461 : vector<1x1x8x16xbf16> to vector<8x16xbf16>
    %c3_544 = arith.constant 3 : index
    %c0_545 = arith.constant 0 : index
    %c0_546 = arith.constant 0 : index
    %463 = vector.load %arg2[%c3_544, %c0_545, %c0_546] : memref<9x16x16xbf16, #tpu.memory_space<vmem>>, vector<1x16x16xbf16>
    %464 = vector.shape_cast %463 : vector<1x16x16xbf16> to vector<16x16xbf16>
    %cst_547 = arith.constant dense<0.000000e+00> : vector<8x16xf32>
    %465 = tpu.matmul %462, %464, %cst_547 {dimension_numbers = #tpu.dot_dimension_numbers<[1], [0], [0], [1], [0, 0, 1, 1], [], []>} : vector<8x16xbf16>, vector<16x16xbf16>, vector<8x16xf32> -> vector<8x16xf32>
    %466 = arith.addf %460, %465 : vector<8x16xf32>
    %c0_548 = arith.constant 0 : index
    %c34 = arith.constant 34 : index
    %c0_549 = arith.constant 0 : index
    %c0_550 = arith.constant 0 : index
    %467 = vector.load %arg1[%c0_548, %c34, %c0_549, %c0_550] : memref<1x36x9x16xbf16, #tpu.memory_space<vmem>>, vector<1x1x8x16xbf16>
    %468 = vector.shape_cast %467 : vector<1x1x8x16xbf16> to vector<8x16xbf16>
    %c4_551 = arith.constant 4 : index
    %c0_552 = arith.constant 0 : index
    %c0_553 = arith.constant 0 : index
    %469 = vector.load %arg2[%c4_551, %c0_552, %c0_553] : memref<9x16x16xbf16, #tpu.memory_space<vmem>>, vector<1x16x16xbf16>
    %470 = vector.shape_cast %469 : vector<1x16x16xbf16> to vector<16x16xbf16>
    %cst_554 = arith.constant dense<0.000000e+00> : vector<8x16xf32>
    %471 = tpu.matmul %468, %470, %cst_554 {dimension_numbers = #tpu.dot_dimension_numbers<[1], [0], [0], [1], [0, 0, 1, 1], [], []>} : vector<8x16xbf16>, vector<16x16xbf16>, vector<8x16xf32> -> vector<8x16xf32>
    %472 = arith.addf %466, %471 : vector<8x16xf32>
    %c0_555 = arith.constant 0 : index
    %c25_556 = arith.constant 25 : index
    %c1_557 = arith.constant 1 : index
    %c0_558 = arith.constant 0 : index
    %473 = vector.load %arg1[%c0_555, %c25_556, %c1_557, %c0_558] : memref<1x36x9x16xbf16, #tpu.memory_space<vmem>>, vector<1x1x8x16xbf16>
    %474 = vector.shape_cast %473 : vector<1x1x8x16xbf16> to vector<8x16xbf16>
    %c5_559 = arith.constant 5 : index
    %c0_560 = arith.constant 0 : index
    %c0_561 = arith.constant 0 : index
    %475 = vector.load %arg2[%c5_559, %c0_560, %c0_561] : memref<9x16x16xbf16, #tpu.memory_space<vmem>>, vector<1x16x16xbf16>
    %476 = vector.shape_cast %475 : vector<1x16x16xbf16> to vector<16x16xbf16>
    %cst_562 = arith.constant dense<0.000000e+00> : vector<8x16xf32>
    %477 = tpu.matmul %474, %476, %cst_562 {dimension_numbers = #tpu.dot_dimension_numbers<[1], [0], [0], [1], [0, 0, 1, 1], [], []>} : vector<8x16xbf16>, vector<16x16xbf16>, vector<8x16xf32> -> vector<8x16xf32>
    %478 = arith.addf %472, %477 : vector<8x16xf32>
    %c0_563 = arith.constant 0 : index
    %c8_564 = arith.constant 8 : index
    %c0_565 = arith.constant 0 : index
    %c0_566 = arith.constant 0 : index
    %479 = vector.load %arg1[%c0_563, %c8_564, %c0_565, %c0_566] : memref<1x36x9x16xbf16, #tpu.memory_space<vmem>>, vector<1x1x8x16xbf16>
    %480 = vector.shape_cast %479 : vector<1x1x8x16xbf16> to vector<8x16xbf16>
    %c6_567 = arith.constant 6 : index
    %c0_568 = arith.constant 0 : index
    %c0_569 = arith.constant 0 : index
    %481 = vector.load %arg2[%c6_567, %c0_568, %c0_569] : memref<9x16x16xbf16, #tpu.memory_space<vmem>>, vector<1x16x16xbf16>
    %482 = vector.shape_cast %481 : vector<1x16x16xbf16> to vector<16x16xbf16>
    %cst_570 = arith.constant dense<0.000000e+00> : vector<8x16xf32>
    %483 = tpu.matmul %480, %482, %cst_570 {dimension_numbers = #tpu.dot_dimension_numbers<[1], [0], [0], [1], [0, 0, 1, 1], [], []>} : vector<8x16xbf16>, vector<16x16xbf16>, vector<8x16xf32> -> vector<8x16xf32>
    %484 = arith.addf %478, %483 : vector<8x16xf32>
    %c0_571 = arith.constant 0 : index
    %c17 = arith.constant 17 : index
    %c0_572 = arith.constant 0 : index
    %c0_573 = arith.constant 0 : index
    %485 = vector.load %arg1[%c0_571, %c17, %c0_572, %c0_573] : memref<1x36x9x16xbf16, #tpu.memory_space<vmem>>, vector<1x1x8x16xbf16>
    %486 = vector.shape_cast %485 : vector<1x1x8x16xbf16> to vector<8x16xbf16>
    %c7_574 = arith.constant 7 : index
    %c0_575 = arith.constant 0 : index
    %c0_576 = arith.constant 0 : index
    %487 = vector.load %arg2[%c7_574, %c0_575, %c0_576] : memref<9x16x16xbf16, #tpu.memory_space<vmem>>, vector<1x16x16xbf16>
    %488 = vector.shape_cast %487 : vector<1x16x16xbf16> to vector<16x16xbf16>
    %cst_577 = arith.constant dense<0.000000e+00> : vector<8x16xf32>
    %489 = tpu.matmul %486, %488, %cst_577 {dimension_numbers = #tpu.dot_dimension_numbers<[1], [0], [0], [1], [0, 0, 1, 1], [], []>} : vector<8x16xbf16>, vector<16x16xbf16>, vector<8x16xf32> -> vector<8x16xf32>
    %490 = arith.addf %484, %489 : vector<8x16xf32>
    %c0_578 = arith.constant 0 : index
    %c8_579 = arith.constant 8 : index
    %c1_580 = arith.constant 1 : index
    %c0_581 = arith.constant 0 : index
    %491 = vector.load %arg1[%c0_578, %c8_579, %c1_580, %c0_581] : memref<1x36x9x16xbf16, #tpu.memory_space<vmem>>, vector<1x1x8x16xbf16>
    %492 = vector.shape_cast %491 : vector<1x1x8x16xbf16> to vector<8x16xbf16>
    %c8_582 = arith.constant 8 : index
    %c0_583 = arith.constant 0 : index
    %c0_584 = arith.constant 0 : index
    %493 = vector.load %arg2[%c8_582, %c0_583, %c0_584] : memref<9x16x16xbf16, #tpu.memory_space<vmem>>, vector<1x16x16xbf16>
    %494 = vector.shape_cast %493 : vector<1x16x16xbf16> to vector<16x16xbf16>
    %cst_585 = arith.constant dense<0.000000e+00> : vector<8x16xf32>
    %495 = tpu.matmul %492, %494, %cst_585 {dimension_numbers = #tpu.dot_dimension_numbers<[1], [0], [0], [1], [0, 0, 1, 1], [], []>} : vector<8x16xbf16>, vector<16x16xbf16>, vector<8x16xf32> -> vector<8x16xf32>
    %496 = arith.addf %490, %495 : vector<8x16xf32>
    %497 = vector.broadcast %0 : vector<1x16xf32> to vector<8x16xf32>
    %498 = arith.addf %496, %497 : vector<8x16xf32>
    %cst_586 = arith.constant 0.000000e+00 : f32
    %499 = vector.broadcast %cst_586 : f32 to vector<8x16xf32>
    %500 = arith.maximumf %498, %499 : vector<8x16xf32>
    %501 = arith.truncf %500 : vector<8x16xf32> to vector<8x16xbf16>
    %c0_587 = arith.constant 0 : index
    %c7_588 = arith.constant 7 : index
    %c0_589 = arith.constant 0 : index
    %c0_590 = arith.constant 0 : index
    %502 = vector.load %arg4[%c0_587, %c7_588, %c0_589, %c0_590] : memref<1x8x8x16xbf16, #tpu.memory_space<vmem>>, vector<1x1x8x16xbf16>
    %503 = vector.shape_cast %502 : vector<1x1x8x16xbf16> to vector<8x16xbf16>
    %504 = vector.shape_cast %501 : vector<8x16xbf16> to vector<1x1x8x16xbf16>
    tpu.vector_store %arg4[%c0_587, %c7_588, %c0_589, %c0_590], %504 {strides = array<i32>} : memref<1x8x8x16xbf16, #tpu.memory_space<vmem>>, vector<1x1x8x16xbf16>,
    return
  }
  func.func @transform_0(%arg0: i32) -> (i32, i32, i32, i32) {
    %c0_i32 = arith.constant 0 : i32
    %c0_i32_0 = arith.constant 0 : i32
    %c0_i32_1 = arith.constant 0 : i32
    %c0_i32_2 = arith.constant 0 : i32
    return %arg0, %c0_i32, %c0_i32_0, %c0_i32_1 : i32, i32, i32, i32
  }
  func.func @transform_1(%arg0: i32) -> (i32, i32, i32) {
    %c0_i32 = arith.constant 0 : i32
    %c0_i32_0 = arith.constant 0 : i32
    %c0_i32_1 = arith.constant 0 : i32
    %c0_i32_2 = arith.constant 0 : i32
    return %c0_i32, %c0_i32_0, %c0_i32_1 : i32, i32, i32
  }
  func.func @transform_2(%arg0: i32) -> (i32, i32) {
    %c0_i32 = arith.constant 0 : i32
    %c0_i32_0 = arith.constant 0 : i32
    %c0_i32_1 = arith.constant 0 : i32
    return %c0_i32, %c0_i32_0 : i32, i32
  }
  func.func @transform_3(%arg0: i32) -> (i32, i32, i32, i32) {
    %c0_i32 = arith.constant 0 : i32
    %c0_i32_0 = arith.constant 0 : i32
    %c0_i32_1 = arith.constant 0 : i32
    %c0_i32_2 = arith.constant 0 : i32
    return %arg0, %c0_i32, %c0_i32_0, %c0_i32_1 : i32, i32, i32, i32
  }
}

</mosaic_0001>

<bundles_post_ra>
// kernel: bottleneck_forward.3
= control target key start
LH: loop header
LB: loop body
LE: loop exit
PB: predicated region body
PF: predicated region fallthrough
CT: control target
= control target key end

     0   :  { %s742_s12 = smov 0   ;;  %s888_s0 = inlined_call_operand.vmem [shape: bf16[512,16], index: 0, kind: input, shape index: {}]   ;;  %s889_s1 = inlined_call_operand.vmem [shape: bf16[16,16], index: 1, kind: input, shape index: {}]   ;;  %s890_s2 = inlined_call_operand.vmem [shape: f32[1,16], index: 2, kind: input, shape index: {}]   ;;  %s891_s3 = inlined_call_operand.vmem [shape: bf16[512,16], index: 3, kind: output, shape index: {}]  }
   0x1 LB: > { %s590_s13 = sadd.s32 4294967295, %s720_s12   ;;  %p594_p0 = scmp.ge.s32.totalorder %s720_s12, 1  ;;  %s720_s12 = sphi %s742_s12, %s13_s12  }
   0x2   : > { %p138_p1 = scmp.lt.s32.totalorder %s720_s12, 3 }
   0x4   : > { %p139_p2 = pnand %p594_p0, %p138_p1 }
   0x5   : > { %s595_s16 = sshll.u32 (!%p139_p2), %s590_s13, 5 }
   0x6   : > { %142 = sbr.rel (%p139_p2) target bundleno = 213 (0xd5), region = 32  ;;  %p163_p3 = scmp.lt.s32.totalorder (!%p139_p2), %s595_s16, 63 }
   0xb   : > { %v701_v0 = vld [vmem:[%s889_s1] sm:$0xff]  ;;  %s893_s16 = smov (!%p163_p3, %s595_s16), 63  ;;  %vm299_vm0 = vcmask 130048   ;;  %vm501_vm1 = vcmask 125952  }
   0xc   : > { %355 = vmatpush.bf16.msra.mxu0 %v701_v0  ;;  %702 = vmatpush.bf16.msra.mxu1 %v701_v0  ;;  %s596_s17 = sshll.u32 %s893_s16, 2  ;;  %v780_v17 = vld [vmem:[%s890_s2] ss:$0 sm:$0xff] }
   0xd   : > { %703 = vmatpush.bf16.msra.mxu2 %v701_v0  ;;  %704 = vmatpush.bf16.msra.mxu3 %v701_v0  ;;  %s166_s20 = scalar_lea.vmem %s888_s0, %s596_s17  ;;  %s789_s25 = scalar_lea.vmem %s891_s3, %s596_s17 }
   0xe   : > { %v685_v1 = vld [vmem:[%s166_s20] sm:$0xff]  ;;  %v686_v5 = vld [vmem:[%s166_s20 + $0x8] sm:$0xff]  ;;  %v687_v9 = vld [vmem:[%s166_s20 + $0x10] sm:$0xff] }
   0xf   : > { %v689_v2 = vld [vmem:[%s166_s20 + $0x20] sm:$0xff]  ;;  %667 = vmatmul.msk.bf16.vlgmr.msra.gmra.mxu0 %vm299_vm0, %v685_v1  ;;  %v690_v6 = vld [vmem:[%s166_s20 + $0x28] sm:$0xff]  ;;  %v691_v10 = vld [vmem:[%s166_s20 + $0x30] sm:$0xff] }
  0x10   : > { %v693_v3 = vld [vmem:[%s166_s20 + $0x40] sm:$0xff]  ;;  %671 = vmatmul.msk.bf16.vlgmr.msra.gmra.mxu1 %vm299_vm0, %v689_v2  ;;  %v694_v7 = vld [vmem:[%s166_s20 + $0x48] sm:$0xff]  ;;  %v695_v11 = vld [vmem:[%s166_s20 + $0x50] sm:$0xff] }
  0x11   : > { %v697_v4 = vld [vmem:[%s166_s20 + $0x60] sm:$0xff]  ;;  %675 = vmatmul.msk.bf16.vlgmr.msra.gmra.mxu2 %vm299_vm0, %v693_v3  ;;  %v698_v8 = vld [vmem:[%s166_s20 + $0x68] sm:$0xff]  ;;  %v699_v12 = vld [vmem:[%s166_s20 + $0x70] sm:$0xff] }
  0x12   : > { %679 = vmatmul.msk.bf16.vlgmr.msra.gmra.mxu3 %vm299_vm0, %v697_v4  ;;  %v688_v13 = vld [vmem:[%s166_s20 + $0x18] sm:$0xff] }
  0x13   : > { %v692_v14 = vld [vmem:[%s166_s20 + $0x38] sm:$0xff] }
  0x14   : > { %v696_v15 = vld [vmem:[%s166_s20 + $0x58] sm:$0xff] }
  0x15   : > { %v700_v16 = vld [vmem:[%s166_s20 + $0x78] sm:$0xff] }
  0x1f   : > { %668 = vmatmul.msk.bf16.gmra.mxu0 %vm299_vm0, %v686_v5 }
  0x20   : > { %672 = vmatmul.msk.bf16.gmra.mxu1 %vm299_vm0, %v690_v6 }
  0x21   : > { %676 = vmatmul.msk.bf16.gmra.mxu2 %vm299_vm0, %v694_v7 }
  0x22   : > { %680 = vmatmul.msk.bf16.gmra.mxu3 %vm299_vm0, %v698_v8 }
  0x2f   : > { %669 = vmatmul.msk.bf16.gmra.mxu0 %vm299_vm0, %v687_v9 }
  0x30   : > { %673 = vmatmul.msk.bf16.gmra.mxu1 %vm299_vm0, %v691_v10 }
  0x31   : > { %677 = vmatmul.msk.bf16.gmra.mxu2 %vm299_vm0, %v695_v11 }
  0x32   : > { %681 = vmatmul.msk.bf16.gmra.mxu3 %vm299_vm0, %v699_v12 }
  0x3f   : > { %670 = vmatmul.msk.bf16.gmra.mxu0 %vm299_vm0, %v688_v13 }
  0x40   : > { %674 = vmatmul.msk.bf16.gmra.mxu1 %vm299_vm0, %v692_v14 }
  0x41   : > { %678 = vmatmul.msk.bf16.gmra.mxu2 %vm299_vm0, %v696_v15 }
  0x42   : > { %682 = vmatmul.msk.bf16.gmra.mxu3 %vm299_vm0, %v700_v16 }
  0x8c   : > { %v357_v18 = vpop.f32.mrf.mxu0 }
  0x8d   : > { %v377_v19 = vpop.f32.mrf.mxu1  ;;  %v358_v20 = vadd.f32 %v780_v17, %v357_v18 }
  0x8e   : > { %v378_v21 = vadd.f32 %v780_v17, %v377_v19 }
  0x8f   : > { %v437_v22 = vmax.f32 %v358_v20, 0.0 }
  0x90   : > { %v445_v23 = vmax.f32 %v378_v21, 0.0 }
  0x91   : > { %v469_v24 = vpack.c.bf16 %v437_v22, %v437_v22 }
  0x92   : > { %v477_v25 = vpack.c.bf16 %v445_v23, %v445_v23 }
  0x93   : > { %502 = vst.msk [vmem:[%s789_s25] sm:$0xf] %vm501_vm1, %v469_v24 }
  0x94   : > { %v397_v26 = vpop.f32.mrf.mxu2  ;;  %510 = vst.msk [vmem:[%s789_s25 + $0x20] sm:$0xf] %vm501_vm1, %v477_v25  ;;  %v359_v30 = vpop.f32.mrf.mxu0 }
  0x95   : > { %v417_v27 = vpop.f32.mrf.mxu3  ;;  %v398_v28 = vadd.f32 %v780_v17, %v397_v26  ;;  %v379_v31 = vpop.f32.mrf.mxu1  ;;  %v360_v32 = vadd.f32 %v780_v17, %v359_v30 }
  0x96   : > { %v418_v29 = vadd.f32 %v780_v17, %v417_v27  ;;  %v380_v33 = vadd.f32 %v780_v17, %v379_v31 }
  0x97   : > { %v453_v34 = vmax.f32 %v398_v28, 0.0  ;;  %v438_v36 = vmax.f32 %v360_v32, 0.0 }
  0x98   : > { %v461_v35 = vmax.f32 %v418_v29, 0.0  ;;  %v446_v37 = vmax.f32 %v380_v33, 0.0 }
  0x99   : > { %v485_v38 = vpack.c.bf16 %v453_v34, %v453_v34  ;;  %v470_v40 = vpack.c.bf16 %v438_v36, %v438_v36 }
  0x9a   : > { %v493_v39 = vpack.c.bf16 %v461_v35, %v461_v35  ;;  %v478_v41 = vpack.c.bf16 %v446_v37, %v446_v37 }
  0x9b   : > { %518 = vst.msk [vmem:[%s789_s25 + $0x40] sm:$0xf] %vm501_vm1, %v485_v38 }
  0x9c   : > { %526 = vst.msk [vmem:[%s789_s25 + $0x60] sm:$0xf] %vm501_vm1, %v493_v39  ;;  %v399_v42 = vpop.f32.mrf.mxu2  ;;  %v362_v46 = vpop.f32.mrf.mxu0 }
  0x9d   : > { %v419_v43 = vpop.f32.mrf.mxu3  ;;  %503 = vst.msk [vmem:[%s789_s25 + $0x4] sm:$0xf] %vm501_vm1, %v470_v40  ;;  %v400_v44 = vadd.f32 %v780_v17, %v399_v42  ;;  %v382_v47 = vpop.f32.mrf.mxu1  ;;  %v363_v48 = vadd.f32 %v780_v17, %v362_v46 }
  0x9e   : > { %v420_v45 = vadd.f32 %v780_v17, %v419_v43  ;;  %511 = vst.msk [vmem:[%s789_s25 + $0x24] sm:$0xf] %vm501_vm1, %v478_v41  ;;  %v383_v49 = vadd.f32 %v780_v17, %v382_v47 }
  0x9f   : > { %v454_v50 = vmax.f32 %v400_v44, 0.0  ;;  %v439_v52 = vmax.f32 %v363_v48, 0.0 }
  0xa0   : > { %v462_v51 = vmax.f32 %v420_v45, 0.0  ;;  %v447_v53 = vmax.f32 %v383_v49, 0.0 }
  0xa1   : > { %v486_v54 = vpack.c.bf16 %v454_v50, %v454_v50  ;;  %v471_v56 = vpack.c.bf16 %v439_v52, %v439_v52 }
  0xa2   : > { %v494_v55 = vpack.c.bf16 %v462_v51, %v462_v51  ;;  %v479_v57 = vpack.c.bf16 %v447_v53, %v447_v53 }
  0xa3   : > { %519 = vst.msk [vmem:[%s789_s25 + $0x44] sm:$0xf] %vm501_vm1, %v486_v54 }
  0xa4   : > { %527 = vst.msk [vmem:[%s789_s25 + $0x64] sm:$0xf] %vm501_vm1, %v494_v55  ;;  %v402_v58 = vpop.f32.mrf.mxu2  ;;  %v364_v62 = vpop.f32.mrf.mxu0 }
  0xa5   : > { %v422_v59 = vpop.f32.mrf.mxu3  ;;  %504 = vst.msk [vmem:[%s789_s25 + $0x8] sm:$0xf] %vm501_vm1, %v471_v56  ;;  %v403_v60 = vadd.f32 %v780_v17, %v402_v58  ;;  %v384_v63 = vpop.f32.mrf.mxu1  ;;  %v365_v0 = vadd.f32 %v780_v17, %v364_v62 }
  0xa6   : > { %v423_v61 = vadd.f32 %v780_v17, %v422_v59  ;;  %512 = vst.msk [vmem:[%s789_s25 + $0x28] sm:$0xf] %vm501_vm1, %v479_v57  ;;  %v385_v1 = vadd.f32 %v780_v17, %v384_v63 }
  0xa7   : > { %v455_v2 = vmax.f32 %v403_v60, 0.0  ;;  %v440_v4 = vmax.f32 %v365_v0, 0.0 }
  0xa8   : > { %v463_v3 = vmax.f32 %v423_v61, 0.0  ;;  %v448_v5 = vmax.f32 %v385_v1, 0.0 }
  0xa9   : > { %v487_v6 = vpack.c.bf16 %v455_v2, %v455_v2  ;;  %v472_v8 = vpack.c.bf16 %v440_v4, %v440_v4 }
  0xaa   : > { %v495_v7 = vpack.c.bf16 %v463_v3, %v463_v3  ;;  %v480_v9 = vpack.c.bf16 %v448_v5, %v448_v5 }
  0xab   : > { %520 = vst.msk [vmem:[%s789_s25 + $0x48] sm:$0xf] %vm501_vm1, %v487_v6 }
  0xac   : > { %528 = vst.msk [vmem:[%s789_s25 + $0x68] sm:$0xf] %vm501_vm1, %v495_v7  ;;  %v404_v10 = vpop.f32.mrf.mxu2  ;;  %v367_v14 = vpop.f32.mrf.mxu0 }
  0xad   : > { %v424_v11 = vpop.f32.mrf.mxu3  ;;  %505 = vst.msk [vmem:[%s789_s25 + $0xc] sm:$0xf] %vm501_vm1, %v472_v8  ;;  %v405_v12 = vadd.f32 %v780_v17, %v404_v10  ;;  %v387_v15 = vpop.f32.mrf.mxu1  ;;  %v368_v16 = vadd.f32 %v780_v17, %v367_v14 }
  0xae   : > { %v425_v13 = vadd.f32 %v780_v17, %v424_v11  ;;  %513 = vst.msk [vmem:[%s789_s25 + $0x2c] sm:$0xf] %vm501_vm1, %v480_v9  ;;  %v388_v18 = vadd.f32 %v780_v17, %v387_v15 }
  0xaf   : > { %v456_v19 = vmax.f32 %v405_v12, 0.0  ;;  %v441_v21 = vmax.f32 %v368_v16, 0.0 }
  0xb0   : > { %v464_v20 = vmax.f32 %v425_v13, 0.0  ;;  %v449_v22 = vmax.f32 %v388_v18, 0.0 }
  0xb1   : > { %v488_v23 = vpack.c.bf16 %v456_v19, %v456_v19  ;;  %v473_v25 = vpack.c.bf16 %v441_v21, %v441_v21 }
  0xb2   : > { %v496_v24 = vpack.c.bf16 %v464_v20, %v464_v20  ;;  %v481_v26 = vpack.c.bf16 %v449_v22, %v449_v22 }
  0xb3   : > { %521 = vst.msk [vmem:[%s789_s25 + $0x4c] sm:$0xf] %vm501_vm1, %v488_v23 }
  0xb4   : > { %529 = vst.msk [vmem:[%s789_s25 + $0x6c] sm:$0xf] %vm501_vm1, %v496_v24  ;;  %v407_v27 = vpop.f32.mrf.mxu2  ;;  %v369_v31 = vpop.f32.mrf.mxu0 }
  0xb5   : > { %v427_v28 = vpop.f32.mrf.mxu3  ;;  %506 = vst.msk [vmem:[%s789_s25 + $0x10] sm:$0xf] %vm501_vm1, %v473_v25  ;;  %v408_v29 = vadd.f32 %v780_v17, %v407_v27  ;;  %v389_v32 = vpop.f32.mrf.mxu1  ;;  %v370_v33 = vadd.f32 %v780_v17, %v369_v31 }
  0xb6   : > { %v428_v30 = vadd.f32 %v780_v17, %v427_v28  ;;  %514 = vst.msk [vmem:[%s789_s25 + $0x30] sm:$0xf] %vm501_vm1, %v481_v26  ;;  %v390_v34 = vadd.f32 %v780_v17, %v389_v32 }
  0xb7   : > { %v457_v35 = vmax.f32 %v408_v29, 0.0  ;;  %v442_v37 = vmax.f32 %v370_v33, 0.0 }
  0xb8   : > { %v465_v36 = vmax.f32 %v428_v30, 0.0  ;;  %v450_v38 = vmax.f32 %v390_v34, 0.0 }
  0xb9   : > { %v489_v39 = vpack.c.bf16 %v457_v35, %v457_v35  ;;  %v474_v41 = vpack.c.bf16 %v442_v37, %v442_v37 }
  0xba   : > { %v497_v40 = vpack.c.bf16 %v465_v36, %v465_v36  ;;  %v482_v42 = vpack.c.bf16 %v450_v38, %v450_v38 }
  0xbb   : > { %522 = vst.msk [vmem:[%s789_s25 + $0x50] sm:$0xf] %vm501_vm1, %v489_v39 }
  0xbc   : > { %530 = vst.msk [vmem:[%s789_s25 + $0x70] sm:$0xf] %vm501_vm1, %v497_v40  ;;  %v409_v43 = vpop.f32.mrf.mxu2  ;;  %v372_v47 = vpop.f32.mrf.mxu0 }
  0xbd   : > { %v429_v44 = vpop.f32.mrf.mxu3  ;;  %507 = vst.msk [vmem:[%s789_s25 + $0x14] sm:$0xf] %vm501_vm1, %v474_v41  ;;  %v410_v45 = vadd.f32 %v780_v17, %v409_v43  ;;  %v392_v48 = vpop.f32.mrf.mxu1  ;;  %v373_v49 = vadd.f32 %v780_v17, %v372_v47 }
  0xbe   : > { %v430_v46 = vadd.f32 %v780_v17, %v429_v44  ;;  %515 = vst.msk [vmem:[%s789_s25 + $0x34] sm:$0xf] %vm501_vm1, %v482_v42  ;;  %v393_v50 = vadd.f32 %v780_v17, %v392_v48 }
  0xbf   : > { %v458_v51 = vmax.f32 %v410_v45, 0.0  ;;  %v443_v53 = vmax.f32 %v373_v49, 0.0 }
  0xc0   : > { %v466_v52 = vmax.f32 %v430_v46, 0.0  ;;  %v451_v54 = vmax.f32 %v393_v50, 0.0 }
  0xc1   : > { %v490_v55 = vpack.c.bf16 %v458_v51, %v458_v51  ;;  %v475_v57 = vpack.c.bf16 %v443_v53, %v443_v53 }
  0xc2   : > { %v498_v56 = vpack.c.bf16 %v466_v52, %v466_v52  ;;  %v483_v58 = vpack.c.bf16 %v451_v54, %v451_v54 }
  0xc3   : > { %523 = vst.msk [vmem:[%s789_s25 + $0x54] sm:$0xf] %vm501_vm1, %v490_v55 }
  0xc4   : > { %531 = vst.msk [vmem:[%s789_s25 + $0x74] sm:$0xf] %vm501_vm1, %v498_v56  ;;  %v412_v59 = vpop.f32.mrf.mxu2  ;;  %v374_v63 = vpop.f32.mrf.mxu0 }
  0xc5   : > { %v432_v60 = vpop.f32.mrf.mxu3  ;;  %508 = vst.msk [vmem:[%s789_s25 + $0x18] sm:$0xf] %vm501_vm1, %v475_v57  ;;  %v413_v61 = vadd.f32 %v780_v17, %v412_v59  ;;  %v394_v0 = vpop.f32.mrf.mxu1  ;;  %v375_v1 = vadd.f32 %v780_v17, %v374_v63 }
  0xc6   : > { %v433_v62 = vadd.f32 %v780_v17, %v432_v60  ;;  %516 = vst.msk [vmem:[%s789_s25 + $0x38] sm:$0xf] %vm501_vm1, %v483_v58  ;;  %v395_v2 = vadd.f32 %v780_v17, %v394_v0 }
  0xc7   : > { %v459_v3 = vmax.f32 %v413_v61, 0.0  ;;  %v444_v5 = vmax.f32 %v375_v1, 0.0 }
  0xc8   : > { %v467_v4 = vmax.f32 %v433_v62, 0.0  ;;  %v452_v6 = vmax.f32 %v395_v2, 0.0 }
  0xc9   : > { %v491_v7 = vpack.c.bf16 %v459_v3, %v459_v3  ;;  %v476_v9 = vpack.c.bf16 %v444_v5, %v444_v5 }
  0xca   : > { %v499_v8 = vpack.c.bf16 %v467_v4, %v467_v4  ;;  %v484_v10 = vpack.c.bf16 %v452_v6, %v452_v6 }
  0xcb   : > { %524 = vst.msk [vmem:[%s789_s25 + $0x58] sm:$0xf] %vm501_vm1, %v491_v7 }
  0xcc   : > { %532 = vst.msk [vmem:[%s789_s25 + $0x78] sm:$0xf] %vm501_vm1, %v499_v8  ;;  %v414_v11 = vpop.f32.mrf.mxu2 }
  0xcd   : > { %v434_v12 = vpop.f32.mrf.mxu3  ;;  %509 = vst.msk [vmem:[%s789_s25 + $0x1c] sm:$0xf] %vm501_vm1, %v476_v9  ;;  %v415_v13 = vadd.f32 %v780_v17, %v414_v11 }
  0xce   : > { %v435_v14 = vadd.f32 %v780_v17, %v434_v12  ;;  %517 = vst.msk [vmem:[%s789_s25 + $0x3c] sm:$0xf] %vm501_vm1, %v484_v10 }
  0xcf   : > { %v460_v15 = vmax.f32 %v415_v13, 0.0 }
  0xd0   : > { %v468_v16 = vmax.f32 %v435_v14, 0.0 }
  0xd1   : > { %v492_v18 = vpack.c.bf16 %v460_v15, %v460_v15 }
  0xd2   : > { %v500_v19 = vpack.c.bf16 %v468_v16, %v468_v16 }
  0xd3   : > { %525 = vst.msk [vmem:[%s789_s25 + $0x5c] sm:$0xf] %vm501_vm1, %v492_v18 }
  0xd4   : > { %533 = vst.msk [vmem:[%s789_s25 + $0x7c] sm:$0xf] %vm501_vm1, %v500_v19 }
  0xd5 PF: > { %s13_s12 = sadd.s32 1, %s720_s12  }
  0xd6   : > { %p10_p4 = scmp.ge.s32.totalorder %s13_s12, 4  }
  0xd8   :  { %12 = sbr.rel (!%p10_p4) target bundleno = 1 (0x1), region = 62 }

// kernel: bottleneck_forward.5
= control target key start
LH: loop header
LB: loop body
LE: loop exit
PB: predicated region body
PF: predicated region fallthrough
CT: control target
= control target key end

     0   :  { %vm103_vm0 = vcmask 130048   ;;  %s669_s3 = inlined_call_operand.vmem [shape: bf16[16,128], index: 3, kind: input, shape index: {}]   ;;  %s670_s1 = inlined_call_operand.vmem [shape: bf16[16,128], index: 1, kind: input, shape index: {}]   ;;  %s671_s2 = inlined_call_operand.vmem [shape: bf16[128,16], index: 2, kind: input, shape index: {}]   ;;  %s672_s0 = inlined_call_operand.vmem [shape: bf16[128,16], index: 0, kind: input, shape index: {}]   ;;  %s673_s4 = inlined_call_operand.vmem [shape: f32[1,128], index: 4, kind: input, shape index: {}]   ;;  %s674_s5 = inlined_call_operand.vmem [shape: bf16[128,128], index: 5, kind: output, shape index: {}]  }
   0x1   :  { %v473_v0 = vld [vmem:[%s669_s3] sm:$0xff]  ;;  %v466_v6 = vld [vmem:[%s671_s2 + $0x8] sm:$0xff]  ;;  %v467_v10 = vld [vmem:[%s671_s2 + $0x10] sm:$0xff] }
   0x2   :  { %v464_v1 = vld [vmem:[%s670_s1] sm:$0xff]  ;;  %135 = vmatpush.bf16.msra.mxu0 %v473_v0  ;;  %521 = vmatpush.bf16.msra.mxu2 %v473_v0  ;;  %v470_v7 = vld [vmem:[%s671_s2 + $0x28] sm:$0xff]  ;;  %v471_v11 = vld [vmem:[%s671_s2 + $0x30] sm:$0xff] }
   0x3   :  { %v465_v2 = vld [vmem:[%s671_s2] sm:$0xff]  ;;  %254 = vmatpush.bf16.msra.mxu1 %v464_v1  ;;  %522 = vmatpush.bf16.msra.mxu3 %v464_v1  ;;  %v457_v8 = vld [vmem:[%s672_s0 + $0x8] sm:$0xff]  ;;  %v458_v12 = vld [vmem:[%s672_s0 + $0x10] sm:$0xff] }
   0x4   :  { %v469_v3 = vld [vmem:[%s671_s2 + $0x20] sm:$0xff]  ;;  %v461_v9 = vld [vmem:[%s672_s0 + $0x28] sm:$0xff]  ;;  %v462_v13 = vld [vmem:[%s672_s0 + $0x30] sm:$0xff] }
   0x5   :  { %v456_v4 = vld [vmem:[%s672_s0] sm:$0xff]  ;;  %404 = vmatmul.msk.bf16.vlgmr.msra.gmra.mxu0 %vm103_vm0, %v465_v2  ;;  %408 = vmatmul.msk.bf16.vlgmr.msra.gmra.mxu2 %vm103_vm0, %v469_v3  ;;  %v468_v14 = vld [vmem:[%s671_s2 + $0x18] sm:$0xff] }
   0x6   :  { %v460_v5 = vld [vmem:[%s672_s0 + $0x20] sm:$0xff]  ;;  %448 = vmatmul.msk.bf16.vlgmr.msra.gmra.mxu1 %vm103_vm0, %v456_v4  ;;  %v472_v15 = vld [vmem:[%s671_s2 + $0x38] sm:$0xff] }
   0x7   :  { %452 = vmatmul.msk.bf16.vlgmr.msra.gmra.mxu3 %vm103_vm0, %v460_v5  ;;  %v459_v16 = vld [vmem:[%s672_s0 + $0x18] sm:$0xff]  ;;  %v627_v21 = vld [vmem:[%s673_s4] ss:$0 sm:$0xff] }
   0x8   :  { %v463_v17 = vld [vmem:[%s672_s0 + $0x38] sm:$0xff] }
  0x15   :  { %405 = vmatmul.msk.bf16.gmra.mxu0 %vm103_vm0, %v466_v6  ;;  %409 = vmatmul.msk.bf16.gmra.mxu2 %vm103_vm0, %v470_v7 }
  0x16   :  { %449 = vmatmul.msk.bf16.gmra.mxu1 %vm103_vm0, %v457_v8 }
  0x17   :  { %453 = vmatmul.msk.bf16.gmra.mxu3 %vm103_vm0, %v461_v9 }
  0x25   :  { %406 = vmatmul.msk.bf16.gmra.mxu0 %vm103_vm0, %v467_v10  ;;  %410 = vmatmul.msk.bf16.gmra.mxu2 %vm103_vm0, %v471_v11 }
  0x26   :  { %450 = vmatmul.msk.bf16.gmra.mxu1 %vm103_vm0, %v458_v12 }
  0x27   :  { %454 = vmatmul.msk.bf16.gmra.mxu3 %vm103_vm0, %v462_v13 }
  0x35   :  { %407 = vmatmul.msk.bf16.gmra.mxu0 %vm103_vm0, %v468_v14  ;;  %411 = vmatmul.msk.bf16.gmra.mxu2 %vm103_vm0, %v472_v15 }
  0x36   :  { %451 = vmatmul.msk.bf16.gmra.mxu1 %vm103_vm0, %v459_v16 }
  0x37   :  { %455 = vmatmul.msk.bf16.gmra.mxu3 %vm103_vm0, %v463_v17 }
  0x82   :  { %v137_v18 = vpop.f32.mrf.mxu0 }
  0x83   :  { %v256_v19 = vpop.f32.mrf.mxu1 }
  0x84   :  { %v257_v20 = vadd.f32 %v256_v19, %v137_v18 }
  0x86   :  { %v300_v26 = vadd.f32 %v627_v21, %v257_v20 }
  0x88   :  { %v157_v22 = vpop.f32.mrf.mxu2  ;;  %v316_v30 = vmax.f32 %v300_v26, 0.0 }
  0x8a   :  { %v276_v23 = vpop.f32.mrf.mxu3  ;;  %v139_v24 = vpop.f32.mrf.mxu0 }
  0x8b   :  { %v258_v25 = vpop.f32.mrf.mxu1  ;;  %v277_v28 = vadd.f32 %v276_v23, %v157_v22 }
  0x8c   :  { %v259_v27 = vadd.f32 %v258_v25, %v139_v24 }
  0x8d   :  { %v308_v34 = vadd.f32 %v627_v21, %v277_v28 }
  0x8e   :  { %v301_v29 = vadd.f32 %v627_v21, %v259_v27 }
  0x8f   :  { %v324_v40 = vmax.f32 %v308_v34, 0.0 }
  0x90   :  { %v317_v31 = vmax.f32 %v301_v29, 0.0  ;;  %v159_v32 = vpop.f32.mrf.mxu2 }
  0x92   :  { %v278_v33 = vpop.f32.mrf.mxu3  ;;  %v477_v35 = vpack.c.bf16 %v317_v31, %v316_v30  ;;  %v142_v37 = vpop.f32.mrf.mxu0 }
  0x93   :  { %v279_v36 = vadd.f32 %v278_v33, %v159_v32  ;;  %v261_v38 = vpop.f32.mrf.mxu1 }
  0x94   :  { %478 = vst [vmem:[%s674_s5] sm:$0xff] %v477_v35   ;;  %v262_v43 = vadd.f32 %v261_v38, %v142_v37 }
  0x95   :  { %v309_v39 = vadd.f32 %v627_v21, %v279_v36 }
  0x96   :  { %v302_v48 = vadd.f32 %v627_v21, %v262_v43 }
  0x97   :  { %v325_v41 = vmax.f32 %v309_v39, 0.0 }
  0x98   :  { %v162_v44 = vpop.f32.mrf.mxu2  ;;  %v318_v52 = vmax.f32 %v302_v48, 0.0 }
  0x99   :  { %v497_v42 = vpack.c.bf16 %v325_v41, %v324_v40 }
  0x9a   :  { %v281_v45 = vpop.f32.mrf.mxu3  ;;  %v144_v46 = vpop.f32.mrf.mxu0 }
  0x9b   :  { %517 = vst [vmem:[%s674_s5 + $0x20] sm:$0xff] %v497_v42   ;;  %v263_v47 = vpop.f32.mrf.mxu1  ;;  %v282_v50 = vadd.f32 %v281_v45, %v162_v44 }
  0x9c   :  { %v264_v49 = vadd.f32 %v263_v47, %v144_v46 }
  0x9d   :  { %v310_v56 = vadd.f32 %v627_v21, %v282_v50 }
  0x9e   :  { %v303_v51 = vadd.f32 %v627_v21, %v264_v49 }
  0x9f   :  { %v326_v62 = vmax.f32 %v310_v56, 0.0 }
  0xa0   :  { %v319_v53 = vmax.f32 %v303_v51, 0.0  ;;  %v164_v54 = vpop.f32.mrf.mxu2 }
  0xa2   :  { %v283_v55 = vpop.f32.mrf.mxu3  ;;  %v482_v57 = vpack.c.bf16 %v319_v53, %v318_v52  ;;  %v147_v59 = vpop.f32.mrf.mxu0 }
  0xa3   :  { %v284_v58 = vadd.f32 %v283_v55, %v164_v54  ;;  %v266_v60 = vpop.f32.mrf.mxu1 }
  0xa4   :  { %514 = vst [vmem:[%s674_s5 + $0x8] sm:$0xff] %v482_v57   ;;  %v267_v1 = vadd.f32 %v266_v60, %v147_v59 }
  0xa5   :  { %v311_v61 = vadd.f32 %v627_v21, %v284_v58 }
  0xa6   :  { %v304_v6 = vadd.f32 %v627_v21, %v267_v1 }
  0xa7   :  { %v327_v63 = vmax.f32 %v311_v61, 0.0 }
  0xa8   :  { %v167_v2 = vpop.f32.mrf.mxu2  ;;  %v320_v10 = vmax.f32 %v304_v6, 0.0 }
  0xa9   :  { %v502_v0 = vpack.c.bf16 %v327_v63, %v326_v62 }
  0xaa   :  { %v286_v3 = vpop.f32.mrf.mxu3  ;;  %v149_v4 = vpop.f32.mrf.mxu0 }
  0xab   :  { %518 = vst [vmem:[%s674_s5 + $0x28] sm:$0xff] %v502_v0   ;;  %v268_v5 = vpop.f32.mrf.mxu1  ;;  %v287_v8 = vadd.f32 %v286_v3, %v167_v2 }
  0xac   :  { %v269_v7 = vadd.f32 %v268_v5, %v149_v4 }
  0xad   :  { %v312_v14 = vadd.f32 %v627_v21, %v287_v8 }
  0xae   :  { %v305_v9 = vadd.f32 %v627_v21, %v269_v7 }
  0xaf   :  { %v328_v20 = vmax.f32 %v312_v14, 0.0 }
  0xb0   :  { %v321_v11 = vmax.f32 %v305_v9, 0.0  ;;  %v169_v12 = vpop.f32.mrf.mxu2 }
  0xb2   :  { %v288_v13 = vpop.f32.mrf.mxu3  ;;  %v487_v15 = vpack.c.bf16 %v321_v11, %v320_v10  ;;  %v152_v17 = vpop.f32.mrf.mxu0 }
  0xb3   :  { %v289_v16 = vadd.f32 %v288_v13, %v169_v12  ;;  %v271_v18 = vpop.f32.mrf.mxu1 }
  0xb4   :  { %515 = vst [vmem:[%s674_s5 + $0x10] sm:$0xff] %v487_v15   ;;  %v272_v24 = vadd.f32 %v271_v18, %v152_v17 }
  0xb5   :  { %v313_v19 = vadd.f32 %v627_v21, %v289_v16 }
  0xb6   :  { %v306_v29 = vadd.f32 %v627_v21, %v272_v24 }
  0xb7   :  { %v329_v22 = vmax.f32 %v313_v19, 0.0 }
  0xb8   :  { %v172_v25 = vpop.f32.mrf.mxu2  ;;  %v322_v33 = vmax.f32 %v306_v29, 0.0 }
  0xb9   :  { %v507_v23 = vpack.c.bf16 %v329_v22, %v328_v20 }
  0xba   :  { %v291_v26 = vpop.f32.mrf.mxu3  ;;  %v154_v27 = vpop.f32.mrf.mxu0 }
  0xbb   :  { %519 = vst [vmem:[%s674_s5 + $0x30] sm:$0xff] %v507_v23   ;;  %v273_v28 = vpop.f32.mrf.mxu1  ;;  %v292_v31 = vadd.f32 %v291_v26, %v172_v25 }
  0xbc   :  { %v274_v30 = vadd.f32 %v273_v28, %v154_v27 }
  0xbd   :  { %v314_v37 = vadd.f32 %v627_v21, %v292_v31 }
  0xbe   :  { %v307_v32 = vadd.f32 %v627_v21, %v274_v30 }
  0xbf   :  { %v330_v41 = vmax.f32 %v314_v37, 0.0 }
  0xc0   :  { %v323_v34 = vmax.f32 %v307_v32, 0.0  ;;  %v174_v35 = vpop.f32.mrf.mxu2 }
  0xc2   :  { %v293_v36 = vpop.f32.mrf.mxu3  ;;  %v492_v38 = vpack.c.bf16 %v323_v34, %v322_v33 }
  0xc3   :  { %v294_v39 = vadd.f32 %v293_v36, %v174_v35 }
  0xc4   :  { %516 = vst [vmem:[%s674_s5 + $0x18] sm:$0xff] %v492_v38  }
  0xc5   :  { %v315_v40 = vadd.f32 %v627_v21, %v294_v39 }
  0xc7   :  { %v331_v42 = vmax.f32 %v315_v40, 0.0 }
  0xc9   :  { %v512_v43 = vpack.c.bf16 %v331_v42, %v330_v41 }
  0xcb   :  { %520 = vst [vmem:[%s674_s5 + $0x38] sm:$0xff] %v512_v43  }

// kernel: bottleneck_forward.4
= control target key start
LH: loop header
LB: loop body
LE: loop exit
PB: predicated region body
PF: predicated region fallthrough
CT: control target
= control target key end

     0   :  { %s3310_s12 = smov 0   ;;  %s3748_s0 = inlined_call_operand.vmem [shape: bf16[2,36,9,16], index: 0, kind: input, shape index: {}]   ;;  %s3749_s1 = inlined_call_operand.vmem [shape: bf16[9,16,16], index: 1, kind: input, shape index: {}]   ;;  %s3750_s2 = inlined_call_operand.vmem [shape: f32[1,16], index: 2, kind: input, shape index: {}]   ;;  %s3751_s3 = inlined_call_operand.vmem [shape: bf16[2,8,8,16], index: 3, kind: output, shape index: {}]  }
   0x1 LB: > { %s2481_s13 = sadd.s32 4294967295, %s3288_s12   ;;  %p2485_p0 = scmp.ge.s32.totalorder %s3288_s12, 1  ;;  %s3288_s12 = sphi %s3310_s12, %s13_s12  }
   0x2   : > { %p137_p1 = scmp.lt.s32.totalorder %s3288_s12, 3 }
   0x4   : > { %p138_p2 = pnand %p2485_p0, %p137_p1 }
   0x5   : > { %p161_p3 = scmp.lt.s32.totalorder (!%p138_p2), %s2481_s13, 1 }
   0x6   : > { %141 = sbr.rel (%p138_p2) target bundleno = 440 (0x1b8), region = 32 }
   0xb   : > { %v3177_v0 = vld [vmem:[%s3749_s1 + $0x8] sm:$0xff]  ;;  %v3176_v1 = vld [vmem:[%s3749_s1] sm:$0xff]  ;;  %v3180_v2 = vld [vmem:[%s3749_s1 + $0x18] sm:$0xff]  ;;  %s3753_s13 = smov (!%p161_p3, %s2481_s13), 1  ;;  %vm187_vm0 = vcmask 130048   ;;  %vm464_vm1 = vcmask 125952  }
   0xc   : > { %v3179_v3 = vld [vmem:[%s3749_s1 + $0x10] sm:$0xff]  ;;  %v3181_v5 = vld [vmem:[%s3749_s1 + $0x20] sm:$0xff]  ;;  %198 = vmatpush.bf16.msra.mxu0 %v3177_v0  ;;  %220 = vmatpush.bf16.msra.mxu1 %v3176_v1  ;;  %v3185_v6 = vld [vmem:[%s3749_s1 + $0x38] sm:$0xff]  ;;  %s3272_s30 = smul.u32 288, %s3753_s13  ;;  %s3175_s25 = sshll.u32 %s3753_s13, 5 }
   0xd   : > { %v3184_v4 = vld [vmem:[%s3749_s1 + $0x30] sm:$0xff]  ;;  %v3183_v7 = vld [vmem:[%s3749_s1 + $0x28] sm:$0xff]  ;;  %287 = vmatpush.bf16.msra.mxu3 %v3180_v2  ;;  %259 = vmatpush.bf16.msra.mxu2 %v3179_v3  ;;  %v3187_v8 = vld [vmem:[%s3749_s1 + $0x40] sm:$0xff]  ;;  %s3593_s28 = scalar_lea.vmem %s3751_s3, %s3175_s25 }
   0xe   : > { %s3351_s8 = scalar_lea.vmem %s3748_s0, %s3272_s30  ;;  %v3191_v9 = vld [vmem:[%s3749_s1 + $0x10] sm:$0xff]  ;;  %v3189_v10 = vld [vmem:[%s3749_s1 + $0x8] sm:$0xff]  ;;  %v3188_v24 = vld [vmem:[%s3749_s1] sm:$0xff] }
   0xf   : > { %v2489_v11 = vld [vmem:[%s3351_s8 + $0x48] sm:$0xf]  ;;  %v173_v12 = vld [vmem:[%s3351_s8] sm:$0xf]  ;;  %v2513_v13 = vld [vmem:[%s3351_s8 + $0x90] sm:$0xf] }
  0x10   : > { %315 = vmatpush.bf16.msrb.mxu0 %v3181_v5  ;;  %355 = vmatpush.bf16.msrb.mxu1 %v3183_v7  ;;  %v2506_v14 = vld [vmem:[%s3351_s8] sm:$0xf]  ;;  %v3178_v15 = vld [vmem:[%s3351_s8] sm:$0x10]  ;;  %v2535_v17 = vld [vmem:[%s3351_s8 + $0x90] sm:$0xf] }
  0x11   : > { %383 = vmatpush.bf16.msrb.mxu2 %v3184_v4  ;;  %411 = vmatpush.bf16.msrb.mxu3 %v3185_v6  ;;  %v2507_v16 = vor.u32 %v3178_v15, %v2506_v14  ;;  %v3182_v18 = vld [vmem:[%s3351_s8 + $0x90] sm:$0x10]  ;;  %v2521_v28 = vld [vmem:[%s3351_s8 + $0xd8] sm:$0xf]  ;;  %v2550_v30 = vld [vmem:[%s3351_s8 + $0x50] sm:$0xf] }
  0x12   : > { %2496 = vmatmul.msk.bf16.vlgmr.msra.gmra.mxu0 %vm187_vm0, %v2489_v11  ;;  %2501 = vmatmul.msk.bf16.vlgmr.msra.gmra.mxu1 %vm187_vm0, %v173_v12  ;;  %v2536_v19 = vor.u32 %v3182_v18, %v2535_v17  ;;  %v2564_v31 = vld [vmem:[%s3351_s8 + $0x8] sm:$0xf]  ;;  %v3186_v32 = vld [vmem:[%s3351_s8 + $0x8] sm:$0x10]  ;;  %v3192_v34 = vld [vmem:[%s3749_s1 + $0x18] sm:$0xff] }
  0x13   : > { %2520 = vmatmul.msk.bf16.vlgmr.msra.gmra.mxu3 %vm187_vm0, %v2513_v13  ;;  %v237_v20 = vshrl.u32 %v2507_v16, 16  ;;  %v239_v21 = vshll.u32 %v2507_v16, 16  ;;  %v2591_v33 = vld [vmem:[%s3351_s8 + $0x8] sm:$0xf]  ;;  %v3190_v35 = vld [vmem:[%s3351_s8 + $0x8] sm:$0x10]  ;;  %v2565_v38 = vor.u32 %v3186_v32, %v2564_v31 }
  0x14   : > { %451 = vmatpush.bf16.msra.mxu0 %v3187_v8  ;;  %488 = vmatpush.bf16.msra.mxu1 %v3189_v10  ;;  %v335_v22 = vshll.u32 %v2536_v19, 16  ;;  %v333_v26 = vshrl.u32 %v2536_v19, 16  ;;  %v3196_v36 = vld [vmem:[%s3749_s1 + $0x30] sm:$0xff]  ;;  %v3193_v37 = vld [vmem:[%s3749_s1 + $0x20] sm:$0xff]  ;;  %v2592_v39 = vor.u32 %v3190_v35, %v2591_v33  ;;  %v2542_v42 = vld [vmem:[%s3351_s8 + $0x8] sm:$0xf] }
  0x15   : > { %548 = vmatpush.bf16.msra.mxu3 %v3191_v9  ;;  %v241_v23 = vrot.slane %v239_v21, 1  ;;  %v431_v40 = vshll.u32 %v2565_v38, 16  ;;  %v3195_v43 = vld [vmem:[%s3749_s1 + $0x28] sm:$0xff]  ;;  %v429_v44 = vshrl.u32 %v2565_v38, 16  ;;  %v2572_v49 = vld [vmem:[%s3351_s8 + $0x50] sm:$0xf] }
  0x16   : > { %v337_v27 = vrot.slane %v335_v22, 1  ;;  %v528_v41 = vshll.u32 %v2592_v39, 16  ;;  %v526_v46 = vshrl.u32 %v2592_v39, 16  ;;  %v3197_v51 = vld [vmem:[%s3749_s1 + $0x38] sm:$0xff]  ;;  %v3200_v52 = vld [vmem:[%s3749_s1] sm:$0xff]  ;;  %v3201_v57 = vld [vmem:[%s3749_s1 + $0x8] sm:$0xff] }
  0x17   : > { %v242_v25 = vor.u32 %v241_v23, %v237_v20  ;;  %v433_v45 = vrot.slane %v431_v40, 1  ;;  %v3199_v53 = vld [vmem:[%s3749_s1 + $0x40] sm:$0xff]  ;;  %v2571_v54 = vld [vmem:[%s3351_s8 + $0x8] sm:$0xf]  ;;  %v2620_v55 = vld [vmem:[%s3351_s8 + $0x98] sm:$0xf] }
  0x18   : > { %v338_v29 = vor.u32 %v337_v27, %v333_v26  ;;  %v530_v47 = vrot.slane %v528_v41, 1  ;;  %v3194_v56 = vld [vmem:[%s3351_s8 + $0x98] sm:$0x10]  ;;  %v2598_v59 = vld [vmem:[%s3351_s8 + $0x98] sm:$0xf]  ;;  %v3203_v0 = vld [vmem:[%s3749_s1 + $0x10] sm:$0xff] }
  0x19   : > { %2512 = vmatmul.msk.bf16.vlgmr.msra.gmra.mxu2 %vm187_vm0, %v242_v25  ;;  %v434_v48 = vor.u32 %v433_v45, %v429_v44  ;;  %v2621_v58 = vor.u32 %v3194_v56, %v2620_v55  ;;  %v2606_v60 = vld [vmem:[%s3351_s8 + $0xe0] sm:$0xf]  ;;  %v2649_v62 = vld [vmem:[%s3351_s8 + $0x10] sm:$0xf]  ;;  %v3198_v63 = vld [vmem:[%s3351_s8 + $0x10] sm:$0x10] }
  0x1a   : > { %510 = vmatpush.bf16.msra.mxu2 %v3188_v24  ;;  %v531_v50 = vor.u32 %v530_v47, %v526_v46  ;;  %v2627_v1 = vld [vmem:[%s3351_s8 + $0x10] sm:$0xf]  ;;  %v3207_v2 = vld [vmem:[%s3749_s1 + $0x28] sm:$0xff]  ;;  %v3204_v3 = vld [vmem:[%s3749_s1 + $0x18] sm:$0xff]  ;;  %v2650_v4 = vor.u32 %v3198_v63, %v2649_v62 }
  0x1b   : > { %v621_v61 = vshll.u32 %v2621_v58, 16  ;;  %v619_v5 = vshrl.u32 %v2621_v58, 16  ;;  %v3205_v9 = vld [vmem:[%s3749_s1 + $0x20] sm:$0xff]  ;;  %v2635_v12 = vld [vmem:[%s3351_s8 + $0x58] sm:$0xf]  ;;  %v3208_v18 = vld [vmem:[%s3749_s1 + $0x30] sm:$0xff] }
  0x1c   : > { %v714_v7 = vshll.u32 %v2650_v4, 16  ;;  %v712_v10 = vshrl.u32 %v2650_v4, 16  ;;  %v2657_v14 = vld [vmem:[%s3351_s8 + $0x10] sm:$0xf]  ;;  %v3202_v16 = vld [vmem:[%s3351_s8 + $0x10] sm:$0x10] }
  0x1d   : > { %v623_v6 = vrot.slane %v621_v61, 1  ;;  %v2677_v15 = vld [vmem:[%s3351_s8 + $0x10] sm:$0xf]  ;;  %v2706_v17 = vld [vmem:[%s3351_s8 + $0xa0] sm:$0xf]  ;;  %v3213_v20 = vld [vmem:[%s3749_s1 + $0x8] sm:$0xff] }
  0x1e   : > { %v716_v11 = vrot.slane %v714_v7, 1  ;;  %v3206_v19 = vld [vmem:[%s3351_s8 + $0xa0] sm:$0x10]  ;;  %v3209_v21 = vld [vmem:[%s3749_s1 + $0x38] sm:$0xff]  ;;  %v2678_v22 = vor.u32 %v3202_v16, %v2677_v15  ;;  %v2684_v33 = vld [vmem:[%s3351_s8 + $0xa0] sm:$0xf] }
  0x1f   : > { %v624_v8 = vor.u32 %v623_v6, %v619_v5  ;;  %v2707_v23 = vor.u32 %v3206_v19, %v2706_v17  ;;  %v2658_v26 = vld [vmem:[%s3351_s8 + $0x58] sm:$0xf]  ;;  %v3211_v27 = vld [vmem:[%s3749_s1 + $0x40] sm:$0xff]  ;;  %v2692_v38 = vld [vmem:[%s3351_s8 + $0xe8] sm:$0xf] }
  0x20   : > { %v717_v13 = vor.u32 %v716_v11, %v712_v10  ;;  %v808_v24 = vshll.u32 %v2678_v22, 16  ;;  %v3212_v35 = vld [vmem:[%s3749_s1] sm:$0xff]  ;;  %v2735_v39 = vld [vmem:[%s3351_s8 + $0x18] sm:$0xf]  ;;  %v3210_v40 = vld [vmem:[%s3351_s8 + $0x18] sm:$0x10] }
  0x21   : > { %v901_v25 = vshll.u32 %v2707_v23, 16  ;;  %v3216_v41 = vld [vmem:[%s3749_s1 + $0x18] sm:$0xff]  ;;  %v2721_v44 = vld [vmem:[%s3351_s8 + $0x60] sm:$0xf]  ;;  %v2778_v62 = vld [vmem:[%s3351_s8 + $0xf0] sm:$0xf] }
  0x22   : > { %2528 = vmatmul.msk.bf16.vlgmr.msrb.gmra.mxu0 %vm187_vm0, %v2521_v28  ;;  %2541 = vmatmul.msk.bf16.vlgmr.msrb.gmra.mxu1 %vm187_vm0, %v338_v29  ;;  %v806_v28 = vshrl.u32 %v2678_v22, 16  ;;  %v810_v29 = vrot.slane %v808_v24, 1  ;;  %v2763_v46 = vld [vmem:[%s3351_s8 + $0x18] sm:$0xf]  ;;  %v3214_v47 = vld [vmem:[%s3351_s8 + $0x18] sm:$0x10] }
  0x23   : > { %2557 = vmatmul.msk.bf16.vlgmr.msrb.gmra.mxu3 %vm187_vm0, %v2550_v30  ;;  %575 = vmatpush.bf16.msrb.mxu0 %v3192_v34  ;;  %v899_v30 = vshrl.u32 %v2707_v23, 16  ;;  %v903_v31 = vrot.slane %v901_v25, 1  ;;  %v2792_v63 = vld [vmem:[%s3351_s8 + $0xa8] sm:$0xf]  ;;  %v3228_v4 = vld [vmem:[%s3749_s1 + $0x18] sm:$0xff]  ;;  %v3224_v5 = vld [vmem:[%s3749_s1] sm:$0xff] }
  0x24   : > { %668 = vmatpush.bf16.msrb.mxu3 %v3196_v36  ;;  %602 = vmatpush.bf16.msrb.mxu1 %v3193_v37  ;;  %v811_v32 = vor.u32 %v810_v29, %v806_v28  ;;  %v3217_v36 = vld [vmem:[%s3749_s1 + $0x20] sm:$0xff]  ;;  %v3215_v37 = vld [vmem:[%s3749_s1 + $0x10] sm:$0xff]  ;;  %v2770_v10 = vld [vmem:[%s3351_s8 + $0xa8] sm:$0xf] }
  0x25   : > { %v904_v34 = vor.u32 %v903_v31, %v899_v30  ;;  %v3227_v11 = vld [vmem:[%s3749_s1 + $0x10] sm:$0xff]  ;;  %v2799_v19 = vld [vmem:[%s3351_s8 + $0x20] sm:$0xf]  ;;  %v3233_v22 = vld [vmem:[%s3749_s1 + $0x38] sm:$0xff] }
  0x26   : > { %v3231_v23 = vld [vmem:[%s3749_s1 + $0x28] sm:$0xff]  ;;  %v2849_v28 = vld [vmem:[%s3351_s8 + $0x20] sm:$0xf]  ;;  %v3226_v29 = vld [vmem:[%s3351_s8 + $0x20] sm:$0x10] }
  0x27   : > { %v3232_v30 = vld [vmem:[%s3749_s1 + $0x30] sm:$0xff]  ;;  %v2850_v31 = vor.u32 %v3226_v29, %v2849_v28 }
  0x29   : > { %2549 = vmatmul.msk.bf16.vlgmr.msrb.gmra.mxu2 %vm187_vm0, %v2542_v42  ;;  %v2736_v42 = vor.u32 %v3210_v40, %v2735_v39  ;;  %v1368_v39 = vshll.u32 %v2850_v31, 16  ;;  %v2878_v40 = vld [vmem:[%s3351_s8 + $0xb0] sm:$0xf] }
  0x2a   : > { %641 = vmatpush.bf16.msrb.mxu2 %v3195_v43  ;;  %v2713_v43 = vld [vmem:[%s3351_s8 + $0x18] sm:$0xf] }
  0x2b   : > { %v994_v45 = vshll.u32 %v2736_v42, 16 }
  0x32   : > { %2570 = vmatmul.msk.bf16.vlgmr.msra.gmra.mxu0 %vm187_vm0, %v434_v48  ;;  %2579 = vmatmul.msk.bf16.vlgmr.msra.gmra.mxu1 %vm187_vm0, %v2572_v49  ;;  %v3219_v48 = vld [vmem:[%s3749_s1 + $0x28] sm:$0xff]  ;;  %v2744_v49 = vld [vmem:[%s3351_s8 + $0x60] sm:$0xf] }
  0x33   : > { %2597 = vmatmul.msk.bf16.vlgmr.msra.gmra.mxu3 %vm187_vm0, %v531_v50  ;;  %695 = vmatpush.bf16.msra.mxu0 %v3197_v51  ;;  %v3223_v50 = vld [vmem:[%s3749_s1 + $0x40] sm:$0xff]  ;;  %v3220_v51 = vld [vmem:[%s3749_s1 + $0x30] sm:$0xff] }
  0x34   : > { %790 = vmatpush.bf16.msra.mxu3 %v3200_v52  ;;  %734 = vmatpush.bf16.msra.mxu1 %v3199_v53  ;;  %v2764_v52 = vor.u32 %v3214_v47, %v2763_v46  ;;  %v992_v53 = vshrl.u32 %v2736_v42, 16  ;;  %v3235_v42 = vld [vmem:[%s3749_s1 + $0x40] sm:$0xff] }
  0x36   : > { %v1088_v55 = vshll.u32 %v2764_v52, 16  ;;  %v1086_v58 = vshrl.u32 %v2764_v52, 16 }
  0x39   : > { %2584 = vmatmul.msk.bf16.vlgmr.msra.gmra.mxu2 %vm187_vm0, %v2571_v54  ;;  %v996_v54 = vrot.slane %v994_v45, 1  ;;  %v3237_v45 = vld [vmem:[%s3749_s1 + $0x8] sm:$0xff] }
  0x3a   : > { %768 = vmatpush.bf16.msra.mxu2 %v3201_v57  ;;  %v3221_v57 = vld [vmem:[%s3749_s1 + $0x38] sm:$0xff] }
  0x3b   : > { %v997_v56 = vor.u32 %v996_v54, %v992_v53 }
  0x42   : > { %2605 = vmatmul.msk.bf16.vlgmr.msrb.gmra.mxu0 %vm187_vm0, %v2598_v59  ;;  %2613 = vmatmul.msk.bf16.vlgmr.msrb.gmra.mxu1 %vm187_vm0, %v2606_v60  ;;  %v1090_v59 = vrot.slane %v1088_v55, 1  ;;  %v2743_v60 = vld [vmem:[%s3351_s8 + $0x18] sm:$0xf] }
  0x43   : > { %2634 = vmatmul.msk.bf16.vlgmr.msrb.gmra.mxu3 %vm187_vm0, %v2627_v1  ;;  %828 = vmatpush.bf16.msrb.mxu0 %v3203_v0  ;;  %v3218_v0 = vld [vmem:[%s3351_s8 + $0xa8] sm:$0x10]  ;;  %v2821_v1 = vld [vmem:[%s3351_s8 + $0x20] sm:$0xf] }
  0x44   : > { %921 = vmatpush.bf16.msrb.mxu3 %v3207_v2  ;;  %855 = vmatpush.bf16.msrb.mxu1 %v3204_v3  ;;  %v1091_v61 = vor.u32 %v1090_v59, %v1086_v58  ;;  %v3225_v2 = vld [vmem:[%s3749_s1 + $0x8] sm:$0xff]  ;;  %v3222_v3 = vld [vmem:[%s3351_s8 + $0x20] sm:$0x10]  ;;  %v2793_v6 = vor.u32 %v3218_v0, %v2792_v63  ;;  %v2864_v0 = vld [vmem:[%s3351_s8 + $0xf8] sm:$0xf] }
  0x45   : > { %v2822_v7 = vor.u32 %v3222_v3, %v2821_v1  ;;  %v2907_v3 = vld [vmem:[%s3351_s8 + $0x28] sm:$0xf] }
  0x49   : > { %2626 = vmatmul.msk.bf16.vlgmr.msrb.gmra.mxu2 %vm187_vm0, %v624_v8  ;;  %v1181_v8 = vshll.u32 %v2793_v6, 16 }
  0x4a   : > { %882 = vmatpush.bf16.msrb.mxu2 %v3205_v9  ;;  %v1274_v9 = vshll.u32 %v2822_v7, 16 }
  0x4c   : > { %v1276_v15 = vrot.slane %v1274_v9, 1  ;;  %v3240_v9 = vld [vmem:[%s3749_s1 + $0x18] sm:$0xff] }
  0x52   : > { %2642 = vmatmul.msk.bf16.vlgmr.msra.gmra.mxu0 %vm187_vm0, %v2635_v12  ;;  %2655 = vmatmul.msk.bf16.vlgmr.msra.gmra.mxu1 %vm187_vm0, %v717_v13  ;;  %v1179_v12 = vshrl.u32 %v2793_v6, 16  ;;  %v1183_v13 = vrot.slane %v1181_v8, 1  ;;  %v2935_v8 = vld [vmem:[%s3351_s8 + $0x28] sm:$0xf] }
  0x53   : > { %2670 = vmatmul.msk.bf16.vlgmr.msra.gmra.mxu3 %vm187_vm0, %v2657_v14  ;;  %948 = vmatpush.bf16.msra.mxu0 %v3208_v18  ;;  %v1272_v14 = vshrl.u32 %v2822_v7, 16  ;;  %v3234_v7 = vld [vmem:[%s3351_s8 + $0x28] sm:$0x10] }
  0x54   : > { %1048 = vmatpush.bf16.msra.mxu3 %v3213_v20  ;;  %975 = vmatpush.bf16.msra.mxu1 %v3209_v21  ;;  %v1184_v16 = vor.u32 %v1183_v13, %v1179_v12  ;;  %v3229_v21 = vld [vmem:[%s3749_s1 + $0x20] sm:$0xff] }
  0x55   : > { %v1277_v20 = vor.u32 %v1276_v15, %v1272_v14  ;;  %v3241_v12 = vld [vmem:[%s3749_s1 + $0x20] sm:$0xff]  ;;  %v2908_v15 = vor.u32 %v3234_v7, %v2907_v3  ;;  %v2971_v3 = vld [vmem:[%s3351_s8 + $0x30] sm:$0xf] }
  0x56   : > { %v3583_v14 = vld [vmem:[%s3750_s2] ss:$0 sm:$0xff] }
  0x57   : > { %v1552_v29 = vshrl.u32 %v2908_v15, 16 }
  0x59   : > { %2665 = vmatmul.msk.bf16.vlgmr.msra.gmra.mxu2 %vm187_vm0, %v2658_v26 }
  0x5a   : > { %1014 = vmatpush.bf16.msra.mxu2 %v3211_v27  ;;  %v2807_v27 = vld [vmem:[%s3351_s8 + $0x68] sm:$0xf] }
  0x62   : > { %2683 = vmatmul.msk.bf16.vlgmr.msrb.gmra.mxu0 %vm187_vm0, %v811_v32  ;;  %2691 = vmatmul.msk.bf16.vlgmr.msrb.gmra.mxu1 %vm187_vm0, %v2684_v33 }
  0x63   : > { %2712 = vmatmul.msk.bf16.vlgmr.msrb.gmra.mxu3 %vm187_vm0, %v904_v34  ;;  %1070 = vmatpush.bf16.msrb.mxu0 %v3212_v35  ;;  %v2830_v34 = vld [vmem:[%s3351_s8 + $0x68] sm:$0xf]  ;;  %v2829_v35 = vld [vmem:[%s3351_s8 + $0x20] sm:$0xf] }
  0x64   : > { %1162 = vmatpush.bf16.msrb.mxu3 %v3217_v36  ;;  %1108 = vmatpush.bf16.msrb.mxu1 %v3215_v37 }
  0x69   : > { %2699 = vmatmul.msk.bf16.vlgmr.msrb.gmra.mxu2 %vm187_vm0, %v2692_v38 }
  0x6a   : > { %1135 = vmatpush.bf16.msrb.mxu2 %v3216_v41  ;;  %v3230_v41 = vld [vmem:[%s3351_s8 + $0xb0] sm:$0x10] }
  0x6b   : > { %v2879_v47 = vor.u32 %v3230_v41, %v2878_v40  ;;  %v3245_v40 = vld [vmem:[%s3749_s1 + $0x38] sm:$0xff]  ;;  %v3248_v41 = vld [vmem:[%s3749_s1] sm:$0xff] }
  0x6d   : > { %v1461_v53 = vshll.u32 %v2879_v47, 16  ;;  %v1459_v59 = vshrl.u32 %v2879_v47, 16 }
  0x72   : > { %2720 = vmatmul.msk.bf16.vlgmr.msra.gmra.mxu0 %vm187_vm0, %v2713_v43  ;;  %2728 = vmatmul.msk.bf16.vlgmr.msra.gmra.mxu1 %vm187_vm0, %v2721_v44  ;;  %v2856_v43 = vld [vmem:[%s3351_s8 + $0xb0] sm:$0xf] }
  0x73   : > { %2751 = vmatmul.msk.bf16.vlgmr.msra.gmra.mxu3 %vm187_vm0, %v2744_v49  ;;  %1201 = vmatpush.bf16.msra.mxu0 %v3219_v48  ;;  %v3239_v44 = vld [vmem:[%s3749_s1 + $0x10] sm:$0xff]  ;;  %v1366_v48 = vshrl.u32 %v2850_v31, 16  ;;  %v1370_v49 = vrot.slane %v1368_v39, 1 }
  0x74   : > { %1294 = vmatpush.bf16.msra.mxu3 %v3223_v50  ;;  %1228 = vmatpush.bf16.msra.mxu1 %v3220_v51 }
  0x79   : > { %2741 = vmatmul.msk.bf16.vlgmr.msra.gmra.mxu2 %vm187_vm0, %v997_v56  ;;  %v1371_v56 = vor.u32 %v1370_v49, %v1366_v48  ;;  %v2915_v49 = vld [vmem:[%s3351_s8 + $0x28] sm:$0xf] }
  0x7a   : > { %1255 = vmatpush.bf16.msra.mxu2 %v3221_v57  ;;  %v3236_v57 = vld [vmem:[%s3749_s1] sm:$0xff] }
  0x82   : > { %2756 = vmatmul.msk.bf16.vlgmr.msrb.gmra.mxu0 %vm187_vm0, %v2743_v60  ;;  %2769 = vmatmul.msk.bf16.vlgmr.msrb.gmra.mxu1 %vm187_vm0, %v1091_v61  ;;  %v1463_v60 = vrot.slane %v1461_v53, 1 }
  0x83   : > { %2785 = vmatmul.msk.bf16.vlgmr.msrb.gmra.mxu3 %vm187_vm0, %v2778_v62  ;;  %1328 = vmatpush.bf16.msrb.mxu0 %v3225_v2  ;;  %v2893_v2 = vld [vmem:[%s3351_s8 + $0x70] sm:$0xf] }
  0x84   : > { %1415 = vmatpush.bf16.msrb.mxu3 %v3228_v4  ;;  %1350 = vmatpush.bf16.msrb.mxu1 %v3224_v5  ;;  %v1464_v1 = vor.u32 %v1463_v60, %v1459_v59  ;;  %v2950_v59 = vld [vmem:[%s3351_s8 + $0x100] sm:$0xf] }
  0x89   : > { %2777 = vmatmul.msk.bf16.vlgmr.msrb.gmra.mxu2 %vm187_vm0, %v2770_v10  ;;  %v3238_v10 = vld [vmem:[%s3351_s8 + $0x28] sm:$0x10] }
  0x8a   : > { %1388 = vmatpush.bf16.msrb.mxu2 %v3227_v11  ;;  %v3244_v11 = vld [vmem:[%s3749_s1 + $0x30] sm:$0xff] }
  0x8f   : > { %v200_v17 = vpop.f32.mrf.mxu0  ;;  %v222_v18 = vpop.f32.mrf.mxu1 }
  0x90   : > { %v223_v36 = vadd.f32 %v222_v18, %v200_v17  ;;  %v2936_v17 = vor.u32 %v3238_v10, %v2935_v8 }
  0x92   : > { %2798 = vmatmul.msk.bf16.vlgmr.msra.gmra.mxu0 %vm187_vm0, %v1184_v16  ;;  %2806 = vmatmul.msk.bf16.vlgmr.msra.gmra.mxu1 %vm187_vm0, %v2799_v19  ;;  %v1646_v31 = vshrl.u32 %v2936_v17, 16 }
  0x93   : > { %2827 = vmatmul.msk.bf16.vlgmr.msra.gmra.mxu3 %vm187_vm0, %v1277_v20  ;;  %1442 = vmatpush.bf16.msra.mxu0 %v3229_v21  ;;  %v1554_v21 = vshll.u32 %v2908_v15, 16 }
  0x94   : > { %1535 = vmatpush.bf16.msra.mxu3 %v3233_v22  ;;  %1481 = vmatpush.bf16.msra.mxu1 %v3231_v23 }
  0x96   : > { %v289_v24 = vpop.f32.mrf.mxu3 }
  0x97   : > { %v202_v25 = vpop.f32.mrf.mxu0  ;;  %v224_v26 = vpop.f32.mrf.mxu1 }
  0x98   : > { %v1648_v25 = vshll.u32 %v2936_v17, 16  ;;  %v2885_v26 = vld [vmem:[%s3351_s8 + $0x28] sm:$0xf] }
  0x99   : > { %2814 = vmatmul.msk.bf16.vlgmr.msra.gmra.mxu2 %vm187_vm0, %v2807_v27  ;;  %v3243_v27 = vld [vmem:[%s3749_s1 + $0x28] sm:$0xff] }
  0x9a   : > { %1508 = vmatpush.bf16.msra.mxu2 %v3232_v30  ;;  %v1556_v30 = vrot.slane %v1554_v21, 1 }
  0x9c   : > { %v261_v32 = vpop.f32.mrf.mxu2 }
  0x9d   : > { %v265_v46 = vadd.f32 %v261_v32, %v223_v36  ;;  %v1650_v32 = vrot.slane %v1648_v25, 1 }
  0x9e   : > { %v291_v33 = vpop.f32.mrf.mxu3 }
  0x9f   : > { %v317_v37 = vpop.f32.mrf.mxu0  ;;  %v357_v38 = vpop.f32.mrf.mxu1  ;;  %v293_v50 = vadd.f32 %v289_v24, %v265_v46  ;;  %v1651_v39 = vor.u32 %v1650_v32, %v1646_v31 }
  0xa1   : > { %v321_v58 = vadd.f32 %v317_v37, %v293_v50  ;;  %v2964_v50 = vld [vmem:[%s3351_s8 + $0xb8] sm:$0xf] }
  0xa2   : > { %2837 = vmatmul.msk.bf16.vlgmr.msrb.gmra.mxu0 %vm187_vm0, %v2830_v34  ;;  %2842 = vmatmul.msk.bf16.vlgmr.msrb.gmra.mxu1 %vm187_vm0, %v2829_v35  ;;  %v1557_v35 = vor.u32 %v1556_v30, %v1552_v29  ;;  %v3001_v29 = vld [vmem:[%s3351_s8 + $0x30] sm:$0xf] }
  0xa3   : > { %2863 = vmatmul.msk.bf16.vlgmr.msrb.gmra.mxu3 %vm187_vm0, %v2856_v43  ;;  %1574 = vmatpush.bf16.msrb.mxu0 %v3235_v42  ;;  %v361_v61 = vadd.f32 %v357_v38, %v321_v58  ;;  %v2916_v38 = vld [vmem:[%s3351_s8 + $0x70] sm:$0xf]  ;;  %v3247_v42 = vld [vmem:[%s3749_s1 + $0x40] sm:$0xff]  ;;  %v2942_v58 = vld [vmem:[%s3351_s8 + $0xb8] sm:$0xf] }
  0xa4   : > { %1668 = vmatpush.bf16.msrb.mxu3 %v3239_v44  ;;  %1608 = vmatpush.bf16.msrb.mxu1 %v3237_v45  ;;  %v263_v51 = vpop.f32.mrf.mxu2  ;;  %v3021_v30 = vld [vmem:[%s3351_s8 + $0x30] sm:$0xf] }
  0xa5   : > { %v3242_v51 = vld [vmem:[%s3351_s8 + $0xb8] sm:$0x10] }
  0xa6   : > { %v413_v52 = vpop.f32.mrf.mxu3 }
  0xa7   : > { %v319_v54 = vpop.f32.mrf.mxu0  ;;  %v359_v55 = vpop.f32.mrf.mxu1 }
  0xa8   : > { %v2965_v54 = vor.u32 %v3242_v51, %v2964_v50 }
  0xa9   : > { %2855 = vmatmul.msk.bf16.vlgmr.msrb.gmra.mxu2 %vm187_vm0, %v1371_v56 }
  0xaa   : > { %1630 = vmatpush.bf16.msrb.mxu2 %v3236_v57 }
  0xac   : > { %v385_v62 = vpop.f32.mrf.mxu2 }
  0xad   : > { %v389_v4 = vadd.f32 %v385_v62, %v361_v61 }
  0xae   : > { %v415_v63 = vpop.f32.mrf.mxu3 }
  0xaf   : > { %v453_v5 = vpop.f32.mrf.mxu0  ;;  %v490_v6 = vpop.f32.mrf.mxu1  ;;  %v417_v13 = vadd.f32 %v413_v52, %v389_v4  ;;  %v3249_v52 = vld [vmem:[%s3749_s1 + $0x8] sm:$0xff]  ;;  %v1741_v63 = vshll.u32 %v2965_v54, 16 }
  0xb0   : > { %v3255_v4 = vld [vmem:[%s3749_s1 + $0x28] sm:$0xff] }
  0xb1   : > { %v457_v16 = vadd.f32 %v453_v5, %v417_v13  ;;  %v3252_v5 = vld [vmem:[%s3749_s1 + $0x18] sm:$0xff]  ;;  %v1743_v10 = vrot.slane %v1741_v63, 1  ;;  %v3260_v63 = vld [vmem:[%s3749_s1] sm:$0xff] }
  0xb2   : > { %2871 = vmatmul.msk.bf16.vlgmr.msra.gmra.mxu0 %vm187_vm0, %v2864_v0  ;;  %2884 = vmatmul.msk.bf16.vlgmr.msra.gmra.mxu1 %vm187_vm0, %v1464_v1  ;;  %v2993_v0 = vld [vmem:[%s3351_s8 + $0x30] sm:$0xf]  ;;  %v3246_v1 = vld [vmem:[%s3351_s8 + $0x30] sm:$0x10] }
  0xb3   : > { %2900 = vmatmul.msk.bf16.vlgmr.msra.gmra.mxu3 %vm187_vm0, %v2893_v2  ;;  %1695 = vmatpush.bf16.msra.mxu0 %v3240_v9  ;;  %v461_v18 = vadd.f32 %v3583_v14, %v457_v16  ;;  %v3251_v2 = vld [vmem:[%s3749_s1 + $0x10] sm:$0xff]  ;;  %v2994_v7 = vor.u32 %v3246_v1, %v2993_v0  ;;  %v1739_v9 = vshrl.u32 %v2965_v54, 16  ;;  %v3265_v0 = vld [vmem:[%s3749_s1 + $0x20] sm:$0xff] }
  0xb4   : > { %1788 = vmatpush.bf16.msra.mxu3 %v3244_v11  ;;  %1722 = vmatpush.bf16.msra.mxu1 %v3241_v12  ;;  %v387_v19 = vpop.f32.mrf.mxu2  ;;  %v3263_v1 = vld [vmem:[%s3749_s1 + $0x10] sm:$0xff] }
  0xb5   : > { %v462_v22 = vmax.f32 %v461_v18, 0.0  ;;  %v1834_v15 = vshll.u32 %v2994_v7, 16  ;;  %v1744_v19 = vor.u32 %v1743_v10, %v1739_v9  ;;  %v3079_v9 = vld [vmem:[%s3351_s8 + $0x38] sm:$0xf]  ;;  %v3258_v10 = vld [vmem:[%s3351_s8 + $0x38] sm:$0x10] }
  0xb6   : > { %v550_v20 = vpop.f32.mrf.mxu3 }
  0xb7   : > { %v455_v23 = vpop.f32.mrf.mxu0  ;;  %v492_v24 = vpop.f32.mrf.mxu1  ;;  %v463_v28 = vpack.c.bf16 %v462_v22, %v462_v22  ;;  %v1832_v22 = vshrl.u32 %v2994_v7, 16 }
  0xb8   : > { %v1836_v23 = vrot.slane %v1834_v15, 1 }
  0xb9   : > { %465 = vst.msk [vmem:[%s3593_s28] sm:$0xf] %vm464_vm1, %v463_v28  ;;  %2892 = vmatmul.msk.bf16.vlgmr.msra.gmra.mxu2 %vm187_vm0, %v2885_v26 }
  0xba   : > { %1761 = vmatpush.bf16.msra.mxu2 %v3243_v27  ;;  %v2979_v27 = vld [vmem:[%s3351_s8 + $0x78] sm:$0xf]  ;;  %v1837_v28 = vor.u32 %v1836_v23, %v1832_v22 }
  0xbc   : > { %v512_v33 = vpop.f32.mrf.mxu2 }
  0xbd   : > { %v513_v43 = vadd.f32 %v512_v33, %v490_v6  ;;  %v3250_v33 = vld [vmem:[%s3351_s8 + $0x30] sm:$0x10] }
  0xbe   : > { %v552_v34 = vpop.f32.mrf.mxu3 }
  0xbf   : > { %v577_v36 = vpop.f32.mrf.mxu0  ;;  %v604_v37 = vpop.f32.mrf.mxu1  ;;  %v554_v44 = vadd.f32 %v550_v20, %v513_v43  ;;  %v3253_v20 = vld [vmem:[%s3749_s1 + $0x20] sm:$0xff] }
  0xc0   : > { %v3050_v34 = vld [vmem:[%s3351_s8 + $0xc0] sm:$0xf] }
  0xc1   : > { %v581_v53 = vadd.f32 %v577_v36, %v554_v44  ;;  %v3254_v36 = vld [vmem:[%s3351_s8 + $0xc0] sm:$0x10] }
  0xc2   : > { %2913 = vmatmul.msk.bf16.vlgmr.msrb.gmra.mxu0 %vm187_vm0, %v1557_v35  ;;  %2923 = vmatmul.msk.bf16.vlgmr.msrb.gmra.mxu1 %vm187_vm0, %v2916_v38  ;;  %v3256_v35 = vld [vmem:[%s3749_s1 + $0x30] sm:$0xff]  ;;  %v3257_v38 = vld [vmem:[%s3749_s1 + $0x38] sm:$0xff] }
  0xc3   : > { %2941 = vmatmul.msk.bf16.vlgmr.msrb.gmra.mxu3 %vm187_vm0, %v1651_v39  ;;  %1815 = vmatpush.bf16.msrb.mxu0 %v3245_v40  ;;  %v608_v55 = vadd.f32 %v604_v37, %v581_v53  ;;  %v3261_v37 = vld [vmem:[%s3749_s1 + $0x8] sm:$0xff]  ;;  %v3022_v39 = vor.u32 %v3250_v33, %v3021_v30  ;;  %v3051_v40 = vor.u32 %v3254_v36, %v3050_v34 }
  0xc4   : > { %1910 = vmatpush.bf16.msrb.mxu3 %v3248_v41  ;;  %1854 = vmatpush.bf16.msrb.mxu1 %v3247_v42  ;;  %v514_v45 = vpop.f32.mrf.mxu2 }
  0xc5   : > { %v1928_v43 = vshll.u32 %v3022_v39, 16  ;;  %v1926_v50 = vshrl.u32 %v3022_v39, 16  ;;  %v2019_v53 = vshrl.u32 %v3051_v40, 16 }
  0xc6   : > { %v670_v46 = vpop.f32.mrf.mxu3 }
  0xc7   : > { %v579_v47 = vpop.f32.mrf.mxu0  ;;  %v606_v48 = vpop.f32.mrf.mxu1  ;;  %v1930_v51 = vrot.slane %v1928_v43, 1 }
  0xc8   : > { %v2021_v47 = vshll.u32 %v3051_v40, 16  ;;  %v3002_v48 = vld [vmem:[%s3351_s8 + $0x78] sm:$0xf] }
  0xc9   : > { %2928 = vmatmul.msk.bf16.vlgmr.msrb.gmra.mxu2 %vm187_vm0, %v2915_v49  ;;  %v3259_v49 = vld [vmem:[%s3749_s1 + $0x40] sm:$0xff] }
  0xca   : > { %1888 = vmatpush.bf16.msrb.mxu2 %v3249_v52  ;;  %v2023_v54 = vrot.slane %v2021_v47, 1 }
  0xcc   : > { %v643_v56 = vpop.f32.mrf.mxu2 }
  0xcd   : > { %v647_v60 = vadd.f32 %v643_v56, %v608_v55 }
  0xce   : > { %v672_v57 = vpop.f32.mrf.mxu3 }
  0xcf   : > { %v697_v61 = vpop.f32.mrf.mxu0  ;;  %v736_v62 = vpop.f32.mrf.mxu1  ;;  %v674_v6 = vadd.f32 %v670_v46, %v647_v60  ;;  %v1931_v57 = vor.u32 %v1930_v51, %v1926_v50 }
  0xd1   : > { %v701_v8 = vadd.f32 %v697_v61, %v674_v6  ;;  %v3028_v61 = vld [vmem:[%s3351_s8 + $0xc0] sm:$0xf] }
  0xd2   : > { %2949 = vmatmul.msk.bf16.vlgmr.msra.gmra.mxu0 %vm187_vm0, %v2942_v58  ;;  %2957 = vmatmul.msk.bf16.vlgmr.msra.gmra.mxu1 %vm187_vm0, %v2950_v59 }
  0xd3   : > { %2978 = vmatmul.msk.bf16.vlgmr.msra.gmra.mxu3 %vm187_vm0, %v2971_v3  ;;  %1948 = vmatpush.bf16.msra.mxu0 %v3251_v2  ;;  %v740_v11 = vadd.f32 %v736_v62, %v701_v8  ;;  %v2024_v62 = vor.u32 %v2023_v54, %v2019_v53  ;;  %v3036_v8 = vld [vmem:[%s3351_s8 + $0x108] sm:$0xf]  ;;  %v3266_v54 = vld [vmem:[%s3351_s8 + $0xc8] sm:$0x10] }
  0xd4   : > { %2041 = vmatpush.bf16.msra.mxu3 %v3255_v4  ;;  %1975 = vmatpush.bf16.msra.mxu1 %v3252_v5  ;;  %v645_v12 = vpop.f32.mrf.mxu2  ;;  %v3136_v53 = vld [vmem:[%s3351_s8 + $0xc8] sm:$0xf] }
  0xd5   : > { %v741_v16 = vadd.f32 %v3583_v14, %v740_v11  ;;  %v3264_v11 = vld [vmem:[%s3749_s1 + $0x18] sm:$0xff] }
  0xd6   : > { %v792_v13 = vpop.f32.mrf.mxu3 }
  0xd7   : > { %v699_v17 = vpop.f32.mrf.mxu0  ;;  %v738_v18 = vpop.f32.mrf.mxu1  ;;  %v742_v21 = vmax.f32 %v741_v16, 0.0 }
  0xd8   : > { %v3057_v18 = vld [vmem:[%s3351_s8 + $0x38] sm:$0xf] }
  0xd9   : > { %v743_v24 = vpack.c.bf16 %v742_v21, %v742_v21  ;;  %2970 = vmatmul.msk.bf16.vlgmr.msra.gmra.mxu2 %vm187_vm0, %v1744_v19  ;;  %v3065_v19 = vld [vmem:[%s3351_s8 + $0x80] sm:$0xf] }
  0xda   : > { %2002 = vmatpush.bf16.msra.mxu2 %v3253_v20 }
  0xdb   : > { %2656 = vst.msk [vmem:[%s3593_s28 + $0x4] sm:$0xf] %vm464_vm1, %v743_v24  ;;  %v3107_v24 = vld [vmem:[%s3351_s8 + $0x38] sm:$0xf] }
  0xdc   : > { %v770_v25 = vpop.f32.mrf.mxu2 }
  0xdd   : > { %v793_v44 = vadd.f32 %v792_v13, %v770_v25  ;;  %v3080_v13 = vor.u32 %v3258_v10, %v3079_v9  ;;  %v3262_v25 = vld [vmem:[%s3351_s8 + $0x38] sm:$0x10] }
  0xde   : > { %v794_v26 = vpop.f32.mrf.mxu3  ;;  %v3108_v30 = vor.u32 %v3262_v25, %v3107_v24 }
  0xdf   : > { %v830_v31 = vpop.f32.mrf.mxu0  ;;  %v857_v32 = vpop.f32.mrf.mxu1  ;;  %v2114_v23 = vshll.u32 %v3080_v13, 16  ;;  %v3267_v26 = vld [vmem:[%s3749_s1 + $0x28] sm:$0xff]  ;;  %v2112_v33 = vshrl.u32 %v3080_v13, 16 }
  0xe0   : > { %v834_v52 = vadd.f32 %v830_v31, %v793_v44  ;;  %v3268_v31 = vld [vmem:[%s3749_s1 + $0x30] sm:$0xff]  ;;  %v2206_v43 = vshrl.u32 %v3108_v30, 16 }
  0xe1   : > { %v2116_v34 = vrot.slane %v2114_v23, 1 }
  0xe2   : > { %2986 = vmatmul.msk.bf16.vlgmr.msrb.gmra.mxu0 %vm187_vm0, %v2979_v27  ;;  %2999 = vmatmul.msk.bf16.vlgmr.msrb.gmra.mxu1 %vm187_vm0, %v1837_v28  ;;  %v861_v58 = vadd.f32 %v857_v32, %v834_v52  ;;  %v3088_v27 = vld [vmem:[%s3351_s8 + $0x80] sm:$0xf]  ;;  %v3087_v52 = vld [vmem:[%s3351_s8 + $0x38] sm:$0xf] }
  0xe3   : > { %3014 = vmatmul.msk.bf16.vlgmr.msrb.gmra.mxu3 %vm187_vm0, %v3001_v29  ;;  %2068 = vmatpush.bf16.msrb.mxu0 %v3256_v35  ;;  %v3271_v28 = vld [vmem:[%s3749_s1 + $0x40] sm:$0xff] }
  0xe4   : > { %2168 = vmatpush.bf16.msrb.mxu3 %v3261_v37  ;;  %2095 = vmatpush.bf16.msrb.mxu1 %v3257_v38  ;;  %v772_v41 = vpop.f32.mrf.mxu2  ;;  %v2208_v38 = vshll.u32 %v3108_v30, 16 }
  0xe5   : > { %v2117_v41 = vor.u32 %v2116_v34, %v2112_v33 }
  0xe6   : > { %v923_v42 = vpop.f32.mrf.mxu3  ;;  %v2210_v44 = vrot.slane %v2208_v38, 1 }
  0xe7   : > { %v832_v45 = vpop.f32.mrf.mxu0  ;;  %v859_v46 = vpop.f32.mrf.mxu1 }
  0xe9   : > { %3009 = vmatmul.msk.bf16.vlgmr.msrb.gmra.mxu2 %vm187_vm0, %v3002_v48  ;;  %v2211_v48 = vor.u32 %v2210_v44, %v2206_v43 }
  0xea   : > { %2134 = vmatpush.bf16.msrb.mxu2 %v3259_v49 }
  0xec   : > { %v884_v55 = vpop.f32.mrf.mxu2 }
  0xed   : > { %v888_v2 = vadd.f32 %v884_v55, %v861_v58  ;;  %v3122_v55 = vld [vmem:[%s3351_s8 + $0x110] sm:$0xf] }
  0xee   : > { %v925_v56 = vpop.f32.mrf.mxu3 }
  0xef   : > { %v950_v59 = vpop.f32.mrf.mxu0  ;;  %v977_v60 = vpop.f32.mrf.mxu1  ;;  %v927_v3 = vadd.f32 %v923_v42, %v888_v2  ;;  %v3269_v42 = vld [vmem:[%s3749_s1 + $0x38] sm:$0xff]  ;;  %v3165_v56 = vld [vmem:[%s3351_s8 + $0x40] sm:$0xf] }
  0xf1   : > { %v954_v12 = vadd.f32 %v950_v59, %v927_v3  ;;  %v3137_v59 = vor.u32 %v3266_v54, %v3136_v53 }
  0xf2   : > { %3027 = vmatmul.msk.bf16.vlgmr.msra.gmra.mxu0 %vm187_vm0, %v1931_v57  ;;  %3035 = vmatmul.msk.bf16.vlgmr.msra.gmra.mxu1 %vm187_vm0, %v3028_v61  ;;  %v3270_v57 = vld [vmem:[%s3351_s8 + $0x40] sm:$0x10] }
  0xf3   : > { %3056 = vmatmul.msk.bf16.vlgmr.msra.gmra.mxu3 %vm187_vm0, %v2024_v62  ;;  %2190 = vmatpush.bf16.msra.mxu0 %v3260_v63  ;;  %v981_v15 = vadd.f32 %v977_v60, %v954_v12  ;;  %v3166_v60 = vor.u32 %v3270_v57, %v3165_v56 }
  0xf4   : > { %2282 = vmatpush.bf16.msra.mxu3 %v3265_v0  ;;  %2228 = vmatpush.bf16.msra.mxu1 %v3263_v1  ;;  %v886_v4 = vpop.f32.mrf.mxu2  ;;  %v2301_v0 = vshll.u32 %v3137_v59, 16 }
  0xf5   : > { %v2394_v3 = vshll.u32 %v3166_v60, 16  ;;  %v3114_v4 = vld [vmem:[%s3351_s8 + $0xc8] sm:$0xf] }
  0xf6   : > { %v1050_v5 = vpop.f32.mrf.mxu3 }
  0xf7   : > { %v952_v6 = vpop.f32.mrf.mxu0  ;;  %v979_v7 = vpop.f32.mrf.mxu1  ;;  %v2396_v9 = vrot.slane %v2394_v3, 1 }
  0xf8   : > { %v2299_v6 = vshrl.u32 %v3137_v59, 16  ;;  %v2303_v7 = vrot.slane %v2301_v0, 1 }
  0xf9   : > { %3043 = vmatmul.msk.bf16.vlgmr.msra.gmra.mxu2 %vm187_vm0, %v3036_v8  ;;  %v2392_v8 = vshrl.u32 %v3166_v60, 16 }
  0xfa   : > { %2255 = vmatpush.bf16.msra.mxu2 %v3264_v11  ;;  %v2304_v13 = vor.u32 %v2303_v7, %v2299_v6 }
  0xfc   : > { %v1016_v16 = vpop.f32.mrf.mxu2 }
  0xfd   : > { %v1020_v20 = vadd.f32 %v1016_v16, %v981_v15 }
  0xfe   : > { %v1052_v17 = vpop.f32.mrf.mxu3 }
  0xff   : > { %v1072_v21 = vpop.f32.mrf.mxu0  ;;  %v1110_v22 = vpop.f32.mrf.mxu1  ;;  %v1021_v29 = vadd.f32 %v3583_v14, %v1020_v20 }
 0x100   : > { %v1073_v45 = vadd.f32 %v1072_v21, %v1050_v5 }
 0x101   : > { %v1022_v32 = vmax.f32 %v1021_v29, 0.0 }
 0x102   : > { %3064 = vmatmul.msk.bf16.vlgmr.msrb.gmra.mxu0 %vm187_vm0, %v3057_v18  ;;  %3072 = vmatmul.msk.bf16.vlgmr.msrb.gmra.mxu1 %vm187_vm0, %v3065_v19  ;;  %v1114_v49 = vadd.f32 %v1110_v22, %v1073_v45  ;;  %v2397_v18 = vor.u32 %v2396_v9, %v2392_v8  ;;  %v3143_v19 = vld [vmem:[%s3351_s8 + $0x40] sm:$0xf] }
 0x103   : > { %3095 = vmatmul.msk.bf16.vlgmr.msrb.gmra.mxu3 %vm187_vm0, %v3088_v27  ;;  %2321 = vmatpush.bf16.msrb.mxu0 %v3267_v26  ;;  %v1023_v35 = vpack.c.bf16 %v1022_v32, %v1022_v32 }
 0x104   : > { %2414 = vmatpush.bf16.msrb.mxu3 %v3271_v28  ;;  %2348 = vmatpush.bf16.msrb.mxu1 %v3268_v31  ;;  %v1018_v36 = vpop.f32.mrf.mxu2  ;;  %v3151_v28 = vld [vmem:[%s3351_s8 + $0x88] sm:$0xf] }
 0x105   : > { %2742 = vst.msk [vmem:[%s3593_s28 + $0x8] sm:$0xf] %vm464_vm1, %v1023_v35 }
 0x106   : > { %v1164_v37 = vpop.f32.mrf.mxu3 }
 0x107   : > { %v1074_v39 = vpop.f32.mrf.mxu0  ;;  %v1112_v40 = vpop.f32.mrf.mxu1 }
 0x109   : > { %3085 = vmatmul.msk.bf16.vlgmr.msrb.gmra.mxu2 %vm187_vm0, %v2117_v41 }
 0x10a   : > { %2375 = vmatpush.bf16.msrb.mxu2 %v3269_v42 }
 0x10c   : > { %v1137_v46 = vpop.f32.mrf.mxu2 }
 0x10d   : > { %v1141_v58 = vadd.f32 %v1137_v46, %v1114_v49 }
 0x10e   : > { %v1166_v47 = vpop.f32.mrf.mxu3 }
 0x10f   : > { %v1203_v50 = vpop.f32.mrf.mxu0  ;;  %v1230_v51 = vpop.f32.mrf.mxu1  ;;  %v1168_v61 = vadd.f32 %v1164_v37, %v1141_v58 }
 0x111   : > { %v1207_v5 = vadd.f32 %v1203_v50, %v1168_v61 }
 0x112   : > { %3100 = vmatmul.msk.bf16.vlgmr.msra.gmra.mxu0 %vm187_vm0, %v3087_v52  ;;  %3113 = vmatmul.msk.bf16.vlgmr.msra.gmra.mxu1 %vm187_vm0, %v2211_v48 }
 0x113   : > { %3129 = vmatmul.msk.bf16.vlgmr.msra.gmra.mxu3 %vm187_vm0, %v3122_v55  ;;  %v1234_v10 = vadd.f32 %v1230_v51, %v1207_v5 }
 0x114   : > { %v1139_v62 = vpop.f32.mrf.mxu2 }
 0x116   : > { %v1296_v63 = vpop.f32.mrf.mxu3 }
 0x117   : > { %v1205_v1 = vpop.f32.mrf.mxu0  ;;  %v1232_v2 = vpop.f32.mrf.mxu1 }
 0x119   : > { %3121 = vmatmul.msk.bf16.vlgmr.msra.gmra.mxu2 %vm187_vm0, %v3114_v4 }
 0x11c   : > { %v1257_v11 = vpop.f32.mrf.mxu2 }
 0x11d   : > { %v1261_v15 = vadd.f32 %v1257_v11, %v1234_v10 }
 0x11e   : > { %v1298_v12 = vpop.f32.mrf.mxu3 }
 0x11f   : > { %v1330_v16 = vpop.f32.mrf.mxu0  ;;  %v1352_v17 = vpop.f32.mrf.mxu1  ;;  %v1300_v20 = vadd.f32 %v1296_v63, %v1261_v15 }
 0x120   : > { %v1353_v31 = vadd.f32 %v1352_v17, %v1330_v16 }
 0x121   : > { %v1301_v21 = vadd.f32 %v3583_v14, %v1300_v20 }
 0x122   : > { %3142 = vmatmul.msk.bf16.vlgmr.msrb.gmra.mxu0 %vm187_vm0, %v2304_v13  ;;  %3150 = vmatmul.msk.bf16.vlgmr.msrb.gmra.mxu1 %vm187_vm0, %v3143_v19 }
 0x123   : > { %3171 = vmatmul.msk.bf16.vlgmr.msrb.gmra.mxu3 %vm187_vm0, %v2397_v18  ;;  %v1302_v22 = vmax.f32 %v1301_v21, 0.0 }
 0x124   : > { %v1259_v23 = vpop.f32.mrf.mxu2 }
 0x125   : > { %v1303_v25 = vpack.c.bf16 %v1302_v22, %v1302_v22 }
 0x126   : > { %v1417_v24 = vpop.f32.mrf.mxu3 }
 0x127   : > { %v1332_v26 = vpop.f32.mrf.mxu0  ;;  %v1354_v27 = vpop.f32.mrf.mxu1  ;;  %2828 = vst.msk [vmem:[%s3593_s28 + $0xc] sm:$0xf] %vm464_vm1, %v1303_v25 }
 0x129   : > { %3158 = vmatmul.msk.bf16.vlgmr.msrb.gmra.mxu2 %vm187_vm0, %v3151_v28 }
 0x12c   : > { %v1390_v29 = vpop.f32.mrf.mxu2 }
 0x12d   : > { %v1394_v34 = vadd.f32 %v1390_v29, %v1353_v31 }
 0x12e   : > { %v1419_v30 = vpop.f32.mrf.mxu3 }
 0x12f   : > { %v1444_v32 = vpop.f32.mrf.mxu0  ;;  %v1483_v33 = vpop.f32.mrf.mxu1  ;;  %v1421_v35 = vadd.f32 %v1417_v24, %v1394_v34 }
 0x131   : > { %v1448_v40 = vadd.f32 %v1444_v32, %v1421_v35 }
 0x133   : > { %v1487_v41 = vadd.f32 %v1483_v33, %v1448_v40 }
 0x134   : > { %v1392_v36 = vpop.f32.mrf.mxu2 }
 0x136   : > { %v1537_v37 = vpop.f32.mrf.mxu3 }
 0x137   : > { %v1446_v38 = vpop.f32.mrf.mxu0  ;;  %v1485_v39 = vpop.f32.mrf.mxu1 }
 0x13c   : > { %v1510_v42 = vpop.f32.mrf.mxu2 }
 0x13d   : > { %v1514_v44 = vadd.f32 %v1510_v42, %v1487_v41 }
 0x13e   : > { %v1539_v43 = vpop.f32.mrf.mxu3 }
 0x13f   : > { %v1576_v45 = vpop.f32.mrf.mxu0  ;;  %v1610_v46 = vpop.f32.mrf.mxu1  ;;  %v1541_v47 = vadd.f32 %v1537_v37, %v1514_v44 }
 0x141   : > { %v1580_v48 = vadd.f32 %v1576_v45, %v1541_v47 }
 0x143   : > { %v1581_v49 = vadd.f32 %v3583_v14, %v1580_v48 }
 0x144   : > { %v1512_v50 = vpop.f32.mrf.mxu2 }
 0x145   : > { %v1582_v52 = vmax.f32 %v1581_v49, 0.0 }
 0x146   : > { %v1670_v51 = vpop.f32.mrf.mxu3 }
 0x147   : > { %v1578_v53 = vpop.f32.mrf.mxu0  ;;  %v1612_v54 = vpop.f32.mrf.mxu1  ;;  %v1583_v55 = vpack.c.bf16 %v1582_v52, %v1582_v52 }
 0x149   : > { %2914 = vst.msk [vmem:[%s3593_s28 + $0x10] sm:$0xf] %vm464_vm1, %v1583_v55 }
 0x14c   : > { %v1632_v56 = vpop.f32.mrf.mxu2 }
 0x14d   : > { %v1633_v60 = vadd.f32 %v1632_v56, %v1610_v46 }
 0x14e   : > { %v1672_v57 = vpop.f32.mrf.mxu3 }
 0x14f   : > { %v1697_v58 = vpop.f32.mrf.mxu0  ;;  %v1724_v59 = vpop.f32.mrf.mxu1  ;;  %v1674_v61 = vadd.f32 %v1670_v51, %v1633_v60 }
 0x151   : > { %v1701_v2 = vadd.f32 %v1697_v58, %v1674_v61 }
 0x153   : > { %v1728_v3 = vadd.f32 %v1724_v59, %v1701_v2 }
 0x154   : > { %v1634_v62 = vpop.f32.mrf.mxu2 }
 0x156   : > { %v1790_v63 = vpop.f32.mrf.mxu3 }
 0x157   : > { %v1699_v0 = vpop.f32.mrf.mxu0  ;;  %v1726_v1 = vpop.f32.mrf.mxu1 }
 0x15c   : > { %v1763_v4 = vpop.f32.mrf.mxu2 }
 0x15d   : > { %v1767_v6 = vadd.f32 %v1763_v4, %v1728_v3 }
 0x15e   : > { %v1792_v5 = vpop.f32.mrf.mxu3 }
 0x15f   : > { %v1817_v7 = vpop.f32.mrf.mxu0  ;;  %v1856_v8 = vpop.f32.mrf.mxu1  ;;  %v1794_v9 = vadd.f32 %v1790_v63, %v1767_v6 }
 0x161   : > { %v1821_v10 = vadd.f32 %v1817_v7, %v1794_v9 }
 0x163   : > { %v1860_v11 = vadd.f32 %v1856_v8, %v1821_v10 }
 0x164   : > { %v1765_v12 = vpop.f32.mrf.mxu2 }
 0x165   : > { %v1861_v15 = vadd.f32 %v3583_v14, %v1860_v11 }
 0x166   : > { %v1912_v13 = vpop.f32.mrf.mxu3 }
 0x167   : > { %v1819_v16 = vpop.f32.mrf.mxu0  ;;  %v1858_v17 = vpop.f32.mrf.mxu1  ;;  %v1862_v18 = vmax.f32 %v1861_v15, 0.0 }
 0x169   : > { %v1863_v19 = vpack.c.bf16 %v1862_v18, %v1862_v18 }
 0x16b   : > { %3000 = vst.msk [vmem:[%s3593_s28 + $0x14] sm:$0xf] %vm464_vm1, %v1863_v19 }
 0x16c   : > { %v1890_v20 = vpop.f32.mrf.mxu2 }
 0x16d   : > { %v1913_v26 = vadd.f32 %v1912_v13, %v1890_v20 }
 0x16e   : > { %v1914_v21 = vpop.f32.mrf.mxu3 }
 0x16f   : > { %v1950_v22 = vpop.f32.mrf.mxu0  ;;  %v1977_v23 = vpop.f32.mrf.mxu1 }
 0x170   : > { %v1954_v29 = vadd.f32 %v1950_v22, %v1913_v26 }
 0x172   : > { %v1981_v32 = vadd.f32 %v1977_v23, %v1954_v29 }
 0x174   : > { %v1892_v24 = vpop.f32.mrf.mxu2 }
 0x176   : > { %v2043_v25 = vpop.f32.mrf.mxu3 }
 0x177   : > { %v1952_v27 = vpop.f32.mrf.mxu0  ;;  %v1979_v28 = vpop.f32.mrf.mxu1 }
 0x17c   : > { %v2004_v30 = vpop.f32.mrf.mxu2 }
 0x17d   : > { %v2008_v35 = vadd.f32 %v2004_v30, %v1981_v32 }
 0x17e   : > { %v2045_v31 = vpop.f32.mrf.mxu3 }
 0x17f   : > { %v2070_v33 = vpop.f32.mrf.mxu0  ;;  %v2097_v34 = vpop.f32.mrf.mxu1  ;;  %v2047_v36 = vadd.f32 %v2043_v25, %v2008_v35 }
 0x181   : > { %v2074_v41 = vadd.f32 %v2070_v33, %v2047_v36 }
 0x183   : > { %v2101_v42 = vadd.f32 %v2097_v34, %v2074_v41 }
 0x184   : > { %v2006_v37 = vpop.f32.mrf.mxu2 }
 0x186   : > { %v2170_v38 = vpop.f32.mrf.mxu3 }
 0x187   : > { %v2072_v39 = vpop.f32.mrf.mxu0  ;;  %v2099_v40 = vpop.f32.mrf.mxu1 }
 0x18c   : > { %v2136_v43 = vpop.f32.mrf.mxu2 }
 0x18d   : > { %v2140_v45 = vadd.f32 %v2136_v43, %v2101_v42 }
 0x18e   : > { %v2172_v44 = vpop.f32.mrf.mxu3 }
 0x18f   : > { %v2192_v46 = vpop.f32.mrf.mxu0  ;;  %v2230_v47 = vpop.f32.mrf.mxu1  ;;  %v2141_v48 = vadd.f32 %v3583_v14, %v2140_v45 }
 0x190   : > { %v2193_v55 = vadd.f32 %v2192_v46, %v2170_v38 }
 0x191   : > { %v2142_v49 = vmax.f32 %v2141_v48, 0.0 }
 0x192   : > { %v2234_v58 = vadd.f32 %v2230_v47, %v2193_v55 }
 0x193   : > { %v2143_v50 = vpack.c.bf16 %v2142_v49, %v2142_v49 }
 0x194   : > { %v2138_v51 = vpop.f32.mrf.mxu2 }
 0x195   : > { %3086 = vst.msk [vmem:[%s3593_s28 + $0x18] sm:$0xf] %vm464_vm1, %v2143_v50 }
 0x196   : > { %v2284_v52 = vpop.f32.mrf.mxu3 }
 0x197   : > { %v2194_v53 = vpop.f32.mrf.mxu0  ;;  %v2232_v54 = vpop.f32.mrf.mxu1 }
 0x19c   : > { %v2257_v56 = vpop.f32.mrf.mxu2 }
 0x19d   : > { %v2261_v61 = vadd.f32 %v2257_v56, %v2234_v58 }
 0x19e   : > { %v2286_v57 = vpop.f32.mrf.mxu3 }
 0x19f   : > { %v2323_v59 = vpop.f32.mrf.mxu0  ;;  %v2350_v60 = vpop.f32.mrf.mxu1  ;;  %v2288_v62 = vadd.f32 %v2284_v52, %v2261_v61 }
 0x1a1   : > { %v2327_v3 = vadd.f32 %v2323_v59, %v2288_v62 }
 0x1a3   : > { %v2354_v4 = vadd.f32 %v2350_v60, %v2327_v3 }
 0x1a4   : > { %v2259_v63 = vpop.f32.mrf.mxu2 }
 0x1a6   : > { %v2416_v0 = vpop.f32.mrf.mxu3 }
 0x1a7   : > { %v2325_v1 = vpop.f32.mrf.mxu0  ;;  %v2352_v2 = vpop.f32.mrf.mxu1 }
 0x1ac   : > { %v2377_v5 = vpop.f32.mrf.mxu2 }
 0x1ad   : > { %v2381_v7 = vadd.f32 %v2377_v5, %v2354_v4 }
 0x1ae   : > { %v2418_v6 = vpop.f32.mrf.mxu3 }
 0x1af   : > { %v2420_v8 = vadd.f32 %v2416_v0, %v2381_v7 }
 0x1b1   : > { %v2421_v9 = vadd.f32 %v3583_v14, %v2420_v8 }
 0x1b3   : > { %v2422_v10 = vmax.f32 %v2421_v9, 0.0 }
 0x1b4   : > { %v2379_v11 = vpop.f32.mrf.mxu2 }
 0x1b5   : > { %v2423_v12 = vpack.c.bf16 %v2422_v10, %v2422_v10 }
 0x1b7   : > { %3172 = vst.msk [vmem:[%s3593_s28 + $0x1c] sm:$0xf] %vm464_vm1, %v2423_v12 }
 0x1b8 PF: > { %s13_s12 = sadd.s32 1, %s3288_s12  }
 0x1b9   : > { %p10_p4 = scmp.ge.s32.totalorder %s13_s12, 4  }
 0x1bb   :  { %12 = sbr.rel (!%p10_p4) target bundleno = 1 (0x1), region = 110 }

</bundles_post_ra>
